<compile_context>
chip_gen: v7x
topology: tpu7x:2x2x1
jax: 0.10.0
libtpu: 0.0.40
codegen_flags: <defaults>
</compile_context>

<pallas_src>
import functools

import jax
import jax.numpy as jnp
from jax import lax
from jax.experimental import pallas as pl
from jax.experimental.pallas import tpu as pltpu


def _round_up(x, m):
    return (x + m - 1) // m * m


def _cdiv(a, b):
    return (a + b - 1) // b


# -----------------------------------------------------------------------------
# Tile-size selection: multiple of 16 (bf16 sublane packing), bounded by an
# activation-block VMEM budget, and split so a v7x megacore gets >= 2 blocks.
# -----------------------------------------------------------------------------
def _pick_tm(batch, m, act_bytes_per_row, tm_max):
    tm = min(tm_max, _round_up(m, 16))
    # keep double-buffered activation blocks comfortably inside scoped VMEM
    while tm > 128 and 2 * tm * act_bytes_per_row > 8 * 1024 * 1024:
        tm = _round_up(tm // 2, 16)
    # v7x: expose at least two parallel grid blocks so both TensorCores work
    while tm > 16 and batch * _cdiv(m, tm) < 2:
        tm = _round_up(tm // 2, 16)
    return tm


# -----------------------------------------------------------------------------
# Kernel A: multi-input full-K matmul with fused bias + ReLU epilogue and an
# optional fused classifier head:  out = act(sum_i x_i @ w_i + b) (@ hw + hb)
# -----------------------------------------------------------------------------
def _fused_matmul_kernel(*refs, n_x, relu, has_head):
    xs = refs[:n_x]
    ws = refs[n_x:2 * n_x]
    b_ref = refs[2 * n_x]
    pos = 2 * n_x + 1
    hw_ref = hb_ref = None
    if has_head:
        hw_ref, hb_ref = refs[pos], refs[pos + 1]
        pos += 2
    o_ref = refs[pos]

    acc = jnp.dot(xs[0][0], ws[0][...], preferred_element_type=jnp.float32)
    for i in range(1, n_x):
        acc = acc + jnp.dot(xs[i][0], ws[i][...],
                            preferred_element_type=jnp.float32)
    y = acc + b_ref[...]
    if relu:
        y = jnp.maximum(y, 0.0)
    if has_head:
        y = jnp.dot(y.astype(hw_ref.dtype), hw_ref[...],
                    preferred_element_type=jnp.float32) + hb_ref[...]
    o_ref[0] = y.astype(o_ref.dtype)


def fused_matmul(xs, ws, bias, head_w=None, head_b=None, relu=True,
                 out_dtype=jnp.bfloat16, use_pallas=True, tm_max=1024,
                 tn_max=256):
    """out[b,m,:] = act(sum_i xs[i][b,m,:] @ ws[i] + bias)  (optionally @hw+hb).

    xs[i]: (B, M, K_i) bf16 with K_i == ws[i].shape[0] (lane-dense, padded once
    at init / input boundary).  ws[i]: (K_i, Np) bf16 (BN scale folded).
    bias: (1, Np) f32.  head_w: (Np, Nh) bf16, head_b: (1, Nh) f32.
    """
    n_x = len(xs)
    B, M, _ = xs[0].shape
    Np = ws[0].shape[1]

    if not use_pallas:   # plain-JAX reference of the same math / precision
        acc = jnp.einsum('bmk,kn->bmn', xs[0], ws[0],
                         preferred_element_type=jnp.float32)
        for i in range(1, n_x):
            acc = acc + jnp.einsum('bmk,kn->bmn', xs[i], ws[i],
                                   preferred_element_type=jnp.float32)
        y = acc + bias
        if relu:
            y = jnp.maximum(y, 0.0)
        if head_w is not None:
            y = jnp.einsum('bmn,nh->bmh', y.astype(head_w.dtype), head_w,
                           preferred_element_type=jnp.float32) + head_b
        return y.astype(out_dtype)

    if Np <= tn_max:
        tn = Np
    else:
        tn = tn_max if Np % tn_max == 0 else 128
    if head_w is not None:
        assert tn == Np, "classifier fusion requires a single N tile"
        n_out_total = head_w.shape[1]
        tn_out = n_out_total
    else:
        n_out_total = Np
        tn_out = tn

    act_bytes = sum(int(x.shape[2]) * x.dtype.itemsize for x in xs)
    tm = _pick_tm(B, M, act_bytes, tm_max)
    grid = (B, _cdiv(M, tm), Np // tn)

    in_specs, args = [], []
    for x in xs:
        in_specs.append(pl.BlockSpec((1, tm, x.shape[2]),
                                     lambda b, i, j: (b, i, 0)))
        args.append(x)
    for w in ws:
        in_specs.append(pl.BlockSpec((w.shape[0], tn), lambda b, i, j: (0, j)))
        args.append(w)
    in_specs.append(pl.BlockSpec((1, tn), lambda b, i, j: (0, j)))
    args.append(bias)
    if head_w is not None:
        in_specs.append(pl.BlockSpec(head_w.shape, lambda b, i, j: (0, 0)))
        args.append(head_w)
        in_specs.append(pl.BlockSpec(head_b.shape, lambda b, i, j: (0, 0)))
        args.append(head_b)

    kernel = functools.partial(_fused_matmul_kernel, n_x=n_x, relu=relu,
                               has_head=head_w is not None)
    return pl.pallas_call(
        kernel,
        out_shape=jax.ShapeDtypeStruct((B, M, n_out_total), out_dtype),
        grid_spec=pltpu.PrefetchScalarGridSpec(
            num_scalar_prefetch=0,
            grid=grid,
            in_specs=in_specs,
            out_specs=pl.BlockSpec((1, tm, tn_out), lambda b, i, j: (b, i, j)),
        ),
        compiler_params=pltpu.CompilerParams(
            dimension_semantics=("parallel", "parallel", "parallel"),
            vmem_limit_bytes=32 * 1024 * 1024),
    )(*args)


# -----------------------------------------------------------------------------
# Kernel B: fused ASPP (branch 1x1 + BN + ReLU, projected and accumulated):
#   out = relu( sum_i relu(x_i @ w_i + b_i) @ p_i  +  proj_b  +  extra[b] )
# Branch activations never hit HBM; `extra` is the global-pool branch term.
# -----------------------------------------------------------------------------
def _aspp_project_kernel(*refs, n_b):
    xs = refs[:n_b]
    ws = refs[n_b:2 * n_b]
    bs = refs[2 * n_b:3 * n_b]
    ps = refs[3 * n_b:4 * n_b]
    pb_ref = refs[4 * n_b]
    extra_ref = refs[4 * n_b + 1]
    o_ref = refs[4 * n_b + 2]

    acc = None
    for i in range(n_b):
        y = jnp.dot(xs[i][0], ws[i][...], preferred_element_type=jnp.float32)
        y = jnp.maximum(y + bs[i][...], 0.0)
        t = jnp.dot(y.astype(ps[i].dtype), ps[i][...],
                    preferred_element_type=jnp.float32)
        acc = t if acc is None else acc + t
    y = acc + pb_ref[...] + extra_ref[0]
    o_ref[0] = jnp.maximum(y, 0.0).astype(o_ref.dtype)


def aspp_project(xs, branch_ws, branch_bs, proj_ws, proj_b, extra,
                 out_dtype=jnp.bfloat16, use_pallas=True, tm_max=512):
    n_b = len(xs)
    B, M, _ = xs[0].shape
    N = proj_ws[0].shape[1]

    if not use_pallas:   # plain-JAX reference of the same math / precision
        acc = jnp.zeros((B, M, N), jnp.float32)
        for x, w, b, p in zip(xs, branch_ws, branch_bs, proj_ws):
            y = jnp.einsum('bmk,kn->bmn', x, w,
                           preferred_element_type=jnp.float32) + b
            y = jnp.maximum(y, 0.0)
            acc = acc + jnp.einsum('bmn,nh->bmh', y.astype(p.dtype), p,
                                   preferred_element_type=jnp.float32)
        y = acc + proj_b + extra
        return jnp.maximum(y, 0.0).astype(out_dtype)

    act_bytes = sum(int(x.shape[2]) * x.dtype.itemsize for x in xs)
    tm = _pick_tm(B, M, act_bytes, tm_max)
    grid = (B, _cdiv(M, tm))

    in_specs, args = [], []
    for x in xs:
        in_specs.append(pl.BlockSpec((1, tm, x.shape[2]),
                                     lambda b, i: (b, i, 0)))
        args.append(x)
    for w in branch_ws:
        in_specs.append(pl.BlockSpec(w.shape, lambda b, i: (0, 0)))
        args.append(w)
    for b_ in branch_bs:
        in_specs.append(pl.BlockSpec(b_.shape, lambda b, i: (0, 0)))
        args.append(b_)
    for p_ in proj_ws:
        in_specs.append(pl.BlockSpec(p_.shape, lambda b, i: (0, 0)))
        args.append(p_)
    in_specs.append(pl.BlockSpec(proj_b.shape, lambda b, i: (0, 0)))
    args.append(proj_b)
    in_specs.append(pl.BlockSpec((1, 1, N), lambda b, i: (b, 0, 0)))
    args.append(extra)

    kernel = functools.partial(_aspp_project_kernel, n_b=n_b)
    return pl.pallas_call(
        kernel,
        out_shape=jax.ShapeDtypeStruct((B, M, N), out_dtype),
        grid_spec=pltpu.PrefetchScalarGridSpec(
            num_scalar_prefetch=0,
            grid=grid,
            in_specs=in_specs,
            out_specs=pl.BlockSpec((1, tm, N), lambda b, i: (b, i, 0)),
        ),
        compiler_params=pltpu.CompilerParams(
            dimension_semantics=("parallel", "parallel"),
            vmem_limit_bytes=32 * 1024 * 1024),
    )(*args)


# -----------------------------------------------------------------------------
# Depthwise 3x3 conv (groups=C, no bias), 'same' padding = dilation, bf16.
# TODO(synk): fuse into the following pointwise Pallas matmul (spatial tile
# with halo + 9 shifted VPU MACs) to save one HBM round trip of the activation.
# -----------------------------------------------------------------------------
def depthwise_conv3x3(x, w, dilation):
    c = x.shape[-1]
    d = dilation
    return lax.conv_general_dilated(
        x, w, window_strides=(1, 1), padding=((d, d), (d, d)),
        rhs_dilation=(d, d), dimension_numbers=("NHWC", "HWIO", "NHWC"),
        feature_group_count=c)


# -----------------------------------------------------------------------------
# Bilinear interpolation (align_corners=False), PyTorch F.interpolate
# semantics, kept in the input dtype (bf16) — no f32 materialization.
# -----------------------------------------------------------------------------
def _interp_axis(in_size, out_size):
    scale = in_size / out_size
    dst = jnp.arange(out_size, dtype=jnp.float32)
    src = jnp.maximum((dst + 0.5) * scale - 0.5, 0.0)
    i0 = jnp.minimum(jnp.floor(src).astype(jnp.int32), in_size - 1)
    i1 = jnp.minimum(i0 + 1, in_size - 1)
    w1 = src - i0.astype(jnp.float32)
    return i0, i1, 1.0 - w1, w1


def bilinear_resize(x, out_hw):
    _, H, W, _ = x.shape
    OH, OW = out_hw
    dt = x.dtype
    i0h, i1h, w0h, w1h = _interp_axis(H, OH)
    i0w, i1w, w0w, w1w = _interp_axis(W, OW)
    w0h = w0h.astype(dt)[None, :, None, None]
    w1h = w1h.astype(dt)[None, :, None, None]
    w0w = w0w.astype(dt)[None, None, :, None]
    w1w = w1w.astype(dt)[None, None, :, None]
    xh = x[:, i0h] * w0h + x[:, i1h] * w1h
    return xh[:, :, i0w] * w0w + xh[:, :, i1w] * w1w


# -----------------------------------------------------------------------------
# Parameter construction: deterministic synthetic weights, BatchNorm folded
# into the 1x1 weights, everything padded to lane-dense shapes at init.
# -----------------------------------------------------------------------------
def _bn_fold(key, cout, eps=1e-5):
    kg, kb, km, kv = jax.random.split(key, 4)
    gamma = jax.random.uniform(kg, (cout,), jnp.float32, 0.5, 1.5)
    beta = 0.1 * jax.random.normal(kb, (cout,), jnp.float32)
    mean = 0.1 * jax.random.normal(km, (cout,), jnp.float32)
    var = jax.random.uniform(kv, (cout,), jnp.float32, 0.5, 1.5)
    scale = gamma / jnp.sqrt(var + eps)
    return scale, beta - mean * scale


def _conv_bn_folded(key, cin, cout, kp=None, np_=None):
    """1x1 conv (no bias) + folded BN -> bf16 weight (Kp, Np), f32 bias (1, Np)."""
    kw, kb = jax.random.split(key)
    w = 0.1 * jax.random.normal(kw, (cin, cout), jnp.float32)
    scale, bias = _bn_fold(kb, cout)
    kp = kp if kp is not None else _round_up(cin, 128)
    np_ = np_ if np_ is not None else _round_up(cout, 128)
    wp = jnp.zeros((kp, np_), jnp.float32).at[:cin, :cout].set(w * scale[None, :])
    bp = jnp.zeros((1, np_), jnp.float32).at[:, :cout].set(bias)
    return wp.astype(jnp.bfloat16), bp


def _dw3(key, c, cp=None):
    """Depthwise 3x3 weight -> (3, 3, 1, Cp) bf16 (HWIO, groups=C)."""
    cp = cp if cp is not None else c
    w = 0.1 * jax.random.normal(key, (3, 3, c), jnp.float32)
    wp = jnp.zeros((3, 3, 1, cp), jnp.float32).at[:, :, 0, :c].set(w)
    return wp.astype(jnp.bfloat16)


def init_params(key, in_channels, low_level_channels, num_classes, rates):
    ks = iter(jax.random.split(key, 24))
    cip = _round_up(in_channels, 128)
    clp = _round_up(low_level_channels, 128)
    p = {}

    # low_level_cov: Conv2d(low_level_channels, 48, 1) + BN + ReLU
    # (output lane-padded to 128 channels: 48 valid + zeros)
    p['low_w'], p['low_b'] = _conv_bn_folded(next(ks), low_level_channels, 48,
                                             kp=clp)

    # TODO(synk): ASPPSC source was not provided; assumed standard separable
    # ASPP: 1x1 branch, three atrous-separable (dw3x3 + pw1x1 + BN + ReLU)
    # branches, global-pool branch, and a 1x1 projection (+Dropout, eval=noop).
    p['aspp0_w'], p['aspp0_b'] = _conv_bn_folded(next(ks), in_channels, 256,
                                                 kp=cip)
    for i in range(len(rates)):
        p[f'aspp{i + 1}_dw'] = _dw3(next(ks), in_channels, cip)
        p[f'aspp{i + 1}_w'], p[f'aspp{i + 1}_b'] = _conv_bn_folded(
            next(ks), in_channels, 256, kp=cip)
    # global-pool branch 1x1 (spatially constant -> plain jnp.dot)
    p['aspp_pool_w'], p['aspp_pool_b'] = _conv_bn_folded(next(ks), in_channels,
                                                         256, kp=cip)
    # ASPP projection 1x1 (5*256 -> 256): stored as 5 BN-scale-folded slices
    kw, kb = jax.random.split(next(ks))
    wproj = 0.1 * jax.random.normal(kw, (5 * 256, 256), jnp.float32)
    scale, bias = _bn_fold(kb, 256)
    wproj = (wproj * scale[None, :]).astype(jnp.bfloat16)
    for i in range(5):
        p[f'proj_aspp_w{i}'] = wproj[i * 256:(i + 1) * 256]
    p['proj_aspp_b'] = bias.reshape(1, 256)

    # project separable conv 1: dw3x3(304) + pw1x1(304->256) + BN + ReLU,
    # split between the two concat halves (low-level 48ch, upsampled ASPP 256ch)
    p['proj1_dw_ll'] = _dw3(next(ks), 48, 128)
    p['proj1_dw_up'] = _dw3(next(ks), 256)
    kw, kb = jax.random.split(next(ks))
    w = 0.1 * jax.random.normal(kw, (304, 256), jnp.float32)
    scale, bias = _bn_fold(kb, 256)
    wf = w * scale[None, :]
    p['proj1_w_ll'] = jnp.zeros((128, 256), jnp.float32).at[:48].set(
        wf[:48]).astype(jnp.bfloat16)
    p['proj1_w_up'] = wf[48:].astype(jnp.bfloat16)
    p['proj1_b'] = bias.reshape(1, 256)

    # project separable conv 2: dw3x3(256) + pw1x1(256->256) + BN + ReLU
    p['proj2_dw'] = _dw3(next(ks), 256)
    p['proj2_w'], p['proj2_b'] = _conv_bn_folded(next(ks), 256, 256)

    # classifier 1x1 (256 -> num_classes, with bias); fused into proj2 epilogue
    kw, kb = jax.random.split(next(ks))
    ncp = _round_up(num_classes, 128)
    p['cls_w'] = jnp.zeros((256, ncp), jnp.float32).at[:, :num_classes].set(
        0.1 * jax.random.normal(kw, (256, num_classes), jnp.float32)
    ).astype(jnp.bfloat16)
    p['cls_b'] = jnp.zeros((1, ncp), jnp.float32).at[:, :num_classes].set(
        0.1 * jax.random.normal(kb, (num_classes,), jnp.float32))
    return p


# -----------------------------------------------------------------------------
# Full DeepLabv3+SC head forward (eval mode)
# -----------------------------------------------------------------------------
def deeplab_head_forward(params, low_level_nchw, out_nchw, *, rates,
                         num_classes, use_pallas=True):
    f32, bf16 = jnp.float32, jnp.bfloat16
    low = jnp.transpose(low_level_nchw, (0, 2, 3, 1)).astype(bf16)
    out = jnp.transpose(out_nchw, (0, 2, 3, 1)).astype(bf16)
    B, Hl, Wl, Cl = low.shape
    _, Ho, Wo, Ci = out.shape

    # one-time lane padding of the raw inputs (no-op at production channel
    # counts); keeps every matmul K lane-dense without per-layer pad copies.
    cip = params['aspp0_w'].shape[0]
    clp = params['low_w'].shape[0]
    if Cl < clp:
        low = jnp.pad(low, ((0, 0), (0, 0), (0, 0), (0, clp - Cl)))
    if Ci < cip:
        out = jnp.pad(out, ((0, 0), (0, 0), (0, 0), (0, cip - Ci)))

    mm = functools.partial(fused_matmul, use_pallas=use_pallas)

    # ---- low_level_cov (output lane-padded to 128 channels, ch 48..127 zero)
    ll = mm([low.reshape(B, Hl * Wl, clp)], [params['low_w']], params['low_b'])
    ll = ll.reshape(B, Hl, Wl, -1)

    # ---- ASPP global-pool branch: spatially constant -> folded into the fused
    # projection as a per-batch additive term (never broadcast / concatenated).
    # TODO(synk): this mean re-reads `out` once; it could be folded into the
    # fused ASPP kernel as a cross-tile partial-sum output.
    pooled = jnp.mean(out, axis=(1, 2), dtype=f32).astype(bf16)           # (B,cip)
    pb = jnp.dot(pooled, params['aspp_pool_w'],
                 preferred_element_type=f32) + params['aspp_pool_b']
    pb = jnp.maximum(pb, 0.0)
    pooled_extra = jnp.dot(pb.astype(bf16), params['proj_aspp_w4'],
                           preferred_element_type=f32)[:, None, :]        # (B,1,256)

    # ---- fused ASPP: branch 1x1s + 1280->256 projection in ONE Pallas call;
    # the four (B,M,256) branch activations never hit HBM.
    xs = [out.reshape(B, Ho * Wo, cip)]
    for i, d in enumerate(rates):
        dwx = depthwise_conv3x3(out, params[f'aspp{i + 1}_dw'], d)
        xs.append(dwx.reshape(B, Ho * Wo, cip))
    n_br = len(rates) + 1
    aspp = aspp_project(
        xs,
        [params['aspp0_w']] + [params[f'aspp{i + 1}_w'] for i in range(len(rates))],
        [params['aspp0_b']] + [params[f'aspp{i + 1}_b'] for i in range(len(rates))],
        [params[f'proj_aspp_w{i}'] for i in range(n_br)],
        params['proj_aspp_b'], pooled_extra, use_pallas=use_pallas)
    aspp = aspp.reshape(B, Ho, Wo, 256)
    # nn.Dropout(0.5) is identity in eval mode.

    # ---- bilinear upsample (bf16); no 304-channel concat is ever built:
    # proj1's depthwise runs per concat half, the pointwise accumulates both
    # halves inside one multi-input Pallas call.
    up = bilinear_resize(aspp, (Hl, Wl))
    ll_dw = depthwise_conv3x3(ll, params['proj1_dw_ll'], 1)
    up_dw = depthwise_conv3x3(up, params['proj1_dw_up'], 1)
    y = mm([ll_dw.reshape(B, Hl * Wl, -1), up_dw.reshape(B, Hl * Wl, 256)],
           [params['proj1_w_ll'], params['proj1_w_up']], params['proj1_b'])
    y = y.reshape(B, Hl, Wl, 256)

    # ---- separable conv 2 with the classifier fused into the kernel epilogue
    # (note: the ReLU'd 256-ch activation feeds the classifier in bf16).
    y_dw = depthwise_conv3x3(y, params['proj2_dw'], 1)
    logits = mm([y_dw.reshape(B, Hl * Wl, 256)], [params['proj2_w']],
                params['proj2_b'], relu=True,
                head_w=params['cls_w'], head_b=params['cls_b'], out_dtype=f32)
    logits = logits.reshape(B, Hl, Wl, -1)[..., :num_classes]
    return jnp.transpose(logits, (0, 3, 1, 2))


# -----------------------------------------------------------------------------
if __name__ == "__main__":
    key = jax.random.PRNGKey(0)
    k_low, k_out, k_params = jax.random.split(key, 3)

    # Module config (output_stride=16 -> ASPP rates [6, 12, 18])
    in_channels = 8
    low_level_channels = 4
    num_classes = 3
    rates = (6, 12, 18)

    # feature['low_level']: (N, C_low, 16, 16); feature['out']: (N, C_in, 8, 8)
    low_level = jax.random.normal(k_low, (2, low_level_channels, 16, 16),
                                  jnp.float32)
    out_feat = jax.random.normal(k_out, (2, in_channels, 8, 8), jnp.float32)

    params = init_params(k_params, in_channels, low_level_channels,
                         num_classes, rates)

    fwd = jax.jit(functools.partial(deeplab_head_forward, rates=rates,
                                    num_classes=num_classes, use_pallas=True))
    y = fwd(params, low_level, out_feat)
    jax.block_until_ready(y)

    # sanity check against a plain-JAX reference of the same (bf16/f32) math
    y_ref = deeplab_head_forward(params, low_level, out_feat, rates=rates,
                                 num_classes=num_classes, use_pallas=False)
    assert y.shape == (2, num_classes, 16, 16), y.shape
    assert jnp.allclose(y, y_ref, atol=1e-2, rtol=1e-2), "mismatch vs reference"

    print("KERNEL_OK")
</pallas_src>

<mosaic_0001>
module attributes {stable_mosaic.version = 11 : i64} {
  func.func @_aspp_project_kernel(%arg0: i32, %arg1: i32, %arg2: memref<1x64x128xbf16, #tpu.memory_space<vmem>>, %arg3: memref<1x64x128xbf16, #tpu.memory_space<vmem>>, %arg4: memref<1x64x128xbf16, #tpu.memory_space<vmem>>, %arg5: memref<1x64x128xbf16, #tpu.memory_space<vmem>>, %arg6: memref<128x256xbf16, #tpu.memory_space<vmem>>, %arg7: memref<128x256xbf16, #tpu.memory_space<vmem>>, %arg8: memref<128x256xbf16, #tpu.memory_space<vmem>>, %arg9: memref<128x256xbf16, #tpu.memory_space<vmem>>, %arg10: memref<1x256xf32, #tpu.memory_space<vmem>>, %arg11: memref<1x256xf32, #tpu.memory_space<vmem>>, %arg12: memref<1x256xf32, #tpu.memory_space<vmem>>, %arg13: memref<1x256xf32, #tpu.memory_space<vmem>>, %arg14: memref<256x256xbf16, #tpu.memory_space<vmem>>, %arg15: memref<256x256xbf16, #tpu.memory_space<vmem>>, %arg16: memref<256x256xbf16, #tpu.memory_space<vmem>>, %arg17: memref<256x256xbf16, #tpu.memory_space<vmem>>, %arg18: memref<1x256xf32, #tpu.memory_space<vmem>>, %arg19: memref<1x1x256xf32, #tpu.memory_space<vmem>>, %arg20: memref<1x64x256xbf16, #tpu.memory_space<vmem>>) attributes {dimension_semantics = [#tpu.dimension_semantics<parallel>, #tpu.dimension_semantics<parallel>], iteration_bounds = array<i64: 2, 1>, scalar_prefetch = 0 : i64, scratch_operands = 0 : i64, tpu.core_type = #tpu.core_type<tc>, window_params = [{transform_indices = @transform_0, window_bounds = array<i64: 1, 64, 128>}, {transform_indices = @transform_1, window_bounds = array<i64: 1, 64, 128>}, {transform_indices = @transform_2, window_bounds = array<i64: 1, 64, 128>}, {transform_indices = @transform_3, window_bounds = array<i64: 1, 64, 128>}, {pipeline_mode = #tpu.pipeline_mode<synchronous>, transform_indices = @transform_4, window_bounds = array<i64: 128, 256>}, {pipeline_mode = #tpu.pipeline_mode<synchronous>, transform_indices = @transform_5, window_bounds = array<i64: 128, 256>}, {pipeline_mode = #tpu.pipeline_mode<synchronous>, transform_indices = @transform_6, window_bounds = array<i64: 128, 256>}, {pipeline_mode = #tpu.pipeline_mode<synchronous>, transform_indices = @transform_7, window_bounds = array<i64: 128, 256>}, {pipeline_mode = #tpu.pipeline_mode<synchronous>, transform_indices = @transform_8, window_bounds = array<i64: 1, 256>}, {pipeline_mode = #tpu.pipeline_mode<synchronous>, transform_indices = @transform_9, window_bounds = array<i64: 1, 256>}, {pipeline_mode = #tpu.pipeline_mode<synchronous>, transform_indices = @transform_10, window_bounds = array<i64: 1, 256>}, {pipeline_mode = #tpu.pipeline_mode<synchronous>, transform_indices = @transform_11, window_bounds = array<i64: 1, 256>}, {pipeline_mode = #tpu.pipeline_mode<synchronous>, transform_indices = @transform_12, window_bounds = array<i64: 256, 256>}, {pipeline_mode = #tpu.pipeline_mode<synchronous>, transform_indices = @transform_13, window_bounds = array<i64: 256, 256>}, {pipeline_mode = #tpu.pipeline_mode<synchronous>, transform_indices = @transform_14, window_bounds = array<i64: 256, 256>}, {pipeline_mode = #tpu.pipeline_mode<synchronous>, transform_indices = @transform_15, window_bounds = array<i64: 256, 256>}, {pipeline_mode = #tpu.pipeline_mode<synchronous>, transform_indices = @transform_16, window_bounds = array<i64: 1, 256>}, {transform_indices = @transform_17, window_bounds = array<i64: 1, 1, 256>}, {transform_indices = @transform_18, window_bounds = array<i64: 1, 64, 256>}]} {
    %c0 = arith.constant 0 : index
    %c0_0 = arith.constant 0 : index
    %c0_1 = arith.constant 0 : index
    %0 = vector.load %arg2[%c0, %c0_0, %c0_1] : memref<1x64x128xbf16, #tpu.memory_space<vmem>>, vector<1x64x128xbf16>
    %1 = vector.shape_cast %0 : vector<1x64x128xbf16> to vector<64x128xbf16>
    %c0_2 = arith.constant 0 : index
    %c0_3 = arith.constant 0 : index
    %2 = vector.load %arg6[%c0_2, %c0_3] : memref<128x256xbf16, #tpu.memory_space<vmem>>, vector<128x256xbf16>
    %cst = arith.constant dense<0.000000e+00> : vector<64x256xf32>
    %3 = tpu.matmul %1, %2, %cst {dimension_numbers = #tpu.dot_dimension_numbers<[1], [0], [0], [1], [0, 0, 1, 1], [], []>} : vector<64x128xbf16>, vector<128x256xbf16>, vector<64x256xf32> -> vector<64x256xf32>
    %c0_4 = arith.constant 0 : index
    %c0_5 = arith.constant 0 : index
    %4 = vector.load %arg10[%c0_4, %c0_5] : memref<1x256xf32, #tpu.memory_space<vmem>>, vector<1x256xf32>
    %5 = vector.broadcast %4 : vector<1x256xf32> to vector<64x256xf32>
    %6 = arith.addf %3, %5 : vector<64x256xf32>
    %cst_6 = arith.constant 0.000000e+00 : f32
    %7 = vector.broadcast %cst_6 : f32 to vector<64x256xf32>
    %8 = arith.maximumf %6, %7 : vector<64x256xf32>
    %9 = arith.truncf %8 : vector<64x256xf32> to vector<64x256xbf16>
    %c0_7 = arith.constant 0 : index
    %c0_8 = arith.constant 0 : index
    %10 = vector.load %arg14[%c0_7, %c0_8] : memref<256x256xbf16, #tpu.memory_space<vmem>>, vector<256x256xbf16>
    %cst_9 = arith.constant dense<0.000000e+00> : vector<64x256xf32>
    %11 = tpu.matmul %9, %10, %cst_9 {dimension_numbers = #tpu.dot_dimension_numbers<[1], [0], [0], [1], [0, 0, 1, 1], [], []>} : vector<64x256xbf16>, vector<256x256xbf16>, vector<64x256xf32> -> vector<64x256xf32>
    %c0_10 = arith.constant 0 : index
    %c0_11 = arith.constant 0 : index
    %c0_12 = arith.constant 0 : index
    %12 = vector.load %arg3[%c0_10, %c0_11, %c0_12] : memref<1x64x128xbf16, #tpu.memory_space<vmem>>, vector<1x64x128xbf16>
    %13 = vector.shape_cast %12 : vector<1x64x128xbf16> to vector<64x128xbf16>
    %c0_13 = arith.constant 0 : index
    %c0_14 = arith.constant 0 : index
    %14 = vector.load %arg7[%c0_13, %c0_14] : memref<128x256xbf16, #tpu.memory_space<vmem>>, vector<128x256xbf16>
    %cst_15 = arith.constant dense<0.000000e+00> : vector<64x256xf32>
    %15 = tpu.matmul %13, %14, %cst_15 {dimension_numbers = #tpu.dot_dimension_numbers<[1], [0], [0], [1], [0, 0, 1, 1], [], []>} : vector<64x128xbf16>, vector<128x256xbf16>, vector<64x256xf32> -> vector<64x256xf32>
    %c0_16 = arith.constant 0 : index
    %c0_17 = arith.constant 0 : index
    %16 = vector.load %arg11[%c0_16, %c0_17] : memref<1x256xf32, #tpu.memory_space<vmem>>, vector<1x256xf32>
    %17 = vector.broadcast %16 : vector<1x256xf32> to vector<64x256xf32>
    %18 = arith.addf %15, %17 : vector<64x256xf32>
    %cst_18 = arith.constant 0.000000e+00 : f32
    %19 = vector.broadcast %cst_18 : f32 to vector<64x256xf32>
    %20 = arith.maximumf %18, %19 : vector<64x256xf32>
    %21 = arith.truncf %20 : vector<64x256xf32> to vector<64x256xbf16>
    %c0_19 = arith.constant 0 : index
    %c0_20 = arith.constant 0 : index
    %22 = vector.load %arg15[%c0_19, %c0_20] : memref<256x256xbf16, #tpu.memory_space<vmem>>, vector<256x256xbf16>
    %cst_21 = arith.constant dense<0.000000e+00> : vector<64x256xf32>
    %23 = tpu.matmul %21, %22, %cst_21 {dimension_numbers = #tpu.dot_dimension_numbers<[1], [0], [0], [1], [0, 0, 1, 1], [], []>} : vector<64x256xbf16>, vector<256x256xbf16>, vector<64x256xf32> -> vector<64x256xf32>
    %24 = arith.addf %11, %23 : vector<64x256xf32>
    %c0_22 = arith.constant 0 : index
    %c0_23 = arith.constant 0 : index
    %c0_24 = arith.constant 0 : index
    %25 = vector.load %arg4[%c0_22, %c0_23, %c0_24] : memref<1x64x128xbf16, #tpu.memory_space<vmem>>, vector<1x64x128xbf16>
    %26 = vector.shape_cast %25 : vector<1x64x128xbf16> to vector<64x128xbf16>
    %c0_25 = arith.constant 0 : index
    %c0_26 = arith.constant 0 : index
    %27 = vector.load %arg8[%c0_25, %c0_26] : memref<128x256xbf16, #tpu.memory_space<vmem>>, vector<128x256xbf16>
    %cst_27 = arith.constant dense<0.000000e+00> : vector<64x256xf32>
    %28 = tpu.matmul %26, %27, %cst_27 {dimension_numbers = #tpu.dot_dimension_numbers<[1], [0], [0], [1], [0, 0, 1, 1], [], []>} : vector<64x128xbf16>, vector<128x256xbf16>, vector<64x256xf32> -> vector<64x256xf32>
    %c0_28 = arith.constant 0 : index
    %c0_29 = arith.constant 0 : index
    %29 = vector.load %arg12[%c0_28, %c0_29] : memref<1x256xf32, #tpu.memory_space<vmem>>, vector<1x256xf32>
    %30 = vector.broadcast %29 : vector<1x256xf32> to vector<64x256xf32>
    %31 = arith.addf %28, %30 : vector<64x256xf32>
    %cst_30 = arith.constant 0.000000e+00 : f32
    %32 = vector.broadcast %cst_30 : f32 to vector<64x256xf32>
    %33 = arith.maximumf %31, %32 : vector<64x256xf32>
    %34 = arith.truncf %33 : vector<64x256xf32> to vector<64x256xbf16>
    %c0_31 = arith.constant 0 : index
    %c0_32 = arith.constant 0 : index
    %35 = vector.load %arg16[%c0_31, %c0_32] : memref<256x256xbf16, #tpu.memory_space<vmem>>, vector<256x256xbf16>
    %cst_33 = arith.constant dense<0.000000e+00> : vector<64x256xf32>
    %36 = tpu.matmul %34, %35, %cst_33 {dimension_numbers = #tpu.dot_dimension_numbers<[1], [0], [0], [1], [0, 0, 1, 1], [], []>} : vector<64x256xbf16>, vector<256x256xbf16>, vector<64x256xf32> -> vector<64x256xf32>
    %37 = arith.addf %24, %36 : vector<64x256xf32>
    %c0_34 = arith.constant 0 : index
    %c0_35 = arith.constant 0 : index
    %c0_36 = arith.constant 0 : index
    %38 = vector.load %arg5[%c0_34, %c0_35, %c0_36] : memref<1x64x128xbf16, #tpu.memory_space<vmem>>, vector<1x64x128xbf16>
    %39 = vector.shape_cast %38 : vector<1x64x128xbf16> to vector<64x128xbf16>
    %c0_37 = arith.constant 0 : index
    %c0_38 = arith.constant 0 : index
    %40 = vector.load %arg9[%c0_37, %c0_38] : memref<128x256xbf16, #tpu.memory_space<vmem>>, vector<128x256xbf16>
    %cst_39 = arith.constant dense<0.000000e+00> : vector<64x256xf32>
    %41 = tpu.matmul %39, %40, %cst_39 {dimension_numbers = #tpu.dot_dimension_numbers<[1], [0], [0], [1], [0, 0, 1, 1], [], []>} : vector<64x128xbf16>, vector<128x256xbf16>, vector<64x256xf32> -> vector<64x256xf32>
    %c0_40 = arith.constant 0 : index
    %c0_41 = arith.constant 0 : index
    %42 = vector.load %arg13[%c0_40, %c0_41] : memref<1x256xf32, #tpu.memory_space<vmem>>, vector<1x256xf32>
    %43 = vector.broadcast %42 : vector<1x256xf32> to vector<64x256xf32>
    %44 = arith.addf %41, %43 : vector<64x256xf32>
    %cst_42 = arith.constant 0.000000e+00 : f32
    %45 = vector.broadcast %cst_42 : f32 to vector<64x256xf32>
    %46 = arith.maximumf %44, %45 : vector<64x256xf32>
    %47 = arith.truncf %46 : vector<64x256xf32> to vector<64x256xbf16>
    %c0_43 = arith.constant 0 : index
    %c0_44 = arith.constant 0 : index
    %48 = vector.load %arg17[%c0_43, %c0_44] : memref<256x256xbf16, #tpu.memory_space<vmem>>, vector<256x256xbf16>
    %cst_45 = arith.constant dense<0.000000e+00> : vector<64x256xf32>
    %49 = tpu.matmul %47, %48, %cst_45 {dimension_numbers = #tpu.dot_dimension_numbers<[1], [0], [0], [1], [0, 0, 1, 1], [], []>} : vector<64x256xbf16>, vector<256x256xbf16>, vector<64x256xf32> -> vector<64x256xf32>
    %50 = arith.addf %37, %49 : vector<64x256xf32>
    %c0_46 = arith.constant 0 : index
    %c0_47 = arith.constant 0 : index
    %51 = vector.load %arg18[%c0_46, %c0_47] : memref<1x256xf32, #tpu.memory_space<vmem>>, vector<1x256xf32>
    %52 = vector.broadcast %51 : vector<1x256xf32> to vector<64x256xf32>
    %53 = arith.addf %50, %52 : vector<64x256xf32>
    %c0_48 = arith.constant 0 : index
    %c0_49 = arith.constant 0 : index
    %c0_50 = arith.constant 0 : index
    %54 = vector.load %arg19[%c0_48, %c0_49, %c0_50] : memref<1x1x256xf32, #tpu.memory_space<vmem>>, vector<1x1x256xf32>
    %55 = vector.shape_cast %54 : vector<1x1x256xf32> to vector<1x256xf32>
    %56 = vector.broadcast %55 : vector<1x256xf32> to vector<64x256xf32>
    %57 = arith.addf %53, %56 : vector<64x256xf32>
    %cst_51 = arith.constant 0.000000e+00 : f32
    %58 = vector.broadcast %cst_51 : f32 to vector<64x256xf32>
    %59 = arith.maximumf %57, %58 : vector<64x256xf32>
    %60 = arith.truncf %59 : vector<64x256xf32> to vector<64x256xbf16>
    %c0_52 = arith.constant 0 : index
    %c0_53 = arith.constant 0 : index
    %c0_54 = arith.constant 0 : index
    %61 = vector.load %arg20[%c0_52, %c0_53, %c0_54] : memref<1x64x256xbf16, #tpu.memory_space<vmem>>, vector<1x64x256xbf16>
    %62 = vector.shape_cast %61 : vector<1x64x256xbf16> to vector<64x256xbf16>
    %63 = vector.shape_cast %60 : vector<64x256xbf16> to vector<1x64x256xbf16>
    tpu.vector_store %arg20[%c0_52, %c0_53, %c0_54], %63 {strides = array<i32>} : memref<1x64x256xbf16, #tpu.memory_space<vmem>>, vector<1x64x256xbf16>,
    return
  }
  func.func @transform_0(%arg0: i32, %arg1: i32) -> (i32, i32, i32) {
    %c0_i32 = arith.constant 0 : i32
    %c0_i32_0 = arith.constant 0 : i32
    return %arg0, %arg1, %c0_i32 : i32, i32, i32
  }
  func.func @transform_1(%arg0: i32, %arg1: i32) -> (i32, i32, i32) {
    %c0_i32 = arith.constant 0 : i32
    %c0_i32_0 = arith.constant 0 : i32
    return %arg0, %arg1, %c0_i32 : i32, i32, i32
  }
  func.func @transform_2(%arg0: i32, %arg1: i32) -> (i32, i32, i32) {
    %c0_i32 = arith.constant 0 : i32
    %c0_i32_0 = arith.constant 0 : i32
    return %arg0, %arg1, %c0_i32 : i32, i32, i32
  }
  func.func @transform_3(%arg0: i32, %arg1: i32) -> (i32, i32, i32) {
    %c0_i32 = arith.constant 0 : i32
    %c0_i32_0 = arith.constant 0 : i32
    return %arg0, %arg1, %c0_i32 : i32, i32, i32
  }
  func.func @transform_4(%arg0: i32, %arg1: i32) -> (i32, i32) {
    %c0_i32 = arith.constant 0 : i32
    %c0_i32_0 = arith.constant 0 : i32
    %c0_i32_1 = arith.constant 0 : i32
    return %c0_i32, %c0_i32_0 : i32, i32
  }
  func.func @transform_5(%arg0: i32, %arg1: i32) -> (i32, i32) {
    %c0_i32 = arith.constant 0 : i32
    %c0_i32_0 = arith.constant 0 : i32
    %c0_i32_1 = arith.constant 0 : i32
    return %c0_i32, %c0_i32_0 : i32, i32
  }
  func.func @transform_6(%arg0: i32, %arg1: i32) -> (i32, i32) {
    %c0_i32 = arith.constant 0 : i32
    %c0_i32_0 = arith.constant 0 : i32
    %c0_i32_1 = arith.constant 0 : i32
    return %c0_i32, %c0_i32_0 : i32, i32
  }
  func.func @transform_7(%arg0: i32, %arg1: i32) -> (i32, i32) {
    %c0_i32 = arith.constant 0 : i32
    %c0_i32_0 = arith.constant 0 : i32
    %c0_i32_1 = arith.constant 0 : i32
    return %c0_i32, %c0_i32_0 : i32, i32
  }
  func.func @transform_8(%arg0: i32, %arg1: i32) -> (i32, i32) {
    %c0_i32 = arith.constant 0 : i32
    %c0_i32_0 = arith.constant 0 : i32
    %c0_i32_1 = arith.constant 0 : i32
    return %c0_i32, %c0_i32_0 : i32, i32
  }
  func.func @transform_9(%arg0: i32, %arg1: i32) -> (i32, i32) {
    %c0_i32 = arith.constant 0 : i32
    %c0_i32_0 = arith.constant 0 : i32
    %c0_i32_1 = arith.constant 0 : i32
    return %c0_i32, %c0_i32_0 : i32, i32
  }
  func.func @transform_10(%arg0: i32, %arg1: i32) -> (i32, i32) {
    %c0_i32 = arith.constant 0 : i32
    %c0_i32_0 = arith.constant 0 : i32
    %c0_i32_1 = arith.constant 0 : i32
    return %c0_i32, %c0_i32_0 : i32, i32
  }
  func.func @transform_11(%arg0: i32, %arg1: i32) -> (i32, i32) {
    %c0_i32 = arith.constant 0 : i32
    %c0_i32_0 = arith.constant 0 : i32
    %c0_i32_1 = arith.constant 0 : i32
    return %c0_i32, %c0_i32_0 : i32, i32
  }
  func.func @transform_12(%arg0: i32, %arg1: i32) -> (i32, i32) {
    %c0_i32 = arith.constant 0 : i32
    %c0_i32_0 = arith.constant 0 : i32
    %c0_i32_1 = arith.constant 0 : i32
    return %c0_i32, %c0_i32_0 : i32, i32
  }
  func.func @transform_13(%arg0: i32, %arg1: i32) -> (i32, i32) {
    %c0_i32 = arith.constant 0 : i32
    %c0_i32_0 = arith.constant 0 : i32
    %c0_i32_1 = arith.constant 0 : i32
    return %c0_i32, %c0_i32_0 : i32, i32
  }
  func.func @transform_14(%arg0: i32, %arg1: i32) -> (i32, i32) {
    %c0_i32 = arith.constant 0 : i32
    %c0_i32_0 = arith.constant 0 : i32
    %c0_i32_1 = arith.constant 0 : i32
    return %c0_i32, %c0_i32_0 : i32, i32
  }
  func.func @transform_15(%arg0: i32, %arg1: i32) -> (i32, i32) {
    %c0_i32 = arith.constant 0 : i32
    %c0_i32_0 = arith.constant 0 : i32
    %c0_i32_1 = arith.constant 0 : i32
    return %c0_i32, %c0_i32_0 : i32, i32
  }
  func.func @transform_16(%arg0: i32, %arg1: i32) -> (i32, i32) {
    %c0_i32 = arith.constant 0 : i32
    %c0_i32_0 = arith.constant 0 : i32
    %c0_i32_1 = arith.constant 0 : i32
    return %c0_i32, %c0_i32_0 : i32, i32
  }
  func.func @transform_17(%arg0: i32, %arg1: i32) -> (i32, i32, i32) {
    %c0_i32 = arith.constant 0 : i32
    %c0_i32_0 = arith.constant 0 : i32
    %c0_i32_1 = arith.constant 0 : i32
    return %arg0, %c0_i32, %c0_i32_0 : i32, i32, i32
  }
  func.func @transform_18(%arg0: i32, %arg1: i32) -> (i32, i32, i32) {
    %c0_i32 = arith.constant 0 : i32
    %c0_i32_0 = arith.constant 0 : i32
    return %arg0, %arg1, %c0_i32 : i32, i32, i32
  }
}

module attributes {stable_mosaic.version = 11 : i64} {
  func.func @_fused_matmul_kernel(%arg0: i32, %arg1: i32, %arg2: i32, %arg3: memref<1x256x128xbf16, #tpu.memory_space<vmem>>, %arg4: memref<128x128xbf16, #tpu.memory_space<vmem>>, %arg5: memref<1x128xf32, #tpu.memory_space<vmem>>, %arg6: memref<1x256x128xbf16, #tpu.memory_space<vmem>>) attributes {dimension_semantics = [#tpu.dimension_semantics<parallel>, #tpu.dimension_semantics<parallel>, #tpu.dimension_semantics<parallel>], iteration_bounds = array<i64: 2, 1, 1>, scalar_prefetch = 0 : i64, scratch_operands = 0 : i64, tpu.core_type = #tpu.core_type<tc>, window_params = [{transform_indices = @transform_0, window_bounds = array<i64: 1, 256, 128>}, {transform_indices = @transform_1, window_bounds = array<i64: 128, 128>}, {transform_indices = @transform_2, window_bounds = array<i64: 1, 128>}, {transform_indices = @transform_3, window_bounds = array<i64: 1, 256, 128>}]} {
    %c0 = arith.constant 0 : index
    %c0_0 = arith.constant 0 : index
    %c0_1 = arith.constant 0 : index
    %0 = vector.load %arg3[%c0, %c0_0, %c0_1] : memref<1x256x128xbf16, #tpu.memory_space<vmem>>, vector<1x256x128xbf16>
    %1 = vector.shape_cast %0 : vector<1x256x128xbf16> to vector<256x128xbf16>
    %c0_2 = arith.constant 0 : index
    %c0_3 = arith.constant 0 : index
    %2 = vector.load %arg4[%c0_2, %c0_3] : memref<128x128xbf16, #tpu.memory_space<vmem>>, vector<128x128xbf16>
    %cst = arith.constant dense<0.000000e+00> : vector<256x128xf32>
    %3 = tpu.matmul %1, %2, %cst {dimension_numbers = #tpu.dot_dimension_numbers<[1], [0], [0], [1], [0, 0, 1, 1], [], []>} : vector<256x128xbf16>, vector<128x128xbf16>, vector<256x128xf32> -> vector<256x128xf32>
    %c0_4 = arith.constant 0 : index
    %c0_5 = arith.constant 0 : index
    %4 = vector.load %arg5[%c0_4, %c0_5] : memref<1x128xf32, #tpu.memory_space<vmem>>, vector<1x128xf32>
    %5 = vector.broadcast %4 : vector<1x128xf32> to vector<256x128xf32>
    %6 = arith.addf %3, %5 : vector<256x128xf32>
    %cst_6 = arith.constant 0.000000e+00 : f32
    %7 = vector.broadcast %cst_6 : f32 to vector<256x128xf32>
    %8 = arith.maximumf %6, %7 : vector<256x128xf32>
    %9 = arith.truncf %8 : vector<256x128xf32> to vector<256x128xbf16>
    %c0_7 = arith.constant 0 : index
    %c0_8 = arith.constant 0 : index
    %c0_9 = arith.constant 0 : index
    %10 = vector.load %arg6[%c0_7, %c0_8, %c0_9] : memref<1x256x128xbf16, #tpu.memory_space<vmem>>, vector<1x256x128xbf16>
    %11 = vector.shape_cast %10 : vector<1x256x128xbf16> to vector<256x128xbf16>
    %12 = vector.shape_cast %9 : vector<256x128xbf16> to vector<1x256x128xbf16>
    tpu.vector_store %arg6[%c0_7, %c0_8, %c0_9], %12 {strides = array<i32>} : memref<1x256x128xbf16, #tpu.memory_space<vmem>>, vector<1x256x128xbf16>,
    return
  }
  func.func @transform_0(%arg0: i32, %arg1: i32, %arg2: i32) -> (i32, i32, i32) {
    %c0_i32 = arith.constant 0 : i32
    %c0_i32_0 = arith.constant 0 : i32
    return %arg0, %arg1, %c0_i32 : i32, i32, i32
  }
  func.func @transform_1(%arg0: i32, %arg1: i32, %arg2: i32) -> (i32, i32) {
    %c0_i32 = arith.constant 0 : i32
    %c0_i32_0 = arith.constant 0 : i32
    return %c0_i32, %arg2 : i32, i32
  }
  func.func @transform_2(%arg0: i32, %arg1: i32, %arg2: i32) -> (i32, i32) {
    %c0_i32 = arith.constant 0 : i32
    %c0_i32_0 = arith.constant 0 : i32
    return %c0_i32, %arg2 : i32, i32
  }
  func.func @transform_3(%arg0: i32, %arg1: i32, %arg2: i32) -> (i32, i32, i32) {
    %c0_i32 = arith.constant 0 : i32
    return %arg0, %arg1, %arg2 : i32, i32, i32
  }
}

module attributes {stable_mosaic.version = 11 : i64} {
  func.func @_fused_matmul_kernel(%arg0: i32, %arg1: i32, %arg2: i32, %arg3: memref<1x256x128xbf16, #tpu.memory_space<vmem>>, %arg4: memref<1x256x256xbf16, #tpu.memory_space<vmem>>, %arg5: memref<128x256xbf16, #tpu.memory_space<vmem>>, %arg6: memref<256x256xbf16, #tpu.memory_space<vmem>>, %arg7: memref<1x256xf32, #tpu.memory_space<vmem>>, %arg8: memref<1x256x256xbf16, #tpu.memory_space<vmem>>) attributes {dimension_semantics = [#tpu.dimension_semantics<parallel>, #tpu.dimension_semantics<parallel>, #tpu.dimension_semantics<parallel>], iteration_bounds = array<i64: 2, 1, 1>, scalar_prefetch = 0 : i64, scratch_operands = 0 : i64, tpu.core_type = #tpu.core_type<tc>, window_params = [{transform_indices = @transform_0, window_bounds = array<i64: 1, 256, 128>}, {transform_indices = @transform_1, window_bounds = array<i64: 1, 256, 256>}, {transform_indices = @transform_2, window_bounds = array<i64: 128, 256>}, {transform_indices = @transform_3, window_bounds = array<i64: 256, 256>}, {transform_indices = @transform_4, window_bounds = array<i64: 1, 256>}, {transform_indices = @transform_5, window_bounds = array<i64: 1, 256, 256>}]} {
    %c0 = arith.constant 0 : index
    %c0_0 = arith.constant 0 : index
    %c0_1 = arith.constant 0 : index
    %0 = vector.load %arg3[%c0, %c0_0, %c0_1] : memref<1x256x128xbf16, #tpu.memory_space<vmem>>, vector<1x256x128xbf16>
    %1 = vector.shape_cast %0 : vector<1x256x128xbf16> to vector<256x128xbf16>
    %c0_2 = arith.constant 0 : index
    %c0_3 = arith.constant 0 : index
    %2 = vector.load %arg5[%c0_2, %c0_3] : memref<128x256xbf16, #tpu.memory_space<vmem>>, vector<128x256xbf16>
    %cst = arith.constant dense<0.000000e+00> : vector<256x256xf32>
    %3 = tpu.matmul %1, %2, %cst {dimension_numbers = #tpu.dot_dimension_numbers<[1], [0], [0], [1], [0, 0, 1, 1], [], []>} : vector<256x128xbf16>, vector<128x256xbf16>, vector<256x256xf32> -> vector<256x256xf32>
    %c0_4 = arith.constant 0 : index
    %c0_5 = arith.constant 0 : index
    %c0_6 = arith.constant 0 : index
    %4 = vector.load %arg4[%c0_4, %c0_5, %c0_6] : memref<1x256x256xbf16, #tpu.memory_space<vmem>>, vector<1x256x256xbf16>
    %5 = vector.shape_cast %4 : vector<1x256x256xbf16> to vector<256x256xbf16>
    %c0_7 = arith.constant 0 : index
    %c0_8 = arith.constant 0 : index
    %6 = vector.load %arg6[%c0_7, %c0_8] : memref<256x256xbf16, #tpu.memory_space<vmem>>, vector<256x256xbf16>
    %cst_9 = arith.constant dense<0.000000e+00> : vector<256x256xf32>
    %7 = tpu.matmul %5, %6, %cst_9 {dimension_numbers = #tpu.dot_dimension_numbers<[1], [0], [0], [1], [0, 0, 1, 1], [], []>} : vector<256x256xbf16>, vector<256x256xbf16>, vector<256x256xf32> -> vector<256x256xf32>
    %8 = arith.addf %3, %7 : vector<256x256xf32>
    %c0_10 = arith.constant 0 : index
    %c0_11 = arith.constant 0 : index
    %9 = vector.load %arg7[%c0_10, %c0_11] : memref<1x256xf32, #tpu.memory_space<vmem>>, vector<1x256xf32>
    %10 = vector.broadcast %9 : vector<1x256xf32> to vector<256x256xf32>
    %11 = arith.addf %8, %10 : vector<256x256xf32>
    %cst_12 = arith.constant 0.000000e+00 : f32
    %12 = vector.broadcast %cst_12 : f32 to vector<256x256xf32>
    %13 = arith.maximumf %11, %12 : vector<256x256xf32>
    %14 = arith.truncf %13 : vector<256x256xf32> to vector<256x256xbf16>
    %c0_13 = arith.constant 0 : index
    %c0_14 = arith.constant 0 : index
    %c0_15 = arith.constant 0 : index
    %15 = vector.load %arg8[%c0_13, %c0_14, %c0_15] : memref<1x256x256xbf16, #tpu.memory_space<vmem>>, vector<1x256x256xbf16>
    %16 = vector.shape_cast %15 : vector<1x256x256xbf16> to vector<256x256xbf16>
    %17 = vector.shape_cast %14 : vector<256x256xbf16> to vector<1x256x256xbf16>
    tpu.vector_store %arg8[%c0_13, %c0_14, %c0_15], %17 {strides = array<i32>} : memref<1x256x256xbf16, #tpu.memory_space<vmem>>, vector<1x256x256xbf16>,
    return
  }
  func.func @transform_0(%arg0: i32, %arg1: i32, %arg2: i32) -> (i32, i32, i32) {
    %c0_i32 = arith.constant 0 : i32
    %c0_i32_0 = arith.constant 0 : i32
    return %arg0, %arg1, %c0_i32 : i32, i32, i32
  }
  func.func @transform_1(%arg0: i32, %arg1: i32, %arg2: i32) -> (i32, i32, i32) {
    %c0_i32 = arith.constant 0 : i32
    %c0_i32_0 = arith.constant 0 : i32
    return %arg0, %arg1, %c0_i32 : i32, i32, i32
  }
  func.func @transform_2(%arg0: i32, %arg1: i32, %arg2: i32) -> (i32, i32) {
    %c0_i32 = arith.constant 0 : i32
    %c0_i32_0 = arith.constant 0 : i32
    return %c0_i32, %arg2 : i32, i32
  }
  func.func @transform_3(%arg0: i32, %arg1: i32, %arg2: i32) -> (i32, i32) {
    %c0_i32 = arith.constant 0 : i32
    %c0_i32_0 = arith.constant 0 : i32
    return %c0_i32, %arg2 : i32, i32
  }
  func.func @transform_4(%arg0: i32, %arg1: i32, %arg2: i32) -> (i32, i32) {
    %c0_i32 = arith.constant 0 : i32
    %c0_i32_0 = arith.constant 0 : i32
    return %c0_i32, %arg2 : i32, i32
  }
  func.func @transform_5(%arg0: i32, %arg1: i32, %arg2: i32) -> (i32, i32, i32) {
    %c0_i32 = arith.constant 0 : i32
    return %arg0, %arg1, %arg2 : i32, i32, i32
  }
}

module attributes {stable_mosaic.version = 11 : i64} {
  func.func @_fused_matmul_kernel(%arg0: i32, %arg1: i32, %arg2: i32, %arg3: memref<1x256x256xbf16, #tpu.memory_space<vmem>>, %arg4: memref<256x256xbf16, #tpu.memory_space<vmem>>, %arg5: memref<1x256xf32, #tpu.memory_space<vmem>>, %arg6: memref<256x128xbf16, #tpu.memory_space<vmem>>, %arg7: memref<1x128xf32, #tpu.memory_space<vmem>>, %arg8: memref<1x256x128xf32, #tpu.memory_space<vmem>>) attributes {dimension_semantics = [#tpu.dimension_semantics<parallel>, #tpu.dimension_semantics<parallel>, #tpu.dimension_semantics<parallel>], iteration_bounds = array<i64: 2, 1, 1>, scalar_prefetch = 0 : i64, scratch_operands = 0 : i64, tpu.core_type = #tpu.core_type<tc>, window_params = [{transform_indices = @transform_0, window_bounds = array<i64: 1, 256, 256>}, {transform_indices = @transform_1, window_bounds = array<i64: 256, 256>}, {transform_indices = @transform_2, window_bounds = array<i64: 1, 256>}, {pipeline_mode = #tpu.pipeline_mode<synchronous>, transform_indices = @transform_3, window_bounds = array<i64: 256, 128>}, {pipeline_mode = #tpu.pipeline_mode<synchronous>, transform_indices = @transform_4, window_bounds = array<i64: 1, 128>}, {transform_indices = @transform_5, window_bounds = array<i64: 1, 256, 128>}]} {
    %c0 = arith.constant 0 : index
    %c0_0 = arith.constant 0 : index
    %c0_1 = arith.constant 0 : index
    %0 = vector.load %arg3[%c0, %c0_0, %c0_1] : memref<1x256x256xbf16, #tpu.memory_space<vmem>>, vector<1x256x256xbf16>
    %1 = vector.shape_cast %0 : vector<1x256x256xbf16> to vector<256x256xbf16>
    %c0_2 = arith.constant 0 : index
    %c0_3 = arith.constant 0 : index
    %2 = vector.load %arg4[%c0_2, %c0_3] : memref<256x256xbf16, #tpu.memory_space<vmem>>, vector<256x256xbf16>
    %cst = arith.constant dense<0.000000e+00> : vector<256x256xf32>
    %3 = tpu.matmul %1, %2, %cst {dimension_numbers = #tpu.dot_dimension_numbers<[1], [0], [0], [1], [0, 0, 1, 1], [], []>} : vector<256x256xbf16>, vector<256x256xbf16>, vector<256x256xf32> -> vector<256x256xf32>
    %c0_4 = arith.constant 0 : index
    %c0_5 = arith.constant 0 : index
    %4 = vector.load %arg5[%c0_4, %c0_5] : memref<1x256xf32, #tpu.memory_space<vmem>>, vector<1x256xf32>
    %5 = vector.broadcast %4 : vector<1x256xf32> to vector<256x256xf32>
    %6 = arith.addf %3, %5 : vector<256x256xf32>
    %cst_6 = arith.constant 0.000000e+00 : f32
    %7 = vector.broadcast %cst_6 : f32 to vector<256x256xf32>
    %8 = arith.maximumf %6, %7 : vector<256x256xf32>
    %9 = arith.truncf %8 : vector<256x256xf32> to vector<256x256xbf16>
    %c0_7 = arith.constant 0 : index
    %c0_8 = arith.constant 0 : index
    %10 = vector.load %arg6[%c0_7, %c0_8] : memref<256x128xbf16, #tpu.memory_space<vmem>>, vector<256x128xbf16>
    %cst_9 = arith.constant dense<0.000000e+00> : vector<256x128xf32>
    %11 = tpu.matmul %9, %10, %cst_9 {dimension_numbers = #tpu.dot_dimension_numbers<[1], [0], [0], [1], [0, 0, 1, 1], [], []>} : vector<256x256xbf16>, vector<256x128xbf16>, vector<256x128xf32> -> vector<256x128xf32>
    %c0_10 = arith.constant 0 : index
    %c0_11 = arith.constant 0 : index
    %12 = vector.load %arg7[%c0_10, %c0_11] : memref<1x128xf32, #tpu.memory_space<vmem>>, vector<1x128xf32>
    %13 = vector.broadcast %12 : vector<1x128xf32> to vector<256x128xf32>
    %14 = arith.addf %11, %13 : vector<256x128xf32>
    %c0_12 = arith.constant 0 : index
    %c0_13 = arith.constant 0 : index
    %c0_14 = arith.constant 0 : index
    %15 = vector.load %arg8[%c0_12, %c0_13, %c0_14] : memref<1x256x128xf32, #tpu.memory_space<vmem>>, vector<1x256x128xf32>
    %16 = vector.shape_cast %15 : vector<1x256x128xf32> to vector<256x128xf32>
    %17 = vector.shape_cast %14 : vector<256x128xf32> to vector<1x256x128xf32>
    tpu.vector_store %arg8[%c0_12, %c0_13, %c0_14], %17 {strides = array<i32>} : memref<1x256x128xf32, #tpu.memory_space<vmem>>, vector<1x256x128xf32>,
    return
  }
  func.func @transform_0(%arg0: i32, %arg1: i32, %arg2: i32) -> (i32, i32, i32) {
    %c0_i32 = arith.constant 0 : i32
    %c0_i32_0 = arith.constant 0 : i32
    return %arg0, %arg1, %c0_i32 : i32, i32, i32
  }
  func.func @transform_1(%arg0: i32, %arg1: i32, %arg2: i32) -> (i32, i32) {
    %c0_i32 = arith.constant 0 : i32
    %c0_i32_0 = arith.constant 0 : i32
    return %c0_i32, %arg2 : i32, i32
  }
  func.func @transform_2(%arg0: i32, %arg1: i32, %arg2: i32) -> (i32, i32) {
    %c0_i32 = arith.constant 0 : i32
    %c0_i32_0 = arith.constant 0 : i32
    return %c0_i32, %arg2 : i32, i32
  }
  func.func @transform_3(%arg0: i32, %arg1: i32, %arg2: i32) -> (i32, i32) {
    %c0_i32 = arith.constant 0 : i32
    %c0_i32_0 = arith.constant 0 : i32
    %c0_i32_1 = arith.constant 0 : i32
    return %c0_i32, %c0_i32_0 : i32, i32
  }
  func.func @transform_4(%arg0: i32, %arg1: i32, %arg2: i32) -> (i32, i32) {
    %c0_i32 = arith.constant 0 : i32
    %c0_i32_0 = arith.constant 0 : i32
    %c0_i32_1 = arith.constant 0 : i32
    return %c0_i32, %c0_i32_0 : i32, i32
  }
  func.func @transform_5(%arg0: i32, %arg1: i32, %arg2: i32) -> (i32, i32, i32) {
    %c0_i32 = arith.constant 0 : i32
    return %arg0, %arg1, %arg2 : i32, i32, i32
  }
}

</mosaic_0001>

<bundles_post_ra>
// kernel: deeplab_head_forward.4
= control target key start
LH: loop header
LB: loop body
LE: loop exit
PB: predicated region body
PF: predicated region fallthrough
CT: control target
= control target key end

     0   :  { %s1315_s12 = smov 0   ;;  %s1317_s13 = smov 0   ;;  %s1452_s0 = inlined_call_operand.vmem [shape: bf16[2,256,128], index: 0, kind: input, shape index: {}]   ;;  %s1453_s1 = inlined_call_operand.vmem [shape: bf16[128,128], index: 1, kind: input, shape index: {}]   ;;  %s1454_s2 = inlined_call_operand.vmem [shape: f32[1,128], index: 2, kind: input, shape index: {}]   ;;  %s1455_s3 = inlined_call_operand.vmem [shape: bf16[2,256,128], index: 3, kind: output, shape index: {}]  }
   0x1   :  { %s1319_s14 = smov 0  }
   0x2 LB: > { %s32_s15 = sadd.s32 1, %s1289_s13  ;;  %p942_p0 = scmp.ge.s32.totalorder %s1293_s14, 1  ;;  %s1293_s14 = sphi %s1319_s14, %s13_s14   ;;  %s1289_s13 = sphi %s1317_s13, %s1457_s13   ;;  %s1285_s12 = sphi %s1315_s12, %s1456_s12  }
   0x3   : > { %p34_p1 = scmp.ge.s32.totalorder %s32_s15, 2  ;;  %p184_p2 = scmp.lt.s32.totalorder %s1293_s14, 3 }
   0x5   : > { %s1459_s15 = smov (%p34_p1, %s32_s15), 0  ;;  %p185_p3 = pnand %p942_p0, %p184_p2 }
   0x6   : > { %v1247_v0 = vld [vmem:[%s1453_s1] sm:$0xff] (!%p185_p3)   ;;  %p227_p4 = scmp.lt.s32.totalorder (!%p185_p3), %s1285_s12, 1  ;;  %v1248_v1 = vld [vmem:[%s1453_s1 + $0x8] sm:$0xff] (!%p185_p3)   ;;  %v1249_v2 = vld [vmem:[%s1453_s1 + $0x10] sm:$0xff] (!%p185_p3)  }
   0x7   : > { %188 = sbr.rel (%p185_p3) target bundleno = 285 (0x11d), region = 32  ;;  %1159 = vmatprep.subr.bf16.mxu0 (!%p185_p3), %v1247_v0  ;;  %1207 = vmatprep.subr.bf16.mxu1 (!%p185_p3), %v1247_v0  ;;  %v1250_v3 = vld [vmem:[%s1453_s1 + $0x18] sm:$0xff] (!%p185_p3)   ;;  %v1251_v6 = vld [vmem:[%s1453_s1 + $0x20] sm:$0xff] (!%p185_p3)   ;;  %v1252_v7 = vld [vmem:[%s1453_s1 + $0x28] sm:$0xff] (!%p185_p3)  }
   0x8   : > { %1160 = vmatpush3.bf16.msra.mxu0 (!%p185_p3), %v1247_v0  ;;  %1215 = vmatpush3.bf16.msra.mxu1 (!%p185_p3), %v1247_v0  ;;  %v1253_v8 = vld [vmem:[%s1453_s1 + $0x30] sm:$0xff] (!%p185_p3)   ;;  %v1254_v9 = vld [vmem:[%s1453_s1 + $0x38] sm:$0xff] (!%p185_p3)   ;;  %v1386_v24 = vld [vmem:[%s1454_s2] ss:$0 sm:$0xff] (!%p185_p3) }
   0x9   : > { %1161 = vmatprep.subr.bf16.mxu0 (!%p185_p3), %v1248_v1  ;;  %1208 = vmatprep.subr.bf16.mxu1 (!%p185_p3), %v1248_v1 }
   0xc   : > { %1162 = vmatpush3.bf16.msra.mxu0 (!%p185_p3), %v1248_v1  ;;  %1216 = vmatpush3.bf16.msra.mxu1 (!%p185_p3), %v1248_v1 }
   0xd   : > { %1163 = vmatprep.subr.bf16.mxu0 (!%p185_p3), %v1249_v2  ;;  %1209 = vmatprep.subr.bf16.mxu1 (!%p185_p3), %v1249_v2 }
   0xe   : > { %s1461_s12 = smov (!%p227_p4, %s1285_s12), 1 }
   0xf   : > { %s1006_s22 = sshll.u32 %s1461_s12, 7 }
  0x10   : > { %s1350_s25 = scalar_lea.vmem %s1452_s0, %s1006_s22  ;;  %1164 = vmatpush3.bf16.msra.mxu0 %v1249_v2  ;;  %1217 = vmatpush3.bf16.msra.mxu1 %v1249_v2  ;;  %s1401_s17 = scalar_lea.vmem %s1455_s3, %s1006_s22 }
  0x11   : > { %v1255_v4 = vld [vmem:[%s1350_s25] sm:$0xff]   ;;  %1165 = vmatprep.subr.bf16.mxu0 %v1250_v3  ;;  %1210 = vmatprep.subr.bf16.mxu1 %v1250_v3  ;;  %v1257_v10 = vld [vmem:[%s1350_s25 + $0x8] sm:$0xff]   ;;  %v1259_v12 = vld [vmem:[%s1350_s25 + $0x10] sm:$0xff]  }
  0x12   : > { %v1256_v5 = vld [vmem:[%s1350_s25 + $0x40] sm:$0xff]   ;;  %1175 = vmatprep.mubr.bf16.mxu0 %v1255_v4  ;;  %v1258_v11 = vld [vmem:[%s1350_s25 + $0x48] sm:$0xff]   ;;  %v1260_v13 = vld [vmem:[%s1350_s25 + $0x50] sm:$0xff]  }
  0x13   : > { %1191 = vmatprep.mubr.bf16.mxu1 %v1256_v5  ;;  %v1261_v14 = vld [vmem:[%s1350_s25 + $0x18] sm:$0xff]   ;;  %v1263_v16 = vld [vmem:[%s1350_s25 + $0x20] sm:$0xff]   ;;  %v1265_v18 = vld [vmem:[%s1350_s25 + $0x28] sm:$0xff]  }
  0x14   : > { %1166 = vmatpush3.bf16.msra.mxu0 %v1250_v3  ;;  %1218 = vmatpush3.bf16.msra.mxu1 %v1250_v3  ;;  %v1262_v15 = vld [vmem:[%s1350_s25 + $0x58] sm:$0xff]   ;;  %v1264_v17 = vld [vmem:[%s1350_s25 + $0x60] sm:$0xff]   ;;  %v1266_v19 = vld [vmem:[%s1350_s25 + $0x68] sm:$0xff]  }
  0x15   : > { %1167 = vmatprep.subr.bf16.mxu0 %v1251_v6  ;;  %1211 = vmatprep.subr.bf16.mxu1 %v1251_v6  ;;  %v1267_v20 = vld [vmem:[%s1350_s25 + $0x30] sm:$0xff]   ;;  %v1269_v22 = vld [vmem:[%s1350_s25 + $0x38] sm:$0xff]  }
  0x16   : > { %v1268_v21 = vld [vmem:[%s1350_s25 + $0x70] sm:$0xff]   ;;  %v1270_v23 = vld [vmem:[%s1350_s25 + $0x78] sm:$0xff]  }
  0x18   : > { %1168 = vmatpush3.bf16.msra.mxu0 %v1251_v6  ;;  %1219 = vmatpush3.bf16.msra.mxu1 %v1251_v6 }
  0x19   : > { %1169 = vmatprep.subr.bf16.mxu0 %v1252_v7  ;;  %1212 = vmatprep.subr.bf16.mxu1 %v1252_v7 }
  0x1c   : > { %1170 = vmatpush3.bf16.msra.mxu0 %v1252_v7  ;;  %1220 = vmatpush3.bf16.msra.mxu1 %v1252_v7 }
  0x1d   : > { %1171 = vmatprep.subr.bf16.mxu0 %v1253_v8  ;;  %1213 = vmatprep.subr.bf16.mxu1 %v1253_v8 }
  0x20   : > { %1172 = vmatpush3.bf16.msra.mxu0 %v1253_v8  ;;  %1221 = vmatpush3.bf16.msra.mxu1 %v1253_v8 }
  0x21   : > { %1173 = vmatprep.subr.bf16.mxu0 %v1254_v9  ;;  %1214 = vmatprep.subr.bf16.mxu1 %v1254_v9 }
  0x24   : > { %1174 = vmatpush3.bf16.msra.mxu0 %v1254_v9  ;;  %1222 = vmatpush3.bf16.msra.mxu1 %v1254_v9 }
  0x27   : > { %1176 = vmatmul.mubr.bf16.vlgmr.msra.gmra.mrb[0].mxu0 %v1257_v10  ;;  %1192 = vmatmul.mubr.bf16.vlgmr.msra.gmra.mrb[0].mxu1 %v1258_v11 }
  0x28   : > { %1179 = vmatprep.mubr.bf16.mxu0 %v1259_v12  ;;  %1195 = vmatprep.mubr.bf16.mxu1 %v1260_v13 }
  0x2f   : > { %1180 = vmatmul.mubr.bf16.gmra.mrb[4].mxu0 %v1261_v14  ;;  %1196 = vmatmul.mubr.bf16.gmra.mrb[4].mxu1 %v1262_v15 }
  0x30   : > { %1183 = vmatprep.mubr.bf16.mxu0 %v1263_v16  ;;  %1199 = vmatprep.mubr.bf16.mxu1 %v1264_v17 }
  0x37   : > { %1184 = vmatmul.mubr.bf16.gmra.mrb[8].mxu0 %v1265_v18  ;;  %1200 = vmatmul.mubr.bf16.gmra.mrb[8].mxu1 %v1266_v19 }
  0x38   : > { %1187 = vmatprep.mubr.bf16.mxu0 %v1267_v20  ;;  %1203 = vmatprep.mubr.bf16.mxu1 %v1268_v21 }
  0x3f   : > { %1188 = vmatmul.mubr.bf16.gmra.mrb[12].mxu0 %v1269_v22  ;;  %1204 = vmatmul.mubr.bf16.gmra.mrb[12].mxu1 %v1270_v23 }
  0xfa   : > { %v1177_v25 = vpop.f32.mrb[0].mxu0  ;;  %v1193_v26 = vpop.f32.mrb[0].mxu1 }
  0xfb   : > { %v499_v27 = vadd.f32 %v1177_v25, %v1386_v24  ;;  %v563_v28 = vadd.f32 %v1193_v26, %v1386_v24  ;;  %v490_v29 = vpop.f32.mrb[1].mxu0  ;;  %v554_v30 = vpop.f32.mrb[1].mxu1 }
  0xfc   : > { %v491_v31 = vadd.f32 %v1386_v24, %v490_v29  ;;  %v555_v32 = vadd.f32 %v1386_v24, %v554_v30  ;;  %v1178_v33 = vpop.f32.mrb[2].mxu0  ;;  %v1194_v34 = vpop.f32.mrb[2].mxu1 }
  0xfd   : > { %v502_v35 = vadd.f32 %v1178_v33, %v1386_v24  ;;  %v566_v36 = vadd.f32 %v1194_v34, %v1386_v24  ;;  %v493_v37 = vpop.f32.mrb[3].mxu0  ;;  %v557_v38 = vpop.f32.mrb[3].mxu1  ;;  %v619_v41 = vmax.f32 %v499_v27, 0.0  ;;  %v635_v42 = vmax.f32 %v563_v28, 0.0 }
  0xfe   : > { %v494_v39 = vadd.f32 %v1386_v24, %v493_v37  ;;  %v558_v40 = vadd.f32 %v1386_v24, %v557_v38  ;;  %v617_v45 = vmax.f32 %v491_v31, 0.0  ;;  %v633_v46 = vmax.f32 %v555_v32, 0.0 }
  0xff   : > { %v620_v43 = vmax.f32 %v502_v35, 0.0  ;;  %v636_v44 = vmax.f32 %v566_v36, 0.0 }
 0x100   : > { %v618_v47 = vmax.f32 %v494_v39, 0.0  ;;  %v634_v48 = vmax.f32 %v558_v40, 0.0 }
 0x101   : > { %v1048_v49 = vpack.c.bf16 %v620_v43, %v619_v41  ;;  %v1088_v50 = vpack.c.bf16 %v636_v44, %v635_v42 }
 0x102   : > { %v1043_v51 = vpack.c.bf16 %v618_v47, %v617_v45  ;;  %v1083_v52 = vpack.c.bf16 %v634_v48, %v633_v46  ;;  %v1181_v53 = vpop.f32.mrb[4].mxu0  ;;  %v1197_v54 = vpop.f32.mrb[4].mxu1 }
 0x103   : > { %1120 = vst [vmem:[%s1401_s17 + $0x8] sm:$0xff] %v1048_v49   ;;  %1128 = vst [vmem:[%s1401_s17 + $0x48] sm:$0xff] %v1088_v50   ;;  %v515_v55 = vadd.f32 %v1181_v53, %v1386_v24  ;;  %v579_v56 = vadd.f32 %v1197_v54, %v1386_v24  ;;  %v506_v57 = vpop.f32.mrb[5].mxu0  ;;  %v570_v58 = vpop.f32.mrb[5].mxu1 }
 0x104   : > { %1044 = vst [vmem:[%s1401_s17] sm:$0xff] %v1043_v51   ;;  %1127 = vst [vmem:[%s1401_s17 + $0x40] sm:$0xff] %v1083_v52   ;;  %v507_v59 = vadd.f32 %v1386_v24, %v506_v57  ;;  %v571_v60 = vadd.f32 %v1386_v24, %v570_v58  ;;  %v1182_v61 = vpop.f32.mrb[6].mxu0  ;;  %v1198_v62 = vpop.f32.mrb[6].mxu1 }
 0x105   : > { %v518_v63 = vadd.f32 %v1182_v61, %v1386_v24  ;;  %v582_v0 = vadd.f32 %v1198_v62, %v1386_v24  ;;  %v509_v1 = vpop.f32.mrb[7].mxu0  ;;  %v573_v2 = vpop.f32.mrb[7].mxu1  ;;  %v623_v5 = vmax.f32 %v515_v55, 0.0  ;;  %v639_v6 = vmax.f32 %v579_v56, 0.0 }
 0x106   : > { %v510_v3 = vadd.f32 %v1386_v24, %v509_v1  ;;  %v574_v4 = vadd.f32 %v1386_v24, %v573_v2  ;;  %v621_v9 = vmax.f32 %v507_v59, 0.0  ;;  %v637_v10 = vmax.f32 %v571_v60, 0.0 }
 0x107   : > { %v624_v7 = vmax.f32 %v518_v63, 0.0  ;;  %v640_v8 = vmax.f32 %v582_v0, 0.0 }
 0x108   : > { %v622_v11 = vmax.f32 %v510_v3, 0.0  ;;  %v638_v12 = vmax.f32 %v574_v4, 0.0 }
 0x109   : > { %v1058_v13 = vpack.c.bf16 %v624_v7, %v623_v5  ;;  %v1098_v14 = vpack.c.bf16 %v640_v8, %v639_v6 }
 0x10a   : > { %v1053_v15 = vpack.c.bf16 %v622_v11, %v621_v9  ;;  %v1093_v16 = vpack.c.bf16 %v638_v12, %v637_v10  ;;  %v1185_v17 = vpop.f32.mrb[8].mxu0  ;;  %v1201_v18 = vpop.f32.mrb[8].mxu1 }
 0x10b   : > { %1122 = vst [vmem:[%s1401_s17 + $0x18] sm:$0xff] %v1058_v13   ;;  %1130 = vst [vmem:[%s1401_s17 + $0x58] sm:$0xff] %v1098_v14   ;;  %v531_v19 = vadd.f32 %v1185_v17, %v1386_v24  ;;  %v595_v20 = vadd.f32 %v1201_v18, %v1386_v24  ;;  %v522_v21 = vpop.f32.mrb[9].mxu0  ;;  %v586_v22 = vpop.f32.mrb[9].mxu1 }
 0x10c   : > { %1121 = vst [vmem:[%s1401_s17 + $0x10] sm:$0xff] %v1053_v15   ;;  %1129 = vst [vmem:[%s1401_s17 + $0x50] sm:$0xff] %v1093_v16   ;;  %v523_v23 = vadd.f32 %v1386_v24, %v522_v21  ;;  %v587_v25 = vadd.f32 %v1386_v24, %v586_v22  ;;  %v1186_v26 = vpop.f32.mrb[10].mxu0  ;;  %v1202_v27 = vpop.f32.mrb[10].mxu1 }
 0x10d   : > { %v534_v28 = vadd.f32 %v1186_v26, %v1386_v24  ;;  %v598_v29 = vadd.f32 %v1202_v27, %v1386_v24  ;;  %v525_v30 = vpop.f32.mrb[11].mxu0  ;;  %v589_v31 = vpop.f32.mrb[11].mxu1  ;;  %v627_v34 = vmax.f32 %v531_v19, 0.0  ;;  %v643_v35 = vmax.f32 %v595_v20, 0.0 }
 0x10e   : > { %v526_v32 = vadd.f32 %v1386_v24, %v525_v30  ;;  %v590_v33 = vadd.f32 %v1386_v24, %v589_v31  ;;  %v625_v38 = vmax.f32 %v523_v23, 0.0  ;;  %v641_v39 = vmax.f32 %v587_v25, 0.0 }
 0x10f   : > { %v628_v36 = vmax.f32 %v534_v28, 0.0  ;;  %v644_v37 = vmax.f32 %v598_v29, 0.0 }
 0x110   : > { %v626_v40 = vmax.f32 %v526_v32, 0.0  ;;  %v642_v41 = vmax.f32 %v590_v33, 0.0 }
 0x111   : > { %v1068_v42 = vpack.c.bf16 %v628_v36, %v627_v34  ;;  %v1108_v43 = vpack.c.bf16 %v644_v37, %v643_v35 }
 0x112   : > { %v1063_v44 = vpack.c.bf16 %v626_v40, %v625_v38  ;;  %v1103_v45 = vpack.c.bf16 %v642_v41, %v641_v39  ;;  %v1189_v46 = vpop.f32.mrb[12].mxu0  ;;  %v1205_v47 = vpop.f32.mrb[12].mxu1 }
 0x113   : > { %1124 = vst [vmem:[%s1401_s17 + $0x28] sm:$0xff] %v1068_v42   ;;  %1132 = vst [vmem:[%s1401_s17 + $0x68] sm:$0xff] %v1108_v43   ;;  %v547_v48 = vadd.f32 %v1189_v46, %v1386_v24  ;;  %v611_v49 = vadd.f32 %v1205_v47, %v1386_v24  ;;  %v538_v50 = vpop.f32.mrb[13].mxu0  ;;  %v602_v51 = vpop.f32.mrb[13].mxu1 }
 0x114   : > { %1123 = vst [vmem:[%s1401_s17 + $0x20] sm:$0xff] %v1063_v44   ;;  %1131 = vst [vmem:[%s1401_s17 + $0x60] sm:$0xff] %v1103_v45   ;;  %v539_v52 = vadd.f32 %v1386_v24, %v538_v50  ;;  %v603_v53 = vadd.f32 %v1386_v24, %v602_v51  ;;  %v1190_v54 = vpop.f32.mrb[14].mxu0  ;;  %v1206_v55 = vpop.f32.mrb[14].mxu1 }
 0x115   : > { %v550_v56 = vadd.f32 %v1190_v54, %v1386_v24  ;;  %v614_v57 = vadd.f32 %v1206_v55, %v1386_v24  ;;  %v541_v58 = vpop.f32.mrb[15].mxu0  ;;  %v605_v59 = vpop.f32.mrb[15].mxu1  ;;  %v631_v62 = vmax.f32 %v547_v48, 0.0  ;;  %v647_v63 = vmax.f32 %v611_v49, 0.0 }
 0x116   : > { %v542_v60 = vadd.f32 %v1386_v24, %v541_v58  ;;  %v606_v61 = vadd.f32 %v1386_v24, %v605_v59  ;;  %v629_v2 = vmax.f32 %v539_v52, 0.0  ;;  %v645_v3 = vmax.f32 %v603_v53, 0.0 }
 0x117   : > { %v632_v0 = vmax.f32 %v550_v56, 0.0  ;;  %v648_v1 = vmax.f32 %v614_v57, 0.0 }
 0x118   : > { %v630_v4 = vmax.f32 %v542_v60, 0.0  ;;  %v646_v5 = vmax.f32 %v606_v61, 0.0 }
 0x119   : > { %v1078_v6 = vpack.c.bf16 %v632_v0, %v631_v62  ;;  %v1118_v7 = vpack.c.bf16 %v648_v1, %v647_v63 }
 0x11a   : > { %v1073_v8 = vpack.c.bf16 %v630_v4, %v629_v2  ;;  %v1113_v9 = vpack.c.bf16 %v646_v5, %v645_v3 }
 0x11b   : > { %1126 = vst [vmem:[%s1401_s17 + $0x38] sm:$0xff] %v1078_v6   ;;  %1134 = vst [vmem:[%s1401_s17 + $0x78] sm:$0xff] %v1118_v7  }
 0x11c   : > { %1125 = vst [vmem:[%s1401_s17 + $0x30] sm:$0xff] %v1073_v8   ;;  %1133 = vst [vmem:[%s1401_s17 + $0x70] sm:$0xff] %v1113_v9  }
 0x11d PF: > { %s13_s14 = sadd.s32 1, %s1293_s14   ;;  %s1456_s12 = smov %s1289_s13 }
 0x11e   : > { %p10_p5 = scmp.ge.s32.totalorder %s13_s14, 4   ;;  %s1457_s13 = smov %s1459_s15 }
 0x120   :  { %12 = sbr.rel (!%p10_p5) target bundleno = 2 (0x2), region = 68 }

// kernel: deeplab_head_forward.5
= control target key start
LH: loop header
LB: loop body
LE: loop exit
PB: predicated region body
PF: predicated region fallthrough
CT: control target
= control target key end

     0   :  { %s3814_s27 = smov 0   ;;  %s3816_s28 = smov 0   ;;  %s4698_s0 = inlined_call_operand.vmem [shape: bf16[2,64,128], index: 0, kind: input, shape index: {}]   ;;  %s4699_s1 = inlined_call_operand.vmem [shape: bf16[2,64,128], index: 1, kind: input, shape index: {}]   ;;  %s4700_s2 = inlined_call_operand.vmem [shape: bf16[2,64,128], index: 2, kind: input, shape index: {}]   ;;  %s4701_s3 = inlined_call_operand.vmem [shape: bf16[2,64,128], index: 3, kind: input, shape index: {}]   ;;  %s4702_s4 = inlined_call_operand.vmem [shape: bf16[128,256], index: 4, kind: input, shape index: {}]   ;;  %s4703_s5 = inlined_call_operand.vmem [shape: bf16[128,256], index: 5, kind: input, shape index: {}]   ;;  %s4704_s6 = inlined_call_operand.vmem [shape: bf16[128,256], index: 6, kind: input, shape index: {}]   ;;  %s4705_s7 = inlined_call_operand.vmem [shape: bf16[128,256], index: 7, kind: input, shape index: {}]   ;;  %s4706_s8 = inlined_call_operand.vmem [shape: f32[1,256], index: 8, kind: input, shape index: {}]   ;;  %s4707_s9 = inlined_call_operand.vmem [shape: f32[1,256], index: 9, kind: input, shape index: {}]   ;;  %s4708_s10 = inlined_call_operand.vmem [shape: f32[1,256], index: 10, kind: input, shape index: {}]   ;;  %s4709_s11 = inlined_call_operand.vmem [shape: f32[1,256], index: 11, kind: input, shape index: {}]   ;;  %s4710_s12 = inlined_call_operand.vmem [shape: bf16[256,256], index: 12, kind: input, shape index: {}]   ;;  %s4711_s13 = inlined_call_operand.vmem [shape: bf16[256,256], index: 13, kind: input, shape index: {}]   ;;  %s4712_s14 = inlined_call_operand.vmem [shape: bf16[256,256], index: 14, kind: input, shape index: {}]   ;;  %s4713_s15 = inlined_call_operand.vmem [shape: bf16[256,256], index: 15, kind: input, shape index: {}]   ;;  %s4714_s16 = inlined_call_operand.vmem [shape: f32[1,256], index: 16, kind: input, shape index: {}]   ;;  %s4715_s17 = inlined_call_operand.vmem [shape: f32[2,1,256], index: 17, kind: input, shape index: {}]   ;;  %s4716_s18 = inlined_call_operand.vmem [shape: bf16[2,64,256], index: 18, kind: output, shape index: {}]  }
   0x1   :  { %4719 = sst [smem:[#allocation5_spill]] %s4698_s0  ;;  %s3818_s29 = smov 0  }
   0x2   :  { %4720 = sst [smem:[#allocation6_spill]] %s4699_s1 }
   0x3   :  { %4721 = sst [smem:[#allocation7_spill]] %s4700_s2 }
   0x4 LB: > { %4722 = sst [smem:[#allocation2_spill]] %s3712_s28  ;;  %s40_s30 = sadd.s32 1, %s3712_s28  ;;  %s3716_s29 = sphi %s3818_s29, %s28_s29   ;;  %s3712_s28 = sphi %s3816_s28, %s4730_s28   ;;  %s3708_s27 = sphi %s3814_s27, %s4729_s27  }
   0x5   : > { %4723 = sst [smem:[#allocation3_spill]] %s3716_s29  ;;  %p3074_p0 = scmp.ge.s32.totalorder %s3716_s29, 1 }
   0x6   : > { %p42_p1 = scmp.ge.s32.totalorder %s40_s30, 2  ;;  %p593_p2 = scmp.lt.s32.totalorder %s3716_s29, 3 }
   0x8   : > { %s4732_s30 = smov (%p42_p1, %s40_s30), 0  ;;  %p594_p3 = pnand %p3074_p0, %p593_p2 }
   0x9   : > { %4724 = sst [smem:[#allocation4_spill]] %s4732_s30  ;;  %v3390_v0 = vld [vmem:[%s4702_s4 + $0x4] ss:$8 sps:$4 sm:$0xff] (!%p594_p3)   ;;  %p688_p4 = scmp.lt.s32.totalorder (!%p594_p3), %s3708_s27, 1  ;;  %v3392_v1 = vld [vmem:[%s4702_s4] ss:$8 sps:$4 sm:$0xff] (!%p594_p3)  }
   0xa   : > { %597 = sbr.rel (%p594_p3) target bundleno = 864 (0x360), region = 92  ;;  %v3718_v2 = vmov (!%p594_p3), 0   ;;  %883 = vmatprep.subr.bf16.mxu1 (!%p594_p3), %v3390_v0  ;;  %v3393_v3 = vld [vmem:[%s4702_s4 + $0x14] ss:$8 sps:$4 sm:$0xff] (!%p594_p3)   ;;  %v3395_v4 = vld [vmem:[%s4702_s4 + $0x10] ss:$8 sps:$4 sm:$0xff] (!%p594_p3)  }
   0xb   : > { %915 = vmatprep.mubr.bf16.mxu1 (!%p594_p3), %v3718_v2  ;;  %884 = vmatpush1.bf16.msra.mxu1 (!%p594_p3), %v3392_v1  ;;  %v3396_v5 = vld [vmem:[%s4702_s4 + $0x24] ss:$8 sps:$4 sm:$0xff] (!%p594_p3)   ;;  %v3398_v6 = vld [vmem:[%s4702_s4 + $0x20] ss:$8 sps:$4 sm:$0xff] (!%p594_p3)   ;;  %v3399_v7 = vld [vmem:[%s4702_s4 + $0x34] ss:$8 sps:$4 sm:$0xff] (!%p594_p3)  }
   0xc   : > { %885 = vmatprep.subr.bf16.mxu1 (!%p594_p3), %v3393_v3  ;;  %s4725_s2 = sld [smem:[#allocation5_spill]] (!%p594_p3)  ;;  %v3401_v8 = vld [vmem:[%s4702_s4 + $0x30] ss:$8 sps:$4 sm:$0xff] (!%p594_p3)   ;;  %v3402_v9 = vld [vmem:[%s4702_s4 + $0x44] ss:$8 sps:$4 sm:$0xff] (!%p594_p3)   ;;  %s4726_s28 = sld [smem:[#allocation6_spill]] (!%p594_p3) }
   0xd   : > { %v3404_v10 = vld [vmem:[%s4702_s4 + $0x40] ss:$8 sps:$4 sm:$0xff] (!%p594_p3)   ;;  %v3405_v11 = vld [vmem:[%s4702_s4 + $0x54] ss:$8 sps:$4 sm:$0xff] (!%p594_p3)   ;;  %v3407_v12 = vld [vmem:[%s4702_s4 + $0x50] ss:$8 sps:$4 sm:$0xff] (!%p594_p3)  }
   0xe   : > { %v3408_v13 = vld [vmem:[%s4702_s4 + $0x64] ss:$8 sps:$4 sm:$0xff] (!%p594_p3)   ;;  %v3410_v14 = vld [vmem:[%s4702_s4 + $0x60] ss:$8 sps:$4 sm:$0xff] (!%p594_p3)   ;;  %v3411_v15 = vld [vmem:[%s4702_s4 + $0x74] ss:$8 sps:$4 sm:$0xff] (!%p594_p3)  }
   0xf   : > { %886 = vmatpush1.bf16.msra.mxu1 (!%p594_p3), %v3395_v4  ;;  %v3413_v16 = vld [vmem:[%s4702_s4 + $0x70] ss:$8 sps:$4 sm:$0xff] (!%p594_p3)   ;;  %v3417_v18 = vld [vmem:[%s4703_s5 + $0x4] ss:$8 sps:$4 sm:$0xff] (!%p594_p3)   ;;  %v3415_v19 = vld [vmem:[%s4703_s5] ss:$8 sps:$4 sm:$0xff] (!%p594_p3)  }
  0x10   : > { %887 = vmatprep.subr.bf16.mxu1 (!%p594_p3), %v3396_v5  ;;  %v3446_v20 = vld [vmem:[%s4710_s12 + $0x4] ss:$8 sps:$4 sm:$0xff] (!%p594_p3)   ;;  %v3448_v21 = vld [vmem:[%s4710_s12] ss:$8 sps:$4 sm:$0xff] (!%p594_p3)   ;;  %v3449_v22 = vld [vmem:[%s4710_s12 + $0x14] ss:$8 sps:$4 sm:$0xff] (!%p594_p3)  }
  0x11   : > { %s4734_s27 = smov (!%p688_p4, %s3708_s27), 1  ;;  %v3420_v23 = vld [vmem:[%s4703_s5 + $0x14] ss:$8 sps:$4 sm:$0xff]   ;;  %1674 = vmatprep.subr.bf16.mxu0 %v3446_v20  ;;  %v3451_v24 = vld [vmem:[%s4710_s12 + $0x10] ss:$8 sps:$4 sm:$0xff]   ;;  %s4727_s29 = sld [smem:[#allocation7_spill]] }
  0x12   : > { %s3851_s26 = sshll.u32 %s4734_s27, 5  ;;  %1675 = vmatpush1.bf16.msra.mxu0 %v3448_v21  ;;  %v3452_v25 = vld [vmem:[%s4710_s12 + $0x24] ss:$8 sps:$4 sm:$0xff]   ;;  %v3418_v26 = vld [vmem:[%s4703_s5 + $0x10] ss:$8 sps:$4 sm:$0xff]  }
  0x13   : > { %s3863_s23 = scalar_lea.vmem %s4725_s2, %s3851_s26  ;;  %888 = vmatpush1.bf16.msra.mxu1 %v3398_v6  ;;  %s3893_s22 = scalar_lea.vmem %s4726_s28, %s3851_s26  ;;  %1676 = vmatprep.subr.bf16.mxu0 %v3449_v22  ;;  %v3424_v27 = vld [vmem:[%s4703_s5 + $0x24] ss:$8 sps:$4 sm:$0xff]   ;;  %v3454_v28 = vld [vmem:[%s4710_s12 + $0x20] ss:$8 sps:$4 sm:$0xff]   ;;  %v3455_v30 = vld [vmem:[%s4710_s12 + $0x34] ss:$8 sps:$4 sm:$0xff]  }
  0x14   : > { %889 = vmatprep.subr.bf16.mxu1 %v3399_v7  ;;  %v3414_v17 = vld [vmem:[%s3863_s23] sm:$0xff]   ;;  %v3421_v29 = vld [vmem:[%s3863_s23 + $0x8] sm:$0xff]   ;;  %v3427_v32 = vld [vmem:[%s4703_s5 + $0x34] ss:$8 sps:$4 sm:$0xff]   ;;  %s4166_s30 = scalar_lea.vmem %s4701_s3, %s3851_s26  ;;  %s3308_s28 = sshll.u32 %s4734_s27, 6 }
  0x15   : > { %v3422_v31 = vld [vmem:[%s4703_s5 + $0x20] ss:$8 sps:$4 sm:$0xff]   ;;  %v3457_v33 = vld [vmem:[%s4710_s12 + $0x30] ss:$8 sps:$4 sm:$0xff]   ;;  %v3458_v34 = vld [vmem:[%s4710_s12 + $0x44] ss:$8 sps:$4 sm:$0xff]   ;;  %s4643_s2 = scalar_lea.vmem %s4716_s18, %s3308_s28 }
  0x16   : > { %1677 = vmatpush1.bf16.msra.mxu0 %v3451_v24  ;;  %v3425_v35 = vld [vmem:[%s4703_s5 + $0x30] ss:$8 sps:$4 sm:$0xff]   ;;  %v3431_v36 = vld [vmem:[%s4703_s5 + $0x44] ss:$8 sps:$4 sm:$0xff]   ;;  %v3460_v37 = vld [vmem:[%s4710_s12 + $0x40] ss:$8 sps:$4 sm:$0xff]  }
  0x17   : > { %890 = vmatpush1.bf16.msra.mxu1 %v3401_v8  ;;  %1678 = vmatprep.subr.bf16.mxu0 %v3452_v25  ;;  %v3428_v38 = vld [vmem:[%s3863_s23 + $0x10] sm:$0xff]   ;;  %v3429_v40 = vld [vmem:[%s4703_s5 + $0x40] ss:$8 sps:$4 sm:$0xff]   ;;  %v3464_v43 = vld [vmem:[%s4710_s12 + $0x64] ss:$8 sps:$4 sm:$0xff]   ;;  %s4160_s21 = scalar_lea.vmem %s4727_s29, %s3851_s26 }
  0x18   : > { %891 = vmatprep.subr.bf16.mxu1 %v3402_v9  ;;  %v3461_v39 = vld [vmem:[%s4710_s12 + $0x54] ss:$8 sps:$4 sm:$0xff]   ;;  %v3463_v42 = vld [vmem:[%s4710_s12 + $0x50] ss:$8 sps:$4 sm:$0xff]   ;;  %v3438_v46 = vld [vmem:[%s4703_s5 + $0x64] ss:$8 sps:$4 sm:$0xff]  }
  0x19   : > { %v3434_v41 = vld [vmem:[%s4703_s5 + $0x54] ss:$8 sps:$4 sm:$0xff]   ;;  %v3432_v44 = vld [vmem:[%s4703_s5 + $0x50] ss:$8 sps:$4 sm:$0xff]   ;;  %v3436_v47 = vld [vmem:[%s4703_s5 + $0x60] ss:$8 sps:$4 sm:$0xff]  }
  0x1a   : > { %1679 = vmatpush1.bf16.msra.mxu0 %v3454_v28  ;;  %v3435_v45 = vld [vmem:[%s3863_s23 + $0x18] sm:$0xff]   ;;  %v3466_v48 = vld [vmem:[%s4710_s12 + $0x60] ss:$8 sps:$4 sm:$0xff]   ;;  %v3473_v52 = vld [vmem:[%s4710_s12 + $0x84] ss:$8 sps:$4 sm:$0xff]  }
  0x1b   : > { %892 = vmatpush1.bf16.msra.mxu1 %v3404_v10  ;;  %1680 = vmatprep.subr.bf16.mxu0 %v3455_v30  ;;  %v3441_v49 = vld [vmem:[%s4703_s5 + $0x74] ss:$8 sps:$4 sm:$0xff]   ;;  %v3469_v51 = vld [vmem:[%s4710_s12 + $0x70] ss:$8 sps:$4 sm:$0xff]   ;;  %v3472_v54 = vld [vmem:[%s4711_s13 + $0x4] ss:$8 sps:$4 sm:$0xff]  }
  0x1c   : > { %893 = vmatprep.subr.bf16.mxu1 %v3405_v11  ;;  %v3467_v50 = vld [vmem:[%s4710_s12 + $0x74] ss:$8 sps:$4 sm:$0xff]   ;;  %v3439_v53 = vld [vmem:[%s4703_s5 + $0x70] ss:$8 sps:$4 sm:$0xff]   ;;  %v3475_v55 = vld [vmem:[%s4710_s12 + $0x80] ss:$8 sps:$4 sm:$0xff]  }
  0x1d   : > { %v3442_v56 = vld [vmem:[%s3893_s22] sm:$0xff]   ;;  %v3479_v57 = vld [vmem:[%s4710_s12 + $0x94] ss:$8 sps:$4 sm:$0xff]   ;;  %v3481_v60 = vld [vmem:[%s4710_s12 + $0x90] ss:$8 sps:$4 sm:$0xff]  }
  0x1e   : > { %1681 = vmatpush1.bf16.msra.mxu0 %v3457_v33  ;;  %v3470_v58 = vld [vmem:[%s4711_s13] ss:$8 sps:$4 sm:$0xff]   ;;  %v3478_v59 = vld [vmem:[%s4711_s13 + $0x14] ss:$8 sps:$4 sm:$0xff]   ;;  %v3485_v61 = vld [vmem:[%s4710_s12 + $0xa4] ss:$8 sps:$4 sm:$0xff]  }
  0x1f   : > { %894 = vmatpush1.bf16.msra.mxu1 %v3407_v12  ;;  %1682 = vmatprep.subr.bf16.mxu0 %v3458_v34  ;;  %v3476_v62 = vld [vmem:[%s4711_s13 + $0x10] ss:$8 sps:$4 sm:$0xff]   ;;  %v3484_v63 = vld [vmem:[%s4711_s13 + $0x24] ss:$8 sps:$4 sm:$0xff]   ;;  %v3487_v0 = vld [vmem:[%s4710_s12 + $0xa0] ss:$8 sps:$4 sm:$0xff]  }
  0x20   : > { %895 = vmatprep.subr.bf16.mxu1 %v3408_v13  ;;  %v3443_v1 = vld [vmem:[%s3893_s22 + $0x8] sm:$0xff]   ;;  %v3491_v3 = vld [vmem:[%s4710_s12 + $0xb4] ss:$8 sps:$4 sm:$0xff]   ;;  %v3493_v6 = vld [vmem:[%s4710_s12 + $0xb0] ss:$8 sps:$4 sm:$0xff]  }
  0x21   : > { %v3482_v4 = vld [vmem:[%s4711_s13 + $0x20] ss:$8 sps:$4 sm:$0xff]   ;;  %v3490_v5 = vld [vmem:[%s4711_s13 + $0x34] ss:$8 sps:$4 sm:$0xff]   ;;  %v3497_v7 = vld [vmem:[%s4710_s12 + $0xc4] ss:$8 sps:$4 sm:$0xff]  }
  0x22   : > { %1683 = vmatpush1.bf16.msra.mxu0 %v3460_v37  ;;  %v3488_v8 = vld [vmem:[%s4711_s13 + $0x30] ss:$8 sps:$4 sm:$0xff]   ;;  %v3496_v9 = vld [vmem:[%s4711_s13 + $0x44] ss:$8 sps:$4 sm:$0xff]   ;;  %v3499_v10 = vld [vmem:[%s4710_s12 + $0xc0] ss:$8 sps:$4 sm:$0xff]  }
  0x23   : > { %896 = vmatpush1.bf16.msra.mxu1 %v3410_v14  ;;  %1684 = vmatprep.subr.bf16.mxu0 %v3461_v39  ;;  %v3444_v11 = vld [vmem:[%s3893_s22 + $0x10] sm:$0xff]   ;;  %v3494_v13 = vld [vmem:[%s4711_s13 + $0x40] ss:$8 sps:$4 sm:$0xff]   ;;  %v3526_v30 = vld [vmem:[%s4711_s13 + $0xa4] ss:$8 sps:$4 sm:$0xff]  }
  0x24   : > { %897 = vmatprep.subr.bf16.mxu1 %v3411_v15  ;;  %v3503_v12 = vld [vmem:[%s4710_s12 + $0xd4] ss:$8 sps:$4 sm:$0xff]   ;;  %v3500_v15 = vld [vmem:[%s4711_s13 + $0x50] ss:$8 sps:$4 sm:$0xff]   ;;  %v3506_v20 = vld [vmem:[%s4711_s13 + $0x60] ss:$8 sps:$4 sm:$0xff]  }
  0x25   : > { %v3502_v14 = vld [vmem:[%s4711_s13 + $0x54] ss:$8 sps:$4 sm:$0xff]   ;;  %v3511_v21 = vld [vmem:[%s4710_s12 + $0xe0] ss:$8 sps:$4 sm:$0xff]   ;;  %v3512_v24 = vld [vmem:[%s4711_s13 + $0x70] ss:$8 sps:$4 sm:$0xff]  }
  0x26   : > { %1685 = vmatpush1.bf16.msra.mxu0 %v3463_v42  ;;  %v3514_v22 = vld [vmem:[%s4711_s13 + $0x74] ss:$8 sps:$4 sm:$0xff]   ;;  %v3517_v25 = vld [vmem:[%s4710_s12 + $0xf0] ss:$8 sps:$4 sm:$0xff]   ;;  %v3532_v34 = vld [vmem:[%s4711_s13 + $0xc4] ss:$8 sps:$4 sm:$0xff]  }
  0x27   : > { %898 = vmatpush1.bf16.msra.mxu1 %v3413_v16  ;;  %1686 = vmatprep.subr.bf16.mxu0 %v3464_v43  ;;  %v3445_v16 = vld [vmem:[%s3893_s22 + $0x18] sm:$0xff]   ;;  %v3536_v39 = vld [vmem:[%s4711_s13 + $0xe0] ss:$8 sps:$4 sm:$0xff]   ;;  %v3544_v42 = vld [vmem:[%s4704_s6 + $0x4] ss:$8 sps:$4 sm:$0xff]   ;;  %v769_v43 = vlaneseq }
  0x28   : > { %1152 = vmatprep.subr.bf16.mxu1 %v3417_v18  ;;  %v3508_v18 = vld [vmem:[%s4711_s13 + $0x64] ss:$8 sps:$4 sm:$0xff]   ;;  %v3523_v28 = vld [vmem:[%s4711_s13 + $0x94] ss:$8 sps:$4 sm:$0xff]   ;;  %v3527_v33 = vld [vmem:[%s4711_s13 + $0xb0] ss:$8 sps:$4 sm:$0xff]  }
  0x29   : > { %v3533_v37 = vld [vmem:[%s4711_s13 + $0xd0] ss:$8 sps:$4 sm:$0xff]  }
  0x2a   : > { %916 = vmatmul.mubr.bf16.vlgmr.msra.gmra.mrb[0].mxu1 %v3414_v17  ;;  %1687 = vmatpush1.bf16.msra.mxu0 %v3466_v48  ;;  %v3505_v17 = vld [vmem:[%s4710_s12 + $0xd0] ss:$8 sps:$4 sm:$0xff]  }
  0x2b   : > { %1153 = vmatpush1.bf16.msra.mxu1 %v3415_v19  ;;  %925 = vmatprep.mubr.bf16.mxu1 %v3718_v2  ;;  %v3509_v19 = vld [vmem:[%s4710_s12 + $0xe4] ss:$8 sps:$4 sm:$0xff]  }
  0x2c   : > { %1154 = vmatprep.subr.bf16.mxu1 %v3420_v23  ;;  %1688 = vmatprep.subr.bf16.mxu0 %v3467_v50  ;;  %v3515_v23 = vld [vmem:[%s4710_s12 + $0xf4] ss:$8 sps:$4 sm:$0xff]  }
  0x2e   : > { %1689 = vmatpush1.bf16.msra.mxu0 %v3469_v51 }
  0x2f   : > { %1155 = vmatpush1.bf16.msra.mxu1 %v3418_v26  ;;  %1690 = vmatprep.subr.bf16.mxu0 %v3473_v52  ;;  %v3520_v26 = vld [vmem:[%s4711_s13 + $0x84] ss:$8 sps:$4 sm:$0xff]  }
  0x30   : > { %1156 = vmatprep.subr.bf16.mxu1 %v3424_v27  ;;  %v3518_v27 = vld [vmem:[%s4711_s13 + $0x80] ss:$8 sps:$4 sm:$0xff]  }
  0x32   : > { %926 = vmatmul.mubr.bf16.gmra.mrb[4].mxu1 %v3421_v29  ;;  %1691 = vmatpush1.bf16.msra.mxu0 %v3475_v55  ;;  %v3521_v29 = vld [vmem:[%s4711_s13 + $0x90] ss:$8 sps:$4 sm:$0xff]  }
  0x33   : > { %1157 = vmatpush1.bf16.msra.mxu1 %v3422_v31  ;;  %935 = vmatprep.mubr.bf16.mxu1 %v3718_v2  ;;  %v3524_v31 = vld [vmem:[%s4711_s13 + $0xa0] ss:$8 sps:$4 sm:$0xff]  }
  0x34   : > { %1158 = vmatprep.subr.bf16.mxu1 %v3427_v32  ;;  %1692 = vmatprep.subr.bf16.mxu0 %v3479_v57  ;;  %v3529_v32 = vld [vmem:[%s4711_s13 + $0xb4] ss:$8 sps:$4 sm:$0xff]   ;;  %v3600_v57 = vld [vmem:[%s4712_s14 + $0x4] ss:$8 sps:$4 sm:$0xff]  }
  0x36   : > { %1693 = vmatpush1.bf16.msra.mxu0 %v3481_v60 }
  0x37   : > { %1159 = vmatpush1.bf16.msra.mxu1 %v3425_v35  ;;  %1694 = vmatprep.subr.bf16.mxu0 %v3485_v61  ;;  %v3530_v35 = vld [vmem:[%s4711_s13 + $0xc0] ss:$8 sps:$4 sm:$0xff]  }
  0x38   : > { %1160 = vmatprep.subr.bf16.mxu1 %v3431_v36  ;;  %v3535_v36 = vld [vmem:[%s4711_s13 + $0xd4] ss:$8 sps:$4 sm:$0xff]  }
  0x3a   : > { %936 = vmatmul.mubr.bf16.gmra.mrb[8].mxu1 %v3428_v38  ;;  %1695 = vmatpush1.bf16.msra.mxu0 %v3487_v0  ;;  %v3538_v38 = vld [vmem:[%s4711_s13 + $0xe4] ss:$8 sps:$4 sm:$0xff]  }
  0x3b   : > { %1161 = vmatpush1.bf16.msra.mxu1 %v3429_v40  ;;  %945 = vmatprep.mubr.bf16.mxu1 %v3718_v2  ;;  %v3541_v40 = vld [vmem:[%s4711_s13 + $0xf4] ss:$8 sps:$4 sm:$0xff]  }
  0x3c   : > { %1162 = vmatprep.subr.bf16.mxu1 %v3434_v41  ;;  %1696 = vmatprep.subr.bf16.mxu0 %v3491_v3  ;;  %v3539_v41 = vld [vmem:[%s4711_s13 + $0xf0] ss:$8 sps:$4 sm:$0xff]   ;;  %v3598_v3 = vld [vmem:[%s4712_s14] ss:$8 sps:$4 sm:$0xff]  }
  0x3e   : > { %1697 = vmatpush1.bf16.msra.mxu0 %v3493_v6  ;;  %v3603_v6 = vld [vmem:[%s4712_s14 + $0x14] ss:$8 sps:$4 sm:$0xff]  }
  0x3f   : > { %1163 = vmatpush1.bf16.msra.mxu1 %v3432_v44  ;;  %1698 = vmatprep.subr.bf16.mxu0 %v3497_v7  ;;  %v770_v44 = vshrl.u32 %v769_v43, 7 }
  0x40   : > { %1164 = vmatprep.subr.bf16.mxu1 %v3438_v46 }
  0x41   : > { %v4170_v46 = vsub.s32 1, %v770_v44 }
  0x42   : > { %946 = vmatmul.mubr.bf16.gmra.mrb[12].mxu1 %v3435_v45  ;;  %1699 = vmatpush1.bf16.msra.mxu0 %v3499_v10  ;;  %v4168_v45 = vsub.s32 0, %v770_v44 }
  0x43   : > { %1165 = vmatpush1.bf16.msra.mxu1 %v3436_v47  ;;  %1184 = vmatprep.mubr.bf16.mxu1 %v3718_v2  ;;  %v767_v47 = vld [vmem:[%s4706_s8] sm:$0x3] }
  0x44   : > { %1166 = vmatprep.subr.bf16.mxu1 %v3441_v49  ;;  %1700 = vmatprep.subr.bf16.mxu0 %v3503_v12  ;;  %v4176_v48 = vrot.slane %v767_v47, %v4168_v45  ;;  %v4179_v49 = vrot.slane %v767_v47, %v4170_v46  ;;  %v3601_v12 = vld [vmem:[%s4712_s14 + $0x10] ss:$8 sps:$4 sm:$0xff]   ;;  %v1036_v47 = vld [vmem:[%s4707_s9] sm:$0x3] }
  0x46   : > { %1701 = vmatpush1.bf16.msra.mxu0 %v3505_v17 }
  0x47   : > { %1167 = vmatpush1.bf16.msra.mxu1 %v3439_v53  ;;  %1702 = vmatprep.subr.bf16.mxu0 %v3509_v19 }
  0x48   : > { %1441 = vmatprep.subr.bf16.mxu1 %v3472_v54 }
  0x4a   : > { %1185 = vmatmul.mubr.bf16.vlgmr.msra.gmra.mrb[16].mxu1 %v3442_v56  ;;  %1703 = vmatpush1.bf16.msra.mxu0 %v3511_v21  ;;  %v3604_v21 = vld [vmem:[%s4712_s14 + $0x20] ss:$8 sps:$4 sm:$0xff]  }
  0x4b   : > { %1194 = vmatprep.mubr.bf16.mxu1 %v3718_v2  ;;  %1442 = vmatpush1.bf16.msra.mxu1 %v3470_v58 }
  0x4c   : > { %1443 = vmatprep.subr.bf16.mxu1 %v3478_v59  ;;  %1704 = vmatprep.subr.bf16.mxu0 %v3515_v23 }
  0x4e   : > { %1705 = vmatpush1.bf16.msra.mxu0 %v3517_v25 }
  0x4f   : > { %1444 = vmatpush1.bf16.msra.mxu1 %v3476_v62  ;;  %2176 = vmatprep.subr.bf16.mxu0 %v3600_v57 }
  0x50   : > { %1445 = vmatprep.subr.bf16.mxu1 %v3484_v63 }
  0x52   : > { %1195 = vmatmul.mubr.bf16.gmra.mrb[20].mxu1 %v3443_v1 }
  0x53   : > { %1204 = vmatprep.mubr.bf16.mxu1 %v3718_v2  ;;  %1446 = vmatpush1.bf16.msra.mxu1 %v3482_v4 }
  0x54   : > { %1447 = vmatprep.subr.bf16.mxu1 %v3490_v5 }
  0x57   : > { %1448 = vmatpush1.bf16.msra.mxu1 %v3488_v8 }
  0x58   : > { %1449 = vmatprep.subr.bf16.mxu1 %v3496_v9 }
  0x5a   : > { %1205 = vmatmul.mubr.bf16.gmra.mrb[24].mxu1 %v3444_v11 }
  0x5b   : > { %1214 = vmatprep.mubr.bf16.mxu1 %v3718_v2  ;;  %1450 = vmatpush1.bf16.msra.mxu1 %v3494_v13 }
  0x5c   : > { %1451 = vmatprep.subr.bf16.mxu1 %v3502_v14 }
  0x5f   : > { %1452 = vmatpush1.bf16.msra.mxu1 %v3500_v15  ;;  %v3606_v15 = vld [vmem:[%s4712_s14 + $0x24] ss:$8 sps:$4 sm:$0xff]  }
  0x60   : > { %1453 = vmatprep.subr.bf16.mxu1 %v3508_v18 }
  0x62   : > { %1215 = vmatmul.mubr.bf16.gmra.mrb[28].mxu1 %v3445_v16 }
  0x63   : > { %1454 = vmatpush1.bf16.msra.mxu1 %v3506_v20 }
  0x64   : > { %1455 = vmatprep.subr.bf16.mxu1 %v3514_v22 }
  0x67   : > { %1456 = vmatpush1.bf16.msra.mxu1 %v3512_v24  ;;  %v3609_v24 = vld [vmem:[%s4712_s14 + $0x34] ss:$8 sps:$4 sm:$0xff]  }
  0x68   : > { %1457 = vmatprep.subr.bf16.mxu1 %v3520_v26 }
  0x6b   : > { %1458 = vmatpush1.bf16.msra.mxu1 %v3518_v27 }
  0x6c   : > { %1459 = vmatprep.subr.bf16.mxu1 %v3523_v28 }
  0x6f   : > { %1460 = vmatpush1.bf16.msra.mxu1 %v3521_v29 }
  0x70   : > { %1461 = vmatprep.subr.bf16.mxu1 %v3526_v30  ;;  %v3607_v30 = vld [vmem:[%s4712_s14 + $0x30] ss:$8 sps:$4 sm:$0xff]  }
  0x73   : > { %1462 = vmatpush1.bf16.msra.mxu1 %v3524_v31 }
  0x74   : > { %1463 = vmatprep.subr.bf16.mxu1 %v3529_v32 }
  0x77   : > { %1464 = vmatpush1.bf16.msra.mxu1 %v3527_v33  ;;  %v3612_v33 = vld [vmem:[%s4712_s14 + $0x44] ss:$8 sps:$4 sm:$0xff]  }
  0x78   : > { %1465 = vmatprep.subr.bf16.mxu1 %v3532_v34 }
  0x7b   : > { %1466 = vmatpush1.bf16.msra.mxu1 %v3530_v35 }
  0x7c   : > { %1467 = vmatprep.subr.bf16.mxu1 %v3535_v36 }
  0x7f   : > { %1468 = vmatpush1.bf16.msra.mxu1 %v3533_v37 }
  0x80   : > { %1469 = vmatprep.subr.bf16.mxu1 %v3538_v38 }
  0x83   : > { %1470 = vmatpush1.bf16.msra.mxu1 %v3536_v39  ;;  %v3610_v39 = vld [vmem:[%s4712_s14 + $0x40] ss:$8 sps:$4 sm:$0xff]  }
  0x84   : > { %1471 = vmatprep.subr.bf16.mxu1 %v3541_v40 }
  0x87   : > { %1472 = vmatpush1.bf16.msra.mxu1 %v3539_v41 }
  0x88   : > { %1887 = vmatprep.subr.bf16.mxu1 %v3544_v42  ;;  %v3615_v42 = vld [vmem:[%s4712_s14 + $0x54] ss:$8 sps:$4 sm:$0xff]  }
  0xfd   : > { %v917_v50 = vpop.f32.mrb[0].mxu1 }
  0xfe   : > { %v918_v51 = vadd.f32 %v917_v50, %v4176_v48  ;;  %v919_v52 = vpop.f32.mrb[1].mxu1 }
  0xff   : > { %v920_v53 = vadd.f32 %v919_v52, %v4179_v49  ;;  %v921_v54 = vpop.f32.mrb[2].mxu1 }
 0x100   : > { %v922_v55 = vadd.f32 %v921_v54, %v4176_v48  ;;  %v923_v56 = vpop.f32.mrb[3].mxu1  ;;  %v956_v59 = vmax.f32 %v918_v51, 0.0 }
 0x101   : > { %v924_v58 = vadd.f32 %v923_v56, %v4179_v49  ;;  %v957_v61 = vmax.f32 %v920_v53, 0.0  ;;  %v3613_v53 = vld [vmem:[%s4712_s14 + $0x50] ss:$8 sps:$4 sm:$0xff]   ;;  %v4237_v56 = vrot.slane %v1036_v47, %v4168_v45 }
 0x102   : > { %v958_v60 = vmax.f32 %v922_v55, 0.0 }
 0x103   : > { %v959_v62 = vmax.f32 %v924_v58, 0.0 }
 0x104   : > { %v972_v63 = vpack.c.bf16 %v958_v60, %v956_v59  ;;  %v4240_v59 = vrot.slane %v1036_v47, %v4170_v46 }
 0x105   : > { %v927_v0 = vpop.f32.mrb[4].mxu1  ;;  %v973_v1 = vpack.c.bf16 %v959_v62, %v957_v61 }
 0x106   : > { %v928_v4 = vadd.f32 %v927_v0, %v4176_v48  ;;  %v929_v5 = vpop.f32.mrb[5].mxu1 }
 0x107   : > { %v930_v7 = vadd.f32 %v929_v5, %v4179_v49  ;;  %v931_v8 = vpop.f32.mrb[6].mxu1  ;;  %1706 = vmatprep.mubr.bf16.mxu0 %v973_v1 }
 0x108   : > { %v932_v9 = vadd.f32 %v931_v8, %v4176_v48  ;;  %v933_v10 = vpop.f32.mrb[7].mxu1  ;;  %1707 = vmatmul.mubr.bf16.vlgmr.msra.gmra.mrb[0].mxu0 %v972_v63  ;;  %v960_v13 = vmax.f32 %v928_v4, 0.0 }
 0x109   : > { %v934_v11 = vadd.f32 %v933_v10, %v4179_v49  ;;  %2177 = vmatpush1.bf16.msra.mxu0 %v3598_v3  ;;  %v961_v16 = vmax.f32 %v930_v7, 0.0 }
 0x10a   : > { %v962_v14 = vmax.f32 %v932_v9, 0.0  ;;  %2178 = vmatprep.subr.bf16.mxu0 %v3603_v6 }
 0x10b   : > { %v963_v17 = vmax.f32 %v934_v11, 0.0 }
 0x10c   : > { %v974_v18 = vpack.c.bf16 %v962_v14, %v960_v13 }
 0x10d   : > { %v975_v19 = vpack.c.bf16 %v963_v17, %v961_v16  ;;  %v937_v20 = vpop.f32.mrb[8].mxu1  ;;  %2179 = vmatpush1.bf16.msra.mxu0 %v3601_v12  ;;  %v3542_v12 = vld [vmem:[%s4704_s6] ss:$8 sps:$4 sm:$0xff]  }
 0x10e   : > { %v938_v22 = vadd.f32 %v937_v20, %v4176_v48  ;;  %v939_v23 = vpop.f32.mrb[9].mxu1  ;;  %2180 = vmatprep.subr.bf16.mxu0 %v3606_v15  ;;  %v3547_v15 = vld [vmem:[%s4704_s6 + $0x14] ss:$8 sps:$4 sm:$0xff]  }
 0x10f   : > { %v940_v25 = vadd.f32 %v939_v23, %v4179_v49  ;;  %v941_v26 = vpop.f32.mrb[10].mxu1  ;;  %1716 = vmatprep.mubr.bf16.mxu0 %v975_v19 }
 0x110   : > { %v942_v27 = vadd.f32 %v941_v26, %v4176_v48  ;;  %v943_v28 = vpop.f32.mrb[11].mxu1  ;;  %1717 = vmatmul.mubr.bf16.gmra.mrb[4].mxu0 %v974_v18  ;;  %v964_v31 = vmax.f32 %v938_v22, 0.0 }
 0x111   : > { %v944_v29 = vadd.f32 %v943_v28, %v4179_v49  ;;  %2181 = vmatpush1.bf16.msra.mxu0 %v3604_v21  ;;  %v965_v34 = vmax.f32 %v940_v25, 0.0  ;;  %v3545_v21 = vld [vmem:[%s4704_s6 + $0x10] ss:$8 sps:$4 sm:$0xff]  }
 0x112   : > { %v966_v32 = vmax.f32 %v942_v27, 0.0  ;;  %2182 = vmatprep.subr.bf16.mxu0 %v3609_v24  ;;  %v3550_v24 = vld [vmem:[%s4704_s6 + $0x24] ss:$8 sps:$4 sm:$0xff]  }
 0x113   : > { %v967_v35 = vmax.f32 %v944_v29, 0.0 }
 0x114   : > { %v976_v36 = vpack.c.bf16 %v966_v32, %v964_v31 }
 0x115   : > { %v977_v37 = vpack.c.bf16 %v967_v35, %v965_v34  ;;  %v947_v38 = vpop.f32.mrb[12].mxu1  ;;  %2183 = vmatpush1.bf16.msra.mxu0 %v3607_v30  ;;  %v3548_v30 = vld [vmem:[%s4704_s6 + $0x20] ss:$8 sps:$4 sm:$0xff]  }
 0x116   : > { %v948_v40 = vadd.f32 %v947_v38, %v4176_v48  ;;  %v949_v41 = vpop.f32.mrb[13].mxu1  ;;  %2184 = vmatprep.subr.bf16.mxu0 %v3612_v33  ;;  %v3553_v33 = vld [vmem:[%s4704_s6 + $0x34] ss:$8 sps:$4 sm:$0xff]  }
 0x117   : > { %v950_v43 = vadd.f32 %v949_v41, %v4179_v49  ;;  %v951_v44 = vpop.f32.mrb[14].mxu1  ;;  %1726 = vmatprep.mubr.bf16.mxu0 %v977_v37 }
 0x118   : > { %v952_v50 = vadd.f32 %v951_v44, %v4176_v48  ;;  %v953_v51 = vpop.f32.mrb[15].mxu1  ;;  %1727 = vmatmul.mubr.bf16.gmra.mrb[8].mxu0 %v976_v36  ;;  %v968_v54 = vmax.f32 %v948_v40, 0.0 }
 0x119   : > { %v954_v52 = vadd.f32 %v953_v51, %v4179_v49  ;;  %2185 = vmatpush1.bf16.msra.mxu0 %v3610_v39  ;;  %v969_v57 = vmax.f32 %v950_v43, 0.0  ;;  %v3551_v39 = vld [vmem:[%s4704_s6 + $0x30] ss:$8 sps:$4 sm:$0xff]  }
 0x11a   : > { %v970_v55 = vmax.f32 %v952_v50, 0.0  ;;  %2186 = vmatprep.subr.bf16.mxu0 %v3615_v42  ;;  %v3556_v42 = vld [vmem:[%s4704_s6 + $0x44] ss:$8 sps:$4 sm:$0xff]  }
 0x11b   : > { %v971_v58 = vmax.f32 %v954_v52, 0.0  ;;  %v3554_v52 = vld [vmem:[%s4704_s6 + $0x40] ss:$8 sps:$4 sm:$0xff]  }
 0x11c   : > { %v978_v48 = vpack.c.bf16 %v970_v55, %v968_v54  ;;  %v3559_v55 = vld [vmem:[%s4704_s6 + $0x54] ss:$8 sps:$4 sm:$0xff]  }
 0x11d   : > { %v979_v60 = vpack.c.bf16 %v971_v58, %v969_v57  ;;  %v1186_v61 = vpop.f32.mrb[16].mxu1  ;;  %2187 = vmatpush1.bf16.msra.mxu0 %v3613_v53 }
 0x11e   : > { %v1187_v49 = vadd.f32 %v1186_v61, %v4237_v56  ;;  %v1188_v62 = vpop.f32.mrb[17].mxu1 }
 0x11f   : > { %v1189_v63 = vadd.f32 %v1188_v62, %v4240_v59  ;;  %v1190_v0 = vpop.f32.mrb[18].mxu1  ;;  %1736 = vmatprep.mubr.bf16.mxu0 %v979_v60 }
 0x120   : > { %v1191_v1 = vadd.f32 %v1190_v0, %v4237_v56  ;;  %v1192_v3 = vpop.f32.mrb[19].mxu1  ;;  %1737 = vmatmul.mubr.bf16.gmra.mrb[12].mxu0 %v978_v48  ;;  %v1225_v5 = vmax.f32 %v1187_v49, 0.0  ;;  %v3557_v49 = vld [vmem:[%s4704_s6 + $0x50] ss:$8 sps:$4 sm:$0xff]   ;;  %v3562_v0 = vld [vmem:[%s4704_s6 + $0x64] ss:$8 sps:$4 sm:$0xff]  }
 0x121   : > { %v1193_v4 = vadd.f32 %v1192_v3, %v4240_v59  ;;  %v1226_v7 = vmax.f32 %v1189_v63, 0.0 }
 0x122   : > { %v1227_v6 = vmax.f32 %v1191_v1, 0.0 }
 0x123   : > { %v1228_v8 = vmax.f32 %v1193_v4, 0.0 }
 0x124   : > { %v1241_v9 = vpack.c.bf16 %v1227_v6, %v1225_v5  ;;  %v3565_v5 = vld [vmem:[%s4704_s6 + $0x74] ss:$8 sps:$4 sm:$0xff]   ;;  %v3563_v6 = vld [vmem:[%s4704_s6 + $0x70] ss:$8 sps:$4 sm:$0xff]  }
 0x125   : > { %v1242_v10 = vpack.c.bf16 %v1228_v8, %v1226_v7  ;;  %v1196_v11 = vpop.f32.mrb[20].mxu1  ;;  %v3569_v7 = vld [vmem:[%s4705_s7 + $0x4] ss:$8 sps:$4 sm:$0xff]  }
 0x126   : > { %v1197_v13 = vadd.f32 %v1196_v11, %v4237_v56  ;;  %v1198_v14 = vpop.f32.mrb[21].mxu1  ;;  %v3566_v8 = vld [vmem:[%s4160_s21] sm:$0xff]   ;;  %v3570_v11 = vld [vmem:[%s4705_s7 + $0x10] ss:$8 sps:$4 sm:$0xff]  }
 0x127   : > { %v1199_v16 = vadd.f32 %v1198_v14, %v4240_v59  ;;  %v1200_v17 = vpop.f32.mrb[22].mxu1  ;;  %1473 = vmatprep.mubr.bf16.mxu1 %v1242_v10  ;;  %v3572_v10 = vld [vmem:[%s4705_s7 + $0x14] ss:$8 sps:$4 sm:$0xff]   ;;  %v3574_v14 = vld [vmem:[%s4705_s7 + $0x20] ss:$8 sps:$4 sm:$0xff]  }
 0x128   : > { %v1201_v18 = vadd.f32 %v1200_v17, %v4237_v56  ;;  %v1202_v19 = vpop.f32.mrb[23].mxu1  ;;  %1474 = vmatmul.mubr.bf16.vlgmr.msra.gmra.mrb[32].mxu1 %v1241_v9  ;;  %v1229_v22 = vmax.f32 %v1197_v13, 0.0  ;;  %v3567_v9 = vld [vmem:[%s4705_s7] ss:$8 sps:$4 sm:$0xff]   ;;  %v3583_v17 = vld [vmem:[%s4705_s7 + $0x44] ss:$8 sps:$4 sm:$0xff]  }
 0x129   : > { %v1203_v20 = vadd.f32 %v1202_v19, %v4240_v59  ;;  %1888 = vmatpush1.bf16.msra.mxu1 %v3542_v12  ;;  %v1230_v25 = vmax.f32 %v1199_v16, 0.0  ;;  %v3576_v12 = vld [vmem:[%s4705_s7 + $0x24] ss:$8 sps:$4 sm:$0xff]   ;;  %v3577_v16 = vld [vmem:[%s4705_s7 + $0x30] ss:$8 sps:$4 sm:$0xff]  }
 0x12a   : > { %v1231_v23 = vmax.f32 %v1201_v18, 0.0  ;;  %1889 = vmatprep.subr.bf16.mxu1 %v3547_v15  ;;  %v3573_v13 = vld [vmem:[%s4160_s21 + $0x8] sm:$0xff]   ;;  %v3579_v15 = vld [vmem:[%s4705_s7 + $0x34] ss:$8 sps:$4 sm:$0xff]  }
 0x12b   : > { %v1232_v26 = vmax.f32 %v1203_v20, 0.0  ;;  %v3580_v18 = vld [vmem:[%s4160_s21 + $0x10] sm:$0xff]   ;;  %v3581_v19 = vld [vmem:[%s4705_s7 + $0x40] ss:$8 sps:$4 sm:$0xff]  }
 0x12c   : > { %v1243_v27 = vpack.c.bf16 %v1231_v23, %v1229_v22  ;;  %v3586_v20 = vld [vmem:[%s4705_s7 + $0x54] ss:$8 sps:$4 sm:$0xff]   ;;  %v3590_v22 = vld [vmem:[%s4705_s7 + $0x64] ss:$8 sps:$4 sm:$0xff]  }
 0x12d   : > { %v1244_v28 = vpack.c.bf16 %v1232_v26, %v1230_v25  ;;  %v1206_v29 = vpop.f32.mrb[24].mxu1  ;;  %1890 = vmatpush1.bf16.msra.mxu1 %v3545_v21  ;;  %v3584_v21 = vld [vmem:[%s4705_s7 + $0x50] ss:$8 sps:$4 sm:$0xff]   ;;  %v3593_v25 = vld [vmem:[%s4705_s7 + $0x74] ss:$8 sps:$4 sm:$0xff]  }
 0x12e   : > { %v1207_v31 = vadd.f32 %v1206_v29, %v4237_v56  ;;  %v1208_v32 = vpop.f32.mrb[25].mxu1  ;;  %1891 = vmatprep.subr.bf16.mxu1 %v3550_v24  ;;  %v3587_v23 = vld [vmem:[%s4160_s21 + $0x18] sm:$0xff]   ;;  %v3588_v24 = vld [vmem:[%s4705_s7 + $0x60] ss:$8 sps:$4 sm:$0xff]   ;;  %v3596_v29 = vld [vmem:[%s4166_s30 + $0x10] sm:$0xff]  }
 0x12f   : > { %v1209_v34 = vadd.f32 %v1208_v32, %v4240_v59  ;;  %v1210_v35 = vpop.f32.mrb[26].mxu1  ;;  %1483 = vmatprep.mubr.bf16.mxu1 %v1244_v28  ;;  %v3591_v26 = vld [vmem:[%s4705_s7 + $0x70] ss:$8 sps:$4 sm:$0xff]   ;;  %v3595_v28 = vld [vmem:[%s4166_s30 + $0x8] sm:$0xff]  }
 0x130   : > { %v1211_v36 = vadd.f32 %v1210_v35, %v4237_v56  ;;  %v1212_v37 = vpop.f32.mrb[27].mxu1  ;;  %1484 = vmatmul.mubr.bf16.gmra.mrb[36].mxu1 %v1243_v27  ;;  %v1233_v40 = vmax.f32 %v1207_v31, 0.0  ;;  %v3594_v27 = vld [vmem:[%s4166_s30] sm:$0xff]   ;;  %v3597_v31 = vld [vmem:[%s4166_s30 + $0x18] sm:$0xff]   ;;  %s3083_s30 = sshll.u32 %s4734_s27, 1 }
 0x131   : > { %v1213_v38 = vadd.f32 %v1212_v37, %v4240_v59  ;;  %1892 = vmatpush1.bf16.msra.mxu1 %v3548_v30  ;;  %v1234_v43 = vmax.f32 %v1209_v34, 0.0  ;;  %v3618_v30 = vld [vmem:[%s4712_s14 + $0x64] ss:$8 sps:$4 sm:$0xff]   ;;  %v3616_v32 = vld [vmem:[%s4712_s14 + $0x60] ss:$8 sps:$4 sm:$0xff]   ;;  %s730_s19 = scalar_lea.vmem %s4715_s17, %s3083_s30 }
 0x132   : > { %v1235_v41 = vmax.f32 %v1211_v36, 0.0  ;;  %1893 = vmatprep.subr.bf16.mxu1 %v3553_v33  ;;  %2188 = vmatprep.subr.bf16.mxu0 %v3618_v30  ;;  %v3619_v33 = vld [vmem:[%s4712_s14 + $0x70] ss:$8 sps:$4 sm:$0xff]   ;;  %v3621_v34 = vld [vmem:[%s4712_s14 + $0x74] ss:$8 sps:$4 sm:$0xff]  }
 0x133   : > { %v1236_v44 = vmax.f32 %v1213_v38, 0.0  ;;  %2189 = vmatpush1.bf16.msra.mxu0 %v3616_v32  ;;  %v3622_v35 = vld [vmem:[%s4712_s14 + $0x80] ss:$8 sps:$4 sm:$0xff]   ;;  %v3625_v36 = vld [vmem:[%s4712_s14 + $0x90] ss:$8 sps:$4 sm:$0xff]  }
 0x134   : > { %v1245_v47 = vpack.c.bf16 %v1235_v41, %v1233_v40  ;;  %2190 = vmatprep.subr.bf16.mxu0 %v3621_v34  ;;  %v3627_v37 = vld [vmem:[%s4712_s14 + $0x94] ss:$8 sps:$4 sm:$0xff]   ;;  %v3630_v38 = vld [vmem:[%s4712_s14 + $0xa4] ss:$8 sps:$4 sm:$0xff]   ;;  %v3631_v40 = vld [vmem:[%s4712_s14 + $0xb0] ss:$8 sps:$4 sm:$0xff]  }
 0x135   : > { %v1246_v50 = vpack.c.bf16 %v1236_v44, %v1234_v43  ;;  %v1216_v51 = vpop.f32.mrb[28].mxu1  ;;  %1894 = vmatpush1.bf16.msra.mxu1 %v3551_v39  ;;  %v3628_v39 = vld [vmem:[%s4712_s14 + $0xa0] ss:$8 sps:$4 sm:$0xff]   ;;  %v3633_v41 = vld [vmem:[%s4712_s14 + $0xb4] ss:$8 sps:$4 sm:$0xff]  }
 0x136   : > { %v1217_v53 = vadd.f32 %v1216_v51, %v4237_v56  ;;  %v1218_v54 = vpop.f32.mrb[29].mxu1  ;;  %1895 = vmatprep.subr.bf16.mxu1 %v3556_v42  ;;  %v3636_v42 = vld [vmem:[%s4712_s14 + $0xc4] ss:$8 sps:$4 sm:$0xff]   ;;  %v3634_v43 = vld [vmem:[%s4712_s14 + $0xc0] ss:$8 sps:$4 sm:$0xff]  }
 0x137   : > { %v1219_v57 = vadd.f32 %v1218_v54, %v4240_v59  ;;  %v1220_v58 = vpop.f32.mrb[30].mxu1  ;;  %1493 = vmatprep.mubr.bf16.mxu1 %v1246_v50  ;;  %2191 = vmatpush1.bf16.msra.mxu0 %v3619_v33  ;;  %v3637_v44 = vld [vmem:[%s4712_s14 + $0xd0] ss:$8 sps:$4 sm:$0xff]   ;;  %v3642_v50 = vld [vmem:[%s4712_s14 + $0xe4] ss:$8 sps:$4 sm:$0xff]  }
 0x138   : > { %v1221_v48 = vadd.f32 %v1220_v58, %v4237_v56  ;;  %v1222_v60 = vpop.f32.mrb[31].mxu1  ;;  %1494 = vmatmul.mubr.bf16.gmra.mrb[40].mxu1 %v1245_v47  ;;  %v1237_v62 = vmax.f32 %v1217_v53, 0.0  ;;  %v3639_v47 = vld [vmem:[%s4712_s14 + $0xd4] ss:$8 sps:$4 sm:$0xff]   ;;  %v3640_v51 = vld [vmem:[%s4712_s14 + $0xe0] ss:$8 sps:$4 sm:$0xff]  }
 0x139   : > { %v1223_v61 = vadd.f32 %v1222_v60, %v4240_v59  ;;  %1896 = vmatpush1.bf16.msra.mxu1 %v3554_v52  ;;  %v1238_v1 = vmax.f32 %v1219_v57, 0.0  ;;  %v3560_v59 = vld [vmem:[%s4704_s6 + $0x60] ss:$8 sps:$4 sm:$0xff]   ;;  %v3645_v52 = vld [vmem:[%s4712_s14 + $0xf4] ss:$8 sps:$4 sm:$0xff]  }
 0x13a   : > { %v1239_v63 = vmax.f32 %v1221_v48, 0.0  ;;  %1897 = vmatprep.subr.bf16.mxu1 %v3559_v55  ;;  %v3643_v53 = vld [vmem:[%s4712_s14 + $0xf0] ss:$8 sps:$4 sm:$0xff]   ;;  %v3648_v54 = vld [vmem:[%s4713_s15 + $0x4] ss:$8 sps:$4 sm:$0xff]  }
 0x13b   : > { %v1240_v3 = vmax.f32 %v1223_v61, 0.0  ;;  %v3649_v33 = vld [vmem:[%s4713_s15 + $0x10] ss:$8 sps:$4 sm:$0xff]  }
 0x13c   : > { %v1247_v56 = vpack.c.bf16 %v1239_v63, %v1237_v62 }
 0x13d   : > { %v1248_v4 = vpack.c.bf16 %v1240_v3, %v1238_v1  ;;  %1898 = vmatpush1.bf16.msra.mxu1 %v3557_v49 }
 0x13e   : > { %1899 = vmatprep.subr.bf16.mxu1 %v3562_v0 }
 0x13f   : > { %1503 = vmatprep.mubr.bf16.mxu1 %v1248_v4 }
 0x140   : > { %1504 = vmatmul.mubr.bf16.gmra.mrb[44].mxu1 %v1247_v56 }
 0x141   : > { %1900 = vmatpush1.bf16.msra.mxu1 %v3560_v59  ;;  %1919 = vmatprep.mubr.bf16.mxu1 %v3718_v2 }
 0x142   : > { %1901 = vmatprep.subr.bf16.mxu1 %v3565_v5  ;;  %v1771_v5 = vld [vmem:[%s4708_s10] sm:$0x3] }
 0x145   : > { %1902 = vmatpush1.bf16.msra.mxu1 %v3563_v6 }
 0x146   : > { %2405 = vmatprep.subr.bf16.mxu1 %v3569_v7  ;;  %v4466_v7 = vrot.slane %v1771_v5, %v4168_v45 }
 0x148   : > { %1920 = vmatmul.mubr.bf16.vlgmr.msra.gmra.mrb[48].mxu1 %v3566_v8  ;;  %v4469_v8 = vrot.slane %v1771_v5, %v4170_v46 }
 0x149   : > { %2406 = vmatpush1.bf16.msra.mxu1 %v3567_v9  ;;  %1929 = vmatprep.mubr.bf16.mxu1 %v3718_v2 }
 0x14a   : > { %2407 = vmatprep.subr.bf16.mxu1 %v3572_v10 }
 0x14d   : > { %2408 = vmatpush1.bf16.msra.mxu1 %v3570_v11 }
 0x14e   : > { %2409 = vmatprep.subr.bf16.mxu1 %v3576_v12 }
 0x150   : > { %1930 = vmatmul.mubr.bf16.gmra.mrb[52].mxu1 %v3573_v13 }
 0x151   : > { %2410 = vmatpush1.bf16.msra.mxu1 %v3574_v14  ;;  %1939 = vmatprep.mubr.bf16.mxu1 %v3718_v2 }
 0x152   : > { %2411 = vmatprep.subr.bf16.mxu1 %v3579_v15 }
 0x155   : > { %2412 = vmatpush1.bf16.msra.mxu1 %v3577_v16 }
 0x156   : > { %2413 = vmatprep.subr.bf16.mxu1 %v3583_v17 }
 0x158   : > { %1940 = vmatmul.mubr.bf16.gmra.mrb[56].mxu1 %v3580_v18 }
 0x159   : > { %2414 = vmatpush1.bf16.msra.mxu1 %v3581_v19  ;;  %1949 = vmatprep.mubr.bf16.mxu1 %v3718_v2 }
 0x15a   : > { %2415 = vmatprep.subr.bf16.mxu1 %v3586_v20 }
 0x15d   : > { %2416 = vmatpush1.bf16.msra.mxu1 %v3584_v21 }
 0x15e   : > { %2417 = vmatprep.subr.bf16.mxu1 %v3590_v22 }
 0x160   : > { %1950 = vmatmul.mubr.bf16.gmra.mrb[60].mxu1 %v3587_v23  ;;  %v3646_v23 = vld [vmem:[%s4713_s15] ss:$8 sps:$4 sm:$0xff]  }
 0x161   : > { %2418 = vmatpush1.bf16.msra.mxu1 %v3588_v24  ;;  %2437 = vmatprep.mubr.bf16.mxu1 %v3718_v2 }
 0x162   : > { %2419 = vmatprep.subr.bf16.mxu1 %v3593_v25  ;;  %v3651_v25 = vld [vmem:[%s4713_s15 + $0x14] ss:$8 sps:$4 sm:$0xff]  }
 0x165   : > { %2420 = vmatpush1.bf16.msra.mxu1 %v3591_v26 }
 0x168   : > { %2438 = vmatmul.mubr.bf16.vlgmr.msra.gmra.mrb[64].mxu1 %v3594_v27 }
 0x169   : > { %2447 = vmatprep.mubr.bf16.mxu1 %v3718_v2 }
 0x170   : > { %2448 = vmatmul.mubr.bf16.gmra.mrb[68].mxu1 %v3595_v28 }
 0x171   : > { %2457 = vmatprep.mubr.bf16.mxu1 %v3718_v2 }
 0x178   : > { %2458 = vmatmul.mubr.bf16.gmra.mrb[72].mxu1 %v3596_v29 }
 0x179   : > { %2467 = vmatprep.mubr.bf16.mxu1 %v3718_v2  ;;  %v3624_v2 = vld [vmem:[%s4712_s14 + $0x84] ss:$8 sps:$4 sm:$0xff]  }
 0x17a   : > { %2192 = vmatprep.subr.bf16.mxu0 %v3624_v2 }
 0x17b   : > { %2193 = vmatpush1.bf16.msra.mxu0 %v3622_v35  ;;  %v3654_v35 = vld [vmem:[%s4713_s15 + $0x24] ss:$8 sps:$4 sm:$0xff]  }
 0x17c   : > { %2194 = vmatprep.subr.bf16.mxu0 %v3627_v37 }
 0x17f   : > { %2195 = vmatpush1.bf16.msra.mxu0 %v3625_v36 }
 0x180   : > { %2468 = vmatmul.mubr.bf16.gmra.mrb[76].mxu1 %v3597_v31  ;;  %2196 = vmatprep.subr.bf16.mxu0 %v3630_v38 }
 0x183   : > { %2197 = vmatpush1.bf16.msra.mxu0 %v3628_v39  ;;  %v3652_v39 = vld [vmem:[%s4713_s15 + $0x20] ss:$8 sps:$4 sm:$0xff]  }
 0x184   : > { %2198 = vmatprep.subr.bf16.mxu0 %v3633_v41 }
 0x187   : > { %2199 = vmatpush1.bf16.msra.mxu0 %v3631_v40 }
 0x188   : > { %2200 = vmatprep.subr.bf16.mxu0 %v3636_v42  ;;  %v3657_v42 = vld [vmem:[%s4713_s15 + $0x34] ss:$8 sps:$4 sm:$0xff]  }
 0x18b   : > { %2201 = vmatpush1.bf16.msra.mxu0 %v3634_v43 }
 0x18c   : > { %2202 = vmatprep.subr.bf16.mxu0 %v3639_v47 }
 0x18f   : > { %2203 = vmatpush1.bf16.msra.mxu0 %v3637_v44 }
 0x190   : > { %2204 = vmatprep.subr.bf16.mxu0 %v3642_v50 }
 0x193   : > { %2205 = vmatpush1.bf16.msra.mxu0 %v3640_v51 }
 0x194   : > { %2206 = vmatprep.subr.bf16.mxu0 %v3645_v52 }
 0x197   : > { %2207 = vmatpush1.bf16.msra.mxu0 %v3643_v53 }
 0x198   : > { %2694 = vmatprep.subr.bf16.mxu0 %v3648_v54  ;;  %v3655_v54 = vld [vmem:[%s4713_s15 + $0x30] ss:$8 sps:$4 sm:$0xff]  }
 0x1fb   : > { %v4430_v55 = vpop.f32.mrb[32].mxu1 }
 0x1fc   : > { %v4432_v57 = vpop.f32.mrb[33].mxu1 }
 0x1fd   : > { %v4434_v58 = vpop.f32.mrb[34].mxu1 }
 0x1fe   : > { %v4436_v48 = vpop.f32.mrb[35].mxu1 }
 0x203   : > { %v4438_v60 = vpop.f32.mrb[36].mxu1 }
 0x204   : > { %v4440_v61 = vpop.f32.mrb[37].mxu1 }
 0x205   : > { %v4442_v49 = vpop.f32.mrb[38].mxu1 }
 0x206   : > { %v4444_v62 = vpop.f32.mrb[39].mxu1 }
 0x20b   : > { %v4446_v63 = vpop.f32.mrb[40].mxu1 }
 0x20c   : > { %v4448_v0 = vpop.f32.mrb[41].mxu1 }
 0x20d   : > { %v4450_v1 = vpop.f32.mrb[42].mxu1 }
 0x20e   : > { %v4452_v3 = vpop.f32.mrb[43].mxu1 }
 0x213   : > { %v4454_v56 = vpop.f32.mrb[44].mxu1 }
 0x214   : > { %v4456_v4 = vpop.f32.mrb[45].mxu1 }
 0x215   : > { %v4458_v59 = vpop.f32.mrb[46].mxu1 }
 0x216   : > { %v4463_v6 = vpop.f32.mrb[47].mxu1 }
 0x21b   : > { %v1921_v9 = vpop.f32.mrb[48].mxu1 }
 0x21c   : > { %v1922_v10 = vadd.f32 %v1921_v9, %v4466_v7  ;;  %v1923_v11 = vpop.f32.mrb[49].mxu1 }
 0x21d   : > { %v1924_v12 = vadd.f32 %v1923_v11, %v4469_v8  ;;  %v1925_v13 = vpop.f32.mrb[50].mxu1 }
 0x21e   : > { %v1926_v14 = vadd.f32 %v1925_v13, %v4466_v7  ;;  %v1927_v15 = vpop.f32.mrb[51].mxu1  ;;  %v1960_v17 = vmax.f32 %v1922_v10, 0.0  ;;  %v3660_v10 = vld [vmem:[%s4713_s15 + $0x44] ss:$8 sps:$4 sm:$0xff]  }
 0x21f   : > { %v1928_v16 = vadd.f32 %v1927_v15, %v4469_v8  ;;  %v1961_v19 = vmax.f32 %v1924_v12, 0.0 }
 0x220   : > { %v1962_v18 = vmax.f32 %v1926_v14, 0.0  ;;  %v3658_v14 = vld [vmem:[%s4713_s15 + $0x40] ss:$8 sps:$4 sm:$0xff]  }
 0x221   : > { %v1963_v20 = vmax.f32 %v1928_v16, 0.0 }
 0x222   : > { %v1976_v21 = vpack.c.bf16 %v1962_v18, %v1960_v17  ;;  %v3663_v17 = vld [vmem:[%s4713_s15 + $0x54] ss:$8 sps:$4 sm:$0xff]  }
 0x223   : > { %v1977_v22 = vpack.c.bf16 %v1963_v20, %v1961_v19  ;;  %v1931_v24 = vpop.f32.mrb[52].mxu1 }
 0x224   : > { %v1932_v26 = vadd.f32 %v1931_v24, %v4466_v7  ;;  %v1933_v27 = vpop.f32.mrb[53].mxu1 }
 0x225   : > { %2208 = vmatprep.mubr.bf16.mxu0 %v1977_v22  ;;  %v1934_v28 = vadd.f32 %v1933_v27, %v4469_v8  ;;  %v1935_v29 = vpop.f32.mrb[54].mxu1  ;;  %v2289_v22 = vld [vmem:[%s4709_s11] sm:$0x3] }
 0x226   : > { %2209 = vmatmul.mubr.bf16.vlgmr.msra.gmra.mrb[0].mxu0 %v1976_v21  ;;  %v1964_v30 = vmax.f32 %v1932_v26, 0.0  ;;  %v1936_v31 = vadd.f32 %v1935_v29, %v4466_v7  ;;  %v1937_v32 = vpop.f32.mrb[55].mxu1  ;;  %v3661_v26 = vld [vmem:[%s4713_s15 + $0x50] ss:$8 sps:$4 sm:$0xff]   ;;  %v3666_v29 = vld [vmem:[%s4713_s15 + $0x64] ss:$8 sps:$4 sm:$0xff]  }
 0x227   : > { %2695 = vmatpush1.bf16.msra.mxu0 %v3646_v23  ;;  %v1965_v34 = vmax.f32 %v1934_v28, 0.0  ;;  %v1938_v2 = vadd.f32 %v1937_v32, %v4469_v8  ;;  %v4530_v32 = vrot.slane %v2289_v22, %v4170_v46 }
 0x228   : > { %2696 = vmatprep.subr.bf16.mxu0 %v3651_v25  ;;  %v1966_v36 = vmax.f32 %v1936_v31, 0.0  ;;  %v4527_v31 = vrot.slane %v2289_v22, %v4168_v45 }
 0x229   : > { %v1967_v37 = vmax.f32 %v1938_v2, 0.0 }
 0x22a   : > { %v1978_v38 = vpack.c.bf16 %v1966_v36, %v1964_v30 }
 0x22b   : > { %2697 = vmatpush1.bf16.msra.mxu0 %v3649_v33  ;;  %v1979_v40 = vpack.c.bf16 %v1967_v37, %v1965_v34  ;;  %v1941_v41 = vpop.f32.mrb[56].mxu1  ;;  %v3664_v34 = vld [vmem:[%s4713_s15 + $0x60] ss:$8 sps:$4 sm:$0xff]  }
 0x22c   : > { %2698 = vmatprep.subr.bf16.mxu0 %v3654_v35  ;;  %v1942_v43 = vadd.f32 %v1941_v41, %v4466_v7  ;;  %v1943_v44 = vpop.f32.mrb[57].mxu1  ;;  %v3669_v35 = vld [vmem:[%s4713_s15 + $0x74] ss:$8 sps:$4 sm:$0xff]  }
 0x22d   : > { %v1944_v47 = vadd.f32 %v1943_v44, %v4469_v8  ;;  %v1945_v50 = vpop.f32.mrb[58].mxu1  ;;  %2218 = vmatprep.mubr.bf16.mxu0 %v1979_v40 }
 0x22e   : > { %v1968_v51 = vmax.f32 %v1942_v43, 0.0  ;;  %v1946_v52 = vadd.f32 %v1945_v50, %v4466_v7  ;;  %v1947_v53 = vpop.f32.mrb[59].mxu1  ;;  %2219 = vmatmul.mubr.bf16.gmra.mrb[4].mxu0 %v1978_v38  ;;  %v3667_v43 = vld [vmem:[%s4713_s15 + $0x70] ss:$8 sps:$4 sm:$0xff]   ;;  %v3672_v50 = vld [vmem:[%s4713_s15 + $0x84] ss:$8 sps:$4 sm:$0xff]  }
 0x22f   : > { %2699 = vmatpush1.bf16.msra.mxu0 %v3652_v39  ;;  %v1969_v5 = vmax.f32 %v1944_v47, 0.0  ;;  %v1948_v9 = vadd.f32 %v1947_v53, %v4469_v8 }
 0x230   : > { %2700 = vmatprep.subr.bf16.mxu0 %v3657_v42  ;;  %v1970_v11 = vmax.f32 %v1946_v52, 0.0 }
 0x231   : > { %v1971_v12 = vmax.f32 %v1948_v9, 0.0 }
 0x232   : > { %v1980_v13 = vpack.c.bf16 %v1970_v11, %v1968_v51 }
 0x233   : > { %2701 = vmatpush1.bf16.msra.mxu0 %v3655_v54  ;;  %v1981_v15 = vpack.c.bf16 %v1971_v12, %v1969_v5  ;;  %v1951_v16 = vpop.f32.mrb[60].mxu1  ;;  %v3670_v54 = vld [vmem:[%s4713_s15 + $0x80] ss:$8 sps:$4 sm:$0xff]  }
 0x234   : > { %2702 = vmatprep.subr.bf16.mxu0 %v3660_v10  ;;  %v1952_v18 = vadd.f32 %v1951_v16, %v4466_v7  ;;  %v1953_v19 = vpop.f32.mrb[61].mxu1  ;;  %v3675_v10 = vld [vmem:[%s4713_s15 + $0x94] ss:$8 sps:$4 sm:$0xff]  }
 0x235   : > { %v1954_v20 = vadd.f32 %v1953_v19, %v4469_v8  ;;  %v1955_v21 = vpop.f32.mrb[62].mxu1  ;;  %2228 = vmatprep.mubr.bf16.mxu0 %v1981_v15 }
 0x236   : > { %v1972_v23 = vmax.f32 %v1952_v18, 0.0  ;;  %v1956_v24 = vadd.f32 %v1955_v21, %v4466_v7  ;;  %v1957_v25 = vpop.f32.mrb[63].mxu1  ;;  %2229 = vmatmul.mubr.bf16.gmra.mrb[8].mxu0 %v1980_v13  ;;  %v3673_v18 = vld [vmem:[%s4713_s15 + $0x90] ss:$8 sps:$4 sm:$0xff]   ;;  %v3678_v21 = vld [vmem:[%s4713_s15 + $0xa4] ss:$8 sps:$4 sm:$0xff]  }
 0x237   : > { %2703 = vmatpush1.bf16.msra.mxu0 %v3658_v14  ;;  %v1973_v27 = vmax.f32 %v1954_v20, 0.0  ;;  %v1958_v28 = vadd.f32 %v1957_v25, %v4469_v8  ;;  %v3676_v25 = vld [vmem:[%s4713_s15 + $0xa0] ss:$8 sps:$4 sm:$0xff]  }
 0x238   : > { %2704 = vmatprep.subr.bf16.mxu0 %v3663_v17  ;;  %v1974_v30 = vmax.f32 %v1956_v24, 0.0 }
 0x239   : > { %v1975_v7 = vmax.f32 %v1958_v28, 0.0  ;;  %v3681_v28 = vld [vmem:[%s4713_s15 + $0xb4] ss:$8 sps:$4 sm:$0xff]  }
 0x23a   : > { %v1982_v33 = vpack.c.bf16 %v1974_v30, %v1972_v23 }
 0x23b   : > { %2705 = vmatpush1.bf16.msra.mxu0 %v3661_v26  ;;  %v1983_v8 = vpack.c.bf16 %v1975_v7, %v1973_v27  ;;  %v2439_v2 = vpop.f32.mrb[64].mxu1 }
 0x23c   : > { %2706 = vmatprep.subr.bf16.mxu0 %v3666_v29  ;;  %v2440_v36 = vadd.f32 %v2439_v2, %v4527_v31  ;;  %v2441_v37 = vpop.f32.mrb[65].mxu1 }
 0x23d   : > { %2238 = vmatprep.mubr.bf16.mxu0 %v1983_v8  ;;  %v2442_v38 = vadd.f32 %v2441_v37, %v4530_v32  ;;  %v2443_v39 = vpop.f32.mrb[66].mxu1 }
 0x23e   : > { %v2478_v40 = vmax.f32 %v2440_v36, 0.0  ;;  %2239 = vmatmul.mubr.bf16.gmra.mrb[12].mxu0 %v1982_v33  ;;  %v2444_v41 = vadd.f32 %v2443_v39, %v4527_v31  ;;  %v2445_v42 = vpop.f32.mrb[67].mxu1 }
 0x23f   : > { %2707 = vmatpush1.bf16.msra.mxu0 %v3664_v34  ;;  %v2479_v44 = vmax.f32 %v2442_v38, 0.0  ;;  %v2446_v47 = vadd.f32 %v2445_v42, %v4530_v32  ;;  %v3684_v38 = vld [vmem:[%s4713_s15 + $0xc4] ss:$8 sps:$4 sm:$0xff]   ;;  %v3682_v42 = vld [vmem:[%s4713_s15 + $0xc0] ss:$8 sps:$4 sm:$0xff]  }
 0x240   : > { %2708 = vmatprep.subr.bf16.mxu0 %v3669_v35  ;;  %v2480_v51 = vmax.f32 %v2444_v41, 0.0  ;;  %v3679_v35 = vld [vmem:[%s4713_s15 + $0xb0] ss:$8 sps:$4 sm:$0xff]  }
 0x241   : > { %v2481_v52 = vmax.f32 %v2446_v47, 0.0  ;;  %v3687_v47 = vld [vmem:[%s4713_s15 + $0xd4] ss:$8 sps:$4 sm:$0xff]  }
 0x242   : > { %v4548_v53 = vpack.c.bf16 %v2480_v51, %v2478_v40 }
 0x243   : > { %2709 = vmatpush1.bf16.msra.mxu0 %v3667_v43  ;;  %v2495_v5 = vpack.c.bf16 %v2481_v52, %v2479_v44  ;;  %v2449_v9 = vpop.f32.mrb[68].mxu1 }
 0x244   : > { %2710 = vmatprep.subr.bf16.mxu0 %v3672_v50  ;;  %v2450_v11 = vadd.f32 %v2449_v9, %v4527_v31  ;;  %v2451_v12 = vpop.f32.mrb[69].mxu1 }
 0x245   : > { %v2452_v13 = vadd.f32 %v2451_v12, %v4530_v32  ;;  %v2453_v14 = vpop.f32.mrb[70].mxu1  ;;  %2726 = vmatprep.mubr.bf16.mxu0 %v2495_v5 }
 0x246   : > { %v2482_v15 = vmax.f32 %v2450_v11, 0.0  ;;  %v2454_v16 = vadd.f32 %v2453_v14, %v4527_v31  ;;  %v2455_v17 = vpop.f32.mrb[71].mxu1  ;;  %v3685_v11 = vld [vmem:[%s4713_s15 + $0xd0] ss:$8 sps:$4 sm:$0xff]   ;;  %v3690_v14 = vld [vmem:[%s4713_s15 + $0xe4] ss:$8 sps:$4 sm:$0xff]  }
 0x247   : > { %2711 = vmatpush1.bf16.msra.mxu0 %v3670_v54  ;;  %v2483_v19 = vmax.f32 %v2452_v13, 0.0  ;;  %v2456_v20 = vadd.f32 %v2455_v17, %v4530_v32 }
 0x248   : > { %2712 = vmatprep.subr.bf16.mxu0 %v3675_v10  ;;  %v2484_v22 = vmax.f32 %v2454_v16, 0.0 }
 0x249   : > { %v2485_v23 = vmax.f32 %v2456_v20, 0.0  ;;  %v2783_v20 = vld [vmem:[%s4714_s16] sm:$0x3] }
 0x24a   : > { %v2496_v24 = vpack.c.bf16 %v2484_v22, %v2482_v15  ;;  %v4616_v22 = vrot.slane %v2783_v20, %v4168_v45 }
 0x24b   : > { %2713 = vmatpush1.bf16.msra.mxu0 %v3673_v18  ;;  %v2497_v26 = vpack.c.bf16 %v2485_v23, %v2483_v19  ;;  %v2459_v27 = vpop.f32.mrb[72].mxu1  ;;  %v3691_v19 = vld [vmem:[%s4713_s15 + $0xf0] ss:$8 sps:$4 sm:$0xff]   ;;  %v4619_v23 = vrot.slane %v2783_v20, %v4170_v46 }
 0x24c   : > { %2714 = vmatprep.subr.bf16.mxu0 %v3678_v21  ;;  %v2460_v29 = vadd.f32 %v2459_v27, %v4527_v31  ;;  %v2461_v30 = vpop.f32.mrb[73].mxu1  ;;  %v2811_v21 = vld [vmem:[%s730_s19] sm:$0x3] }
 0x24d   : > { %v2462_v7 = vadd.f32 %v2461_v30, %v4530_v32  ;;  %v2463_v33 = vpop.f32.mrb[74].mxu1  ;;  %v4626_v27 = vrot.slane %v2811_v21, %v4170_v46 }
 0x24e   : > { %v2486_v34 = vmax.f32 %v2460_v29, 0.0  ;;  %v2464_v8 = vadd.f32 %v2463_v33, %v4527_v31  ;;  %v2465_v2 = vpop.f32.mrb[75].mxu1 }
 0x24f   : > { %2715 = vmatpush1.bf16.msra.mxu0 %v3676_v25  ;;  %v2487_v36 = vmax.f32 %v2462_v7, 0.0  ;;  %v2466_v37 = vadd.f32 %v2465_v2, %v4530_v32 }
 0x250   : > { %2716 = vmatprep.subr.bf16.mxu0 %v3681_v28  ;;  %v2488_v39 = vmax.f32 %v2464_v8, 0.0 }
 0x251   : > { %v2489_v40 = vmax.f32 %v2466_v37, 0.0 }
 0x252   : > { %v2498_v41 = vpack.c.bf16 %v2488_v39, %v2486_v34 }
 0x253   : > { %2717 = vmatpush1.bf16.msra.mxu0 %v3679_v35  ;;  %v2499_v43 = vpack.c.bf16 %v2489_v40, %v2487_v36  ;;  %v2469_v44 = vpop.f32.mrb[76].mxu1 }
 0x254   : > { %2718 = vmatprep.subr.bf16.mxu0 %v3684_v38  ;;  %v2470_v50 = vadd.f32 %v2469_v44, %v4527_v31  ;;  %v2471_v51 = vpop.f32.mrb[77].mxu1 }
 0x255   : > { %v2472_v52 = vadd.f32 %v2471_v51, %v4530_v32  ;;  %v2473_v54 = vpop.f32.mrb[78].mxu1 }
 0x256   : > { %v2490_v5 = vmax.f32 %v2470_v50, 0.0  ;;  %v2474_v9 = vadd.f32 %v2473_v54, %v4527_v31  ;;  %v2475_v10 = vpop.f32.mrb[79].mxu1  ;;  %v3688_v31 = vld [vmem:[%s4713_s15 + $0xe0] ss:$8 sps:$4 sm:$0xff]  }
 0x257   : > { %2719 = vmatpush1.bf16.msra.mxu0 %v3682_v42  ;;  %v2491_v12 = vmax.f32 %v2472_v52, 0.0  ;;  %v2476_v13 = vadd.f32 %v2475_v10, %v4530_v32  ;;  %v3693_v32 = vld [vmem:[%s4713_s15 + $0xf4] ss:$8 sps:$4 sm:$0xff]  }
 0x258   : > { %2720 = vmatprep.subr.bf16.mxu0 %v3687_v47  ;;  %v2492_v15 = vmax.f32 %v2474_v9, 0.0 }
 0x259   : > { %v2493_v16 = vmax.f32 %v2476_v13, 0.0 }
 0x25a   : > { %v2500_v17 = vpack.c.bf16 %v2492_v15, %v2490_v5 }
 0x25b   : > { %2721 = vmatpush1.bf16.msra.mxu0 %v3685_v11  ;;  %v2501_v18 = vpack.c.bf16 %v2493_v16, %v2491_v12 }
 0x25c   : > { %2722 = vmatprep.subr.bf16.mxu0 %v3690_v14 }
 0x25f   : > { %2723 = vmatpush1.bf16.msra.mxu0 %v3688_v31 }
 0x260   : > { %2724 = vmatprep.subr.bf16.mxu0 %v3693_v32 }
 0x263   : > { %2725 = vmatpush1.bf16.msra.mxu0 %v3691_v19 }
 0x266   : > { %2727 = vmatmul.mubr.bf16.vlgmr.msra.gmra.mrb[0].mxu0 %v4548_v53 }
 0x267   : > { %2736 = vmatprep.mubr.bf16.mxu0 %v2497_v26 }
 0x26e   : > { %2737 = vmatmul.mubr.bf16.gmra.mrb[4].mxu0 %v2496_v24  ;;  %v4622_v24 = vrot.slane %v2811_v21, %v4168_v45 }
 0x26f   : > { %2746 = vmatprep.mubr.bf16.mxu0 %v2499_v43 }
 0x276   : > { %2747 = vmatmul.mubr.bf16.gmra.mrb[8].mxu0 %v2498_v41 }
 0x277   : > { %2756 = vmatprep.mubr.bf16.mxu0 %v2501_v18 }
 0x27e   : > { %2757 = vmatmul.mubr.bf16.gmra.mrb[12].mxu0 %v2500_v17 }
 0x339   : > { %v2728_v53 = vpop.f32.mrb[0].mxu0 }
 0x33a   : > { %v3317_v25 = vadd.f32 %v2728_v53, %v4430_v55  ;;  %v2730_v26 = vpop.f32.mrb[1].mxu0 }
 0x33b   : > { %v3318_v28 = vadd.f32 %v2730_v26, %v4432_v57  ;;  %v2732_v29 = vpop.f32.mrb[2].mxu0 }
 0x33c   : > { %v2795_v30 = vadd.f32 %v3317_v25, %v4616_v22  ;;  %v3319_v7 = vadd.f32 %v2732_v29, %v4434_v58  ;;  %v2734_v33 = vpop.f32.mrb[3].mxu0 }
 0x33d   : > { %v2796_v34 = vadd.f32 %v3318_v28, %v4619_v23  ;;  %v3320_v8 = vadd.f32 %v2734_v33, %v4436_v48 }
 0x33e   : > { %v2823_v45 = vadd.f32 %v4622_v24, %v2795_v30  ;;  %v2797_v55 = vadd.f32 %v3319_v7, %v4616_v22 }
 0x33f   : > { %v2824_v46 = vadd.f32 %v4626_v27, %v2796_v34  ;;  %v2798_v2 = vadd.f32 %v3320_v8, %v4619_v23 }
 0x340   : > { %v2839_v57 = vmax.f32 %v2823_v45, 0.0  ;;  %v2825_v35 = vadd.f32 %v4622_v24, %v2797_v55 }
 0x341   : > { %v2840_v36 = vmax.f32 %v2824_v46, 0.0  ;;  %v2826_v58 = vadd.f32 %v4626_v27, %v2798_v2  ;;  %v2738_v37 = vpop.f32.mrb[4].mxu0 }
 0x342   : > { %v2841_v48 = vmax.f32 %v2825_v35, 0.0  ;;  %v3321_v38 = vadd.f32 %v2738_v37, %v4438_v60  ;;  %v2740_v39 = vpop.f32.mrb[5].mxu0 }
 0x343   : > { %v3309_v40 = vpack.c.bf16 %v2840_v36, %v2839_v57  ;;  %v2842_v41 = vmax.f32 %v2826_v58, 0.0  ;;  %v3322_v42 = vadd.f32 %v2740_v39, %v4440_v61  ;;  %v2742_v43 = vpop.f32.mrb[6].mxu0 }
 0x344   : > { %v2799_v44 = vadd.f32 %v3321_v38, %v4616_v22  ;;  %v3323_v47 = vadd.f32 %v2742_v43, %v4442_v49  ;;  %v2744_v50 = vpop.f32.mrb[7].mxu0 }
 0x345   : > { %2903 = vst [vmem:[%s4643_s2] sm:$0xff] %v3309_v40  ;;  %v3310_v51 = vpack.c.bf16 %v2842_v41, %v2841_v48  ;;  %v2800_v52 = vadd.f32 %v3322_v42, %v4619_v23  ;;  %v3324_v54 = vadd.f32 %v2744_v50, %v4444_v62 }
 0x346   : > { %v2827_v5 = vadd.f32 %v4622_v24, %v2799_v44  ;;  %v2801_v60 = vadd.f32 %v3323_v47, %v4616_v22 }
 0x347   : > { %2904 = vst [vmem:[%s4643_s2 + $0x8] sm:$0xff] %v3310_v51  ;;  %v2828_v9 = vadd.f32 %v4626_v27, %v2800_v52  ;;  %v2802_v61 = vadd.f32 %v3324_v54, %v4619_v23 }
 0x348   : > { %v2843_v10 = vmax.f32 %v2827_v5, 0.0  ;;  %v2829_v49 = vadd.f32 %v4622_v24, %v2801_v60 }
 0x349   : > { %v2844_v11 = vmax.f32 %v2828_v9, 0.0  ;;  %v2830_v12 = vadd.f32 %v4626_v27, %v2802_v61  ;;  %v2748_v13 = vpop.f32.mrb[8].mxu0 }
 0x34a   : > { %v2845_v14 = vmax.f32 %v2829_v49, 0.0  ;;  %v3325_v62 = vadd.f32 %v2748_v13, %v4446_v63  ;;  %v2750_v15 = vpop.f32.mrb[9].mxu0 }
 0x34b   : > { %v3311_v16 = vpack.c.bf16 %v2844_v11, %v2843_v10  ;;  %v2846_v17 = vmax.f32 %v2830_v12, 0.0  ;;  %v3326_v31 = vadd.f32 %v2750_v15, %v4448_v0  ;;  %v2752_v18 = vpop.f32.mrb[10].mxu0 }
 0x34c   : > { %v2803_v32 = vadd.f32 %v3325_v62, %v4616_v22  ;;  %v3327_v19 = vadd.f32 %v2752_v18, %v4450_v1  ;;  %v2754_v20 = vpop.f32.mrb[11].mxu0 }
 0x34d   : > { %2905 = vst [vmem:[%s4643_s2 + $0x10] sm:$0xff] %v3311_v16  ;;  %v3312_v21 = vpack.c.bf16 %v2846_v17, %v2845_v14  ;;  %v2804_v53 = vadd.f32 %v3326_v31, %v4619_v23  ;;  %v3328_v25 = vadd.f32 %v2754_v20, %v4452_v3 }
 0x34e   : > { %v2831_v26 = vadd.f32 %v4622_v24, %v2803_v32  ;;  %v2805_v63 = vadd.f32 %v3327_v19, %v4616_v22 }
 0x34f   : > { %2906 = vst [vmem:[%s4643_s2 + $0x18] sm:$0xff] %v3312_v21  ;;  %v2832_v28 = vadd.f32 %v4626_v27, %v2804_v53  ;;  %v2806_v0 = vadd.f32 %v3328_v25, %v4619_v23 }
 0x350   : > { %v2847_v29 = vmax.f32 %v2831_v26, 0.0  ;;  %v2833_v1 = vadd.f32 %v4622_v24, %v2805_v63 }
 0x351   : > { %v2848_v30 = vmax.f32 %v2832_v28, 0.0  ;;  %v2834_v7 = vadd.f32 %v4626_v27, %v2806_v0  ;;  %v2758_v33 = vpop.f32.mrb[12].mxu0 }
 0x352   : > { %v2849_v34 = vmax.f32 %v2833_v1, 0.0  ;;  %v3329_v3 = vadd.f32 %v2758_v33, %v4454_v56  ;;  %v2760_v8 = vpop.f32.mrb[13].mxu0 }
 0x353   : > { %v3313_v45 = vpack.c.bf16 %v2848_v30, %v2847_v29  ;;  %v2850_v55 = vmax.f32 %v2834_v7, 0.0  ;;  %v3330_v46 = vadd.f32 %v2760_v8, %v4456_v4  ;;  %v2762_v2 = vpop.f32.mrb[14].mxu0 }
 0x354   : > { %v2807_v57 = vadd.f32 %v3329_v3, %v4616_v22  ;;  %v3331_v35 = vadd.f32 %v2762_v2, %v4458_v59  ;;  %v2764_v36 = vpop.f32.mrb[15].mxu0 }
 0x355   : > { %2907 = vst [vmem:[%s4643_s2 + $0x20] sm:$0xff] %v3313_v45  ;;  %v3314_v58 = vpack.c.bf16 %v2850_v55, %v2849_v34  ;;  %v2808_v37 = vadd.f32 %v3330_v46, %v4619_v23  ;;  %v3332_v48 = vadd.f32 %v2764_v36, %v4463_v6 }
 0x356   : > { %v2835_v56 = vadd.f32 %v4622_v24, %v2807_v57  ;;  %v2809_v38 = vadd.f32 %v3331_v35, %v4616_v22 }
 0x357   : > { %2908 = vst [vmem:[%s4643_s2 + $0x28] sm:$0xff] %v3314_v58  ;;  %v2836_v4 = vadd.f32 %v4626_v27, %v2808_v37  ;;  %v2810_v39 = vadd.f32 %v3332_v48, %v4619_v23 }
 0x358   : > { %v2851_v40 = vmax.f32 %v2835_v56, 0.0  ;;  %v2837_v59 = vadd.f32 %v4622_v24, %v2809_v38 }
 0x359   : > { %v2852_v41 = vmax.f32 %v2836_v4, 0.0  ;;  %v2838_v42 = vadd.f32 %v4626_v27, %v2810_v39 }
 0x35a   : > { %v2853_v43 = vmax.f32 %v2837_v59, 0.0 }
 0x35b   : > { %v3315_v44 = vpack.c.bf16 %v2852_v41, %v2851_v40  ;;  %v2854_v47 = vmax.f32 %v2838_v42, 0.0 }
 0x35d   : > { %2909 = vst [vmem:[%s4643_s2 + $0x30] sm:$0xff] %v3315_v44  ;;  %v3316_v6 = vpack.c.bf16 %v2854_v47, %v2853_v43 }
 0x35f   : > { %2910 = vst [vmem:[%s4643_s2 + $0x38] sm:$0xff] %v3316_v6 }
 0x360 PF: > { %s4728_s27 = sld [smem:[#allocation3_spill]]  ;;  %s4730_s28 = sld [smem:[#allocation4_spill]] }
 0x366   : > { %s28_s29 = sadd.s32 1, %s4728_s27   ;;  %s4729_s27 = sld [smem:[#allocation2_spill]] }
 0x367   : > { %p25_p5 = scmp.ge.s32.totalorder %s28_s29, 4  }
 0x369   :  { %27 = sbr.rel (!%p25_p5) target bundleno = 4 (0x4), region = 134 }

// kernel: deeplab_head_forward.6
= control target key start
LH: loop header
LB: loop body
LE: loop exit
PB: predicated region body
PF: predicated region fallthrough
CT: control target
= control target key end

     0   :  { %s2376_s18 = smov 0   ;;  %s2378_s19 = smov 0   ;;  %s2873_s0 = inlined_call_operand.vmem [shape: bf16[2,256,128], index: 0, kind: input, shape index: {}]   ;;  %s2874_s1 = inlined_call_operand.vmem [shape: bf16[2,256,256], index: 1, kind: input, shape index: {}]   ;;  %s2875_s2 = inlined_call_operand.vmem [shape: bf16[128,256], index: 2, kind: input, shape index: {}]   ;;  %s2876_s3 = inlined_call_operand.vmem [shape: bf16[256,256], index: 3, kind: input, shape index: {}]   ;;  %s2877_s4 = inlined_call_operand.vmem [shape: f32[1,256], index: 4, kind: input, shape index: {}]   ;;  %s2878_s5 = inlined_call_operand.vmem [shape: bf16[2,256,256], index: 5, kind: output, shape index: {}]  }
   0x1   :  { %s2380_s20 = smov 0  }
   0x2 LB: > { %s34_s21 = sadd.s32 1, %s2339_s19  ;;  %p1924_p0 = scmp.ge.s32.totalorder %s2343_s20, 1  ;;  %s2343_s20 = sphi %s2380_s20, %s15_s20   ;;  %s2339_s19 = sphi %s2378_s19, %s2880_s19   ;;  %s2335_s18 = sphi %s2376_s18, %s2879_s18  }
   0x3   : > { %p36_p1 = scmp.ge.s32.totalorder %s34_s21, 2  ;;  %p267_p2 = scmp.lt.s32.totalorder %s2343_s20, 3 }
   0x5   : > { %s2882_s21 = smov (%p36_p1, %s34_s21), 0  ;;  %p268_p3 = pnand %p1924_p0, %p267_p2 }
   0x6   : > { %v2185_v0 = vld [vmem:[%s2876_s3 + $0x4] ss:$8 sps:$4 sm:$0xff] (!%p268_p3)   ;;  %v2187_v1 = vld [vmem:[%s2876_s3] ss:$8 sps:$4 sm:$0xff] (!%p268_p3)   ;;  %v2345_v2 = vmov (!%p268_p3), 0   ;;  %p333_p4 = scmp.lt.s32.totalorder (!%p268_p3), %s2335_s18, 1 }
   0x7   : > { %271 = sbr.rel (%p268_p3) target bundleno = 415 (0x19f), region = 40  ;;  %1220 = vmatprep.mubr.bf16.mxu0 (!%p268_p3), %v2345_v2  ;;  %819 = vmatprep.subr.bf16.mxu1 (!%p268_p3), %v2185_v0  ;;  %v2188_v3 = vld [vmem:[%s2876_s3 + $0x14] ss:$8 sps:$4 sm:$0xff] (!%p268_p3)   ;;  %v2190_v4 = vld [vmem:[%s2876_s3 + $0x10] ss:$8 sps:$4 sm:$0xff] (!%p268_p3)  }
   0x8   : > { %820 = vmatpush1.bf16.msra.mxu1 (!%p268_p3), %v2187_v1  ;;  %v2191_v5 = vld [vmem:[%s2876_s3 + $0x24] ss:$8 sps:$4 sm:$0xff] (!%p268_p3)   ;;  %v2193_v6 = vld [vmem:[%s2876_s3 + $0x20] ss:$8 sps:$4 sm:$0xff] (!%p268_p3)   ;;  %v2194_v7 = vld [vmem:[%s2876_s3 + $0x34] ss:$8 sps:$4 sm:$0xff] (!%p268_p3)  }
   0x9   : > { %821 = vmatprep.subr.bf16.mxu1 (!%p268_p3), %v2188_v3  ;;  %v2196_v8 = vld [vmem:[%s2876_s3 + $0x30] ss:$8 sps:$4 sm:$0xff] (!%p268_p3)   ;;  %v2209_v9 = vld [vmem:[%s2875_s2 + $0x4] ss:$8 sps:$4 sm:$0xff] (!%p268_p3)   ;;  %v2211_v10 = vld [vmem:[%s2875_s2] ss:$8 sps:$4 sm:$0xff] (!%p268_p3)  }
   0xa   : > { %v2197_v11 = vld [vmem:[%s2876_s3 + $0x44] ss:$8 sps:$4 sm:$0xff] (!%p268_p3)   ;;  %1188 = vmatprep.subr.bf16.mxu0 (!%p268_p3), %v2209_v9  ;;  %v2215_v12 = vld [vmem:[%s2875_s2 + $0x14] ss:$8 sps:$4 sm:$0xff] (!%p268_p3)   ;;  %v2217_v13 = vld [vmem:[%s2875_s2 + $0x10] ss:$8 sps:$4 sm:$0xff] (!%p268_p3)  }
   0xb   : > { %1189 = vmatpush1.bf16.msra.mxu0 (!%p268_p3), %v2211_v10  ;;  %v2199_v14 = vld [vmem:[%s2876_s3 + $0x40] ss:$8 sps:$4 sm:$0xff] (!%p268_p3)   ;;  %v2200_v15 = vld [vmem:[%s2876_s3 + $0x54] ss:$8 sps:$4 sm:$0xff] (!%p268_p3)   ;;  %v2221_v16 = vld [vmem:[%s2875_s2 + $0x24] ss:$8 sps:$4 sm:$0xff] (!%p268_p3)  }
   0xc   : > { %822 = vmatpush1.bf16.msra.mxu1 (!%p268_p3), %v2190_v4  ;;  %1190 = vmatprep.subr.bf16.mxu0 (!%p268_p3), %v2215_v12  ;;  %v2223_v17 = vld [vmem:[%s2875_s2 + $0x20] ss:$8 sps:$4 sm:$0xff] (!%p268_p3)   ;;  %v2202_v18 = vld [vmem:[%s2876_s3 + $0x50] ss:$8 sps:$4 sm:$0xff] (!%p268_p3)   ;;  %v2227_v19 = vld [vmem:[%s2875_s2 + $0x34] ss:$8 sps:$4 sm:$0xff] (!%p268_p3)  }
   0xd   : > { %823 = vmatprep.subr.bf16.mxu1 (!%p268_p3), %v2191_v5  ;;  %v2203_v20 = vld [vmem:[%s2876_s3 + $0x64] ss:$8 sps:$4 sm:$0xff] (!%p268_p3)   ;;  %v2229_v21 = vld [vmem:[%s2875_s2 + $0x30] ss:$8 sps:$4 sm:$0xff] (!%p268_p3)   ;;  %v2205_v22 = vld [vmem:[%s2876_s3 + $0x60] ss:$8 sps:$4 sm:$0xff] (!%p268_p3)  }
   0xe   : > { %v2233_v23 = vld [vmem:[%s2875_s2 + $0x44] ss:$8 sps:$4 sm:$0xff]   ;;  %v2206_v24 = vld [vmem:[%s2876_s3 + $0x74] ss:$8 sps:$4 sm:$0xff]   ;;  %s2884_s18 = smov (!%p333_p4, %s2335_s18), 1 }
   0xf   : > { %1191 = vmatpush1.bf16.msra.mxu0 %v2217_v13  ;;  %v2235_v25 = vld [vmem:[%s2875_s2 + $0x40] ss:$8 sps:$4 sm:$0xff]   ;;  %v2208_v26 = vld [vmem:[%s2876_s3 + $0x70] ss:$8 sps:$4 sm:$0xff]   ;;  %v2239_v27 = vld [vmem:[%s2875_s2 + $0x54] ss:$8 sps:$4 sm:$0xff]  }
  0x10   : > { %824 = vmatpush1.bf16.msra.mxu1 %v2193_v6  ;;  %1192 = vmatprep.subr.bf16.mxu0 %v2221_v16  ;;  %v2212_v28 = vld [vmem:[%s2876_s3 + $0x84] ss:$8 sps:$4 sm:$0xff]   ;;  %s2061_s11 = sshll.u32 %s2884_s18, 7  ;;  %s2062_s12 = sshll.u32 %s2884_s18, 8  ;;  %v2241_v29 = vld [vmem:[%s2875_s2 + $0x50] ss:$8 sps:$4 sm:$0xff]  }
  0x11   : > { %825 = vmatprep.subr.bf16.mxu1 %v2194_v7  ;;  %v2214_v30 = vld [vmem:[%s2876_s3 + $0x80] ss:$8 sps:$4 sm:$0xff]   ;;  %v2245_v31 = vld [vmem:[%s2875_s2 + $0x64] ss:$8 sps:$4 sm:$0xff]   ;;  %s2499_s25 = scalar_lea.vmem %s2873_s0, %s2061_s11  ;;  %s2506_s28 = scalar_lea.vmem %s2874_s1, %s2062_s12  ;;  %v2218_v32 = vld [vmem:[%s2876_s3 + $0x94] ss:$8 sps:$4 sm:$0xff]  }
  0x12   : > { %v2220_v33 = vld [vmem:[%s2876_s3 + $0x90] ss:$8 sps:$4 sm:$0xff]   ;;  %v2247_v34 = vld [vmem:[%s2875_s2 + $0x60] ss:$8 sps:$4 sm:$0xff]   ;;  %v2260_v35 = vld [vmem:[%s2506_s28 + $0x4] ss:$8 sps:$4 sm:$0xff]   ;;  %s2646_s29 = scalar_lea.vmem %s2878_s5, %s2062_s12 }
  0x13   : > { %1193 = vmatpush1.bf16.msra.mxu0 %v2223_v17  ;;  %v2251_v36 = vld [vmem:[%s2875_s2 + $0x74] ss:$8 sps:$4 sm:$0xff]   ;;  %v2224_v37 = vld [vmem:[%s2876_s3 + $0xa4] ss:$8 sps:$4 sm:$0xff]   ;;  %851 = vmatprep.mubr.bf16.mxu1 %v2260_v35  ;;  %v2253_v38 = vld [vmem:[%s2875_s2 + $0x70] ss:$8 sps:$4 sm:$0xff]  }
  0x14   : > { %826 = vmatpush1.bf16.msra.mxu1 %v2196_v8  ;;  %1194 = vmatprep.subr.bf16.mxu0 %v2227_v19  ;;  %v2226_v39 = vld [vmem:[%s2876_s3 + $0xa0] ss:$8 sps:$4 sm:$0xff]   ;;  %v2230_v40 = vld [vmem:[%s2876_s3 + $0xb4] ss:$8 sps:$4 sm:$0xff]   ;;  %v2232_v42 = vld [vmem:[%s2876_s3 + $0xb0] ss:$8 sps:$4 sm:$0xff]  }
  0x15   : > { %827 = vmatprep.subr.bf16.mxu1 %v2197_v11  ;;  %v2257_v41 = vld [vmem:[%s2499_s25] sm:$0xff]   ;;  %v2242_v45 = vld [vmem:[%s2876_s3 + $0xd4] ss:$8 sps:$4 sm:$0xff]   ;;  %v2261_v46 = vld [vmem:[%s2499_s25 + $0x8] sm:$0xff]  }
  0x16   : > { %v2236_v43 = vld [vmem:[%s2876_s3 + $0xc4] ss:$8 sps:$4 sm:$0xff]   ;;  %v2238_v44 = vld [vmem:[%s2876_s3 + $0xc0] ss:$8 sps:$4 sm:$0xff]   ;;  %v2244_v47 = vld [vmem:[%s2876_s3 + $0xd0] ss:$8 sps:$4 sm:$0xff]  }
  0x17   : > { %1195 = vmatpush1.bf16.msra.mxu0 %v2229_v21  ;;  %v2248_v48 = vld [vmem:[%s2876_s3 + $0xe4] ss:$8 sps:$4 sm:$0xff]   ;;  %v2250_v49 = vld [vmem:[%s2876_s3 + $0xe0] ss:$8 sps:$4 sm:$0xff]   ;;  %v2254_v50 = vld [vmem:[%s2876_s3 + $0xf4] ss:$8 sps:$4 sm:$0xff]  }
  0x18   : > { %828 = vmatpush1.bf16.msra.mxu1 %v2199_v14  ;;  %1196 = vmatprep.subr.bf16.mxu0 %v2233_v23  ;;  %v2265_v51 = vld [vmem:[%s2499_s25 + $0x10] sm:$0xff]   ;;  %v2258_v53 = vld [vmem:[%s2506_s28] ss:$8 sps:$4 sm:$0xff]   ;;  %v2269_v55 = vld [vmem:[%s2499_s25 + $0x18] sm:$0xff]  }
  0x19   : > { %829 = vmatprep.subr.bf16.mxu1 %v2200_v15  ;;  %v2256_v52 = vld [vmem:[%s2876_s3 + $0xf0] ss:$8 sps:$4 sm:$0xff]   ;;  %v2262_v54 = vld [vmem:[%s2506_s28 + $0x14] ss:$8 sps:$4 sm:$0xff]   ;;  %v2266_v57 = vld [vmem:[%s2506_s28 + $0x24] ss:$8 sps:$4 sm:$0xff]  }
  0x1a   : > { %v2264_v56 = vld [vmem:[%s2506_s28 + $0x10] ss:$8 sps:$4 sm:$0xff]   ;;  %v2273_v58 = vld [vmem:[%s2499_s25 + $0x20] sm:$0xff]   ;;  %v2270_v60 = vld [vmem:[%s2506_s28 + $0x34] ss:$8 sps:$4 sm:$0xff]  }
  0x1b   : > { %1197 = vmatpush1.bf16.msra.mxu0 %v2235_v25  ;;  %v2268_v59 = vld [vmem:[%s2506_s28 + $0x20] ss:$8 sps:$4 sm:$0xff]   ;;  %v2272_v62 = vld [vmem:[%s2506_s28 + $0x30] ss:$8 sps:$4 sm:$0xff]   ;;  %v2274_v63 = vld [vmem:[%s2506_s28 + $0x44] ss:$8 sps:$4 sm:$0xff]  }
  0x1c   : > { %830 = vmatpush1.bf16.msra.mxu1 %v2202_v18  ;;  %1198 = vmatprep.subr.bf16.mxu0 %v2239_v27  ;;  %v2277_v61 = vld [vmem:[%s2499_s25 + $0x28] sm:$0xff]   ;;  %v2281_v0 = vld [vmem:[%s2499_s25 + $0x30] sm:$0xff]   ;;  %v2285_v4 = vld [vmem:[%s2499_s25 + $0x38] sm:$0xff]  }
  0x1d   : > { %831 = vmatprep.subr.bf16.mxu1 %v2203_v20  ;;  %v2276_v1 = vld [vmem:[%s2506_s28 + $0x40] ss:$8 sps:$4 sm:$0xff]   ;;  %v2278_v3 = vld [vmem:[%s2506_s28 + $0x54] ss:$8 sps:$4 sm:$0xff]   ;;  %v2280_v5 = vld [vmem:[%s2506_s28 + $0x50] ss:$8 sps:$4 sm:$0xff]  }
  0x1e   : > { %v2282_v6 = vld [vmem:[%s2506_s28 + $0x64] ss:$8 sps:$4 sm:$0xff]   ;;  %v2284_v8 = vld [vmem:[%s2506_s28 + $0x60] ss:$8 sps:$4 sm:$0xff]   ;;  %v2286_v9 = vld [vmem:[%s2506_s28 + $0x74] ss:$8 sps:$4 sm:$0xff]  }
  0x1f   : > { %1199 = vmatpush1.bf16.msra.mxu0 %v2241_v29  ;;  %v2289_v7 = vld [vmem:[%s2499_s25 + $0x40] sm:$0xff]   ;;  %v2293_v10 = vld [vmem:[%s2499_s25 + $0x48] sm:$0xff]   ;;  %v2288_v11 = vld [vmem:[%s2506_s28 + $0x70] ss:$8 sps:$4 sm:$0xff]  }
  0x20   : > { %832 = vmatpush1.bf16.msra.mxu1 %v2205_v22  ;;  %1200 = vmatprep.subr.bf16.mxu0 %v2245_v31  ;;  %v2290_v12 = vld [vmem:[%s2506_s28 + $0x84] ss:$8 sps:$4 sm:$0xff]   ;;  %v2297_v13 = vld [vmem:[%s2499_s25 + $0x50] sm:$0xff]   ;;  %v2292_v14 = vld [vmem:[%s2506_s28 + $0x80] ss:$8 sps:$4 sm:$0xff]  }
  0x21   : > { %833 = vmatprep.subr.bf16.mxu1 %v2206_v24  ;;  %v2294_v15 = vld [vmem:[%s2506_s28 + $0x94] ss:$8 sps:$4 sm:$0xff]   ;;  %v2296_v17 = vld [vmem:[%s2506_s28 + $0x90] ss:$8 sps:$4 sm:$0xff]   ;;  %v2298_v18 = vld [vmem:[%s2506_s28 + $0xa4] ss:$8 sps:$4 sm:$0xff]  }
  0x22   : > { %v2301_v16 = vld [vmem:[%s2499_s25 + $0x58] sm:$0xff]   ;;  %v2305_v19 = vld [vmem:[%s2499_s25 + $0x60] sm:$0xff]   ;;  %v2309_v22 = vld [vmem:[%s2499_s25 + $0x68] sm:$0xff]  }
  0x23   : > { %1201 = vmatpush1.bf16.msra.mxu0 %v2247_v34  ;;  %v2300_v20 = vld [vmem:[%s2506_s28 + $0xa0] ss:$8 sps:$4 sm:$0xff]   ;;  %v2302_v21 = vld [vmem:[%s2506_s28 + $0xb4] ss:$8 sps:$4 sm:$0xff]   ;;  %v2304_v23 = vld [vmem:[%s2506_s28 + $0xb0] ss:$8 sps:$4 sm:$0xff]  }
  0x24   : > { %834 = vmatpush1.bf16.msra.mxu1 %v2208_v26  ;;  %1202 = vmatprep.subr.bf16.mxu0 %v2251_v36  ;;  %v2306_v24 = vld [vmem:[%s2506_s28 + $0xc4] ss:$8 sps:$4 sm:$0xff]   ;;  %v2313_v25 = vld [vmem:[%s2499_s25 + $0x70] sm:$0xff]   ;;  %v2308_v26 = vld [vmem:[%s2506_s28 + $0xc0] ss:$8 sps:$4 sm:$0xff]  }
  0x25   : > { %835 = vmatprep.subr.bf16.mxu1 %v2212_v28  ;;  %v2310_v27 = vld [vmem:[%s2506_s28 + $0xd4] ss:$8 sps:$4 sm:$0xff]   ;;  %v2312_v29 = vld [vmem:[%s2506_s28 + $0xd0] ss:$8 sps:$4 sm:$0xff]   ;;  %v2316_v31 = vld [vmem:[%s2506_s28 + $0xe0] ss:$8 sps:$4 sm:$0xff]  }
  0x26   : > { %v2317_v28 = vld [vmem:[%s2499_s25 + $0x78] sm:$0xff]  }
  0x27   : > { %1203 = vmatpush1.bf16.msra.mxu0 %v2253_v38 }
  0x28   : > { %836 = vmatpush1.bf16.msra.mxu1 %v2214_v30  ;;  %v2314_v30 = vld [vmem:[%s2506_s28 + $0xe4] ss:$8 sps:$4 sm:$0xff]  }
  0x29   : > { %837 = vmatprep.subr.bf16.mxu1 %v2218_v32  ;;  %v2318_v32 = vld [vmem:[%s2506_s28 + $0xf4] ss:$8 sps:$4 sm:$0xff]  }
  0x2a   : > { %1221 = vmatmul.mubr.bf16.vlgmr.msra.gmra.mrb[0].mxu0 %v2257_v41 }
  0x2b   : > { %1230 = vmatprep.mubr.bf16.mxu0 %v2345_v2 }
  0x2c   : > { %838 = vmatpush1.bf16.msra.mxu1 %v2220_v33  ;;  %v2320_v33 = vld [vmem:[%s2506_s28 + $0xf0] ss:$8 sps:$4 sm:$0xff]  }
  0x2d   : > { %839 = vmatprep.subr.bf16.mxu1 %v2224_v37 }
  0x30   : > { %840 = vmatpush1.bf16.msra.mxu1 %v2226_v39 }
  0x31   : > { %841 = vmatprep.subr.bf16.mxu1 %v2230_v40 }
  0x32   : > { %1231 = vmatmul.mubr.bf16.gmra.mrb[4].mxu0 %v2261_v46 }
  0x33   : > { %1240 = vmatprep.mubr.bf16.mxu0 %v2345_v2 }
  0x34   : > { %842 = vmatpush1.bf16.msra.mxu1 %v2232_v42 }
  0x35   : > { %843 = vmatprep.subr.bf16.mxu1 %v2236_v43 }
  0x38   : > { %844 = vmatpush1.bf16.msra.mxu1 %v2238_v44 }
  0x39   : > { %845 = vmatprep.subr.bf16.mxu1 %v2242_v45  ;;  %v1381_v45 = vld [vmem:[%s2877_s4] sm:$0x3] }
  0x3a   : > { %1241 = vmatmul.mubr.bf16.gmra.mrb[8].mxu0 %v2265_v51 }
  0x3b   : > { %1250 = vmatprep.mubr.bf16.mxu0 %v2345_v2 }
  0x3c   : > { %846 = vmatpush1.bf16.msra.mxu1 %v2244_v47 }
  0x3d   : > { %847 = vmatprep.subr.bf16.mxu1 %v2248_v48 }
  0x40   : > { %848 = vmatpush1.bf16.msra.mxu1 %v2250_v49 }
  0x41   : > { %849 = vmatprep.subr.bf16.mxu1 %v2254_v50 }
  0x42   : > { %1251 = vmatmul.mubr.bf16.gmra.mrb[12].mxu0 %v2269_v55 }
  0x43   : > { %1260 = vmatprep.mubr.bf16.mxu0 %v2345_v2 }
  0x44   : > { %850 = vmatpush1.bf16.msra.mxu1 %v2256_v52 }
  0x47   : > { %852 = vmatmul.mubr.bf16.vlgmr.msra.gmra.mrb[0].mxu1 %v2258_v53 }
  0x48   : > { %861 = vmatprep.mubr.bf16.mxu1 %v2262_v54 }
  0x4a   : > { %1261 = vmatmul.mubr.bf16.gmra.mrb[16].mxu0 %v2273_v58 }
  0x4b   : > { %1270 = vmatprep.mubr.bf16.mxu0 %v2345_v2 }
  0x4f   : > { %862 = vmatmul.mubr.bf16.gmra.mrb[4].mxu1 %v2264_v56 }
  0x50   : > { %871 = vmatprep.mubr.bf16.mxu1 %v2266_v57 }
  0x52   : > { %1271 = vmatmul.mubr.bf16.gmra.mrb[20].mxu0 %v2277_v61 }
  0x53   : > { %1280 = vmatprep.mubr.bf16.mxu0 %v2345_v2 }
  0x57   : > { %872 = vmatmul.mubr.bf16.gmra.mrb[8].mxu1 %v2268_v59 }
  0x58   : > { %881 = vmatprep.mubr.bf16.mxu1 %v2270_v60 }
  0x5a   : > { %1281 = vmatmul.mubr.bf16.gmra.mrb[24].mxu0 %v2281_v0 }
  0x5b   : > { %1290 = vmatprep.mubr.bf16.mxu0 %v2345_v2 }
  0x5f   : > { %882 = vmatmul.mubr.bf16.gmra.mrb[12].mxu1 %v2272_v62 }
  0x60   : > { %891 = vmatprep.mubr.bf16.mxu1 %v2274_v63 }
  0x62   : > { %1291 = vmatmul.mubr.bf16.gmra.mrb[28].mxu0 %v2285_v4 }
  0x63   : > { %1300 = vmatprep.mubr.bf16.mxu0 %v2345_v2 }
  0x67   : > { %892 = vmatmul.mubr.bf16.gmra.mrb[16].mxu1 %v2276_v1 }
  0x68   : > { %901 = vmatprep.mubr.bf16.mxu1 %v2278_v3 }
  0x6a   : > { %1301 = vmatmul.mubr.bf16.gmra.mrb[32].mxu0 %v2289_v7 }
  0x6b   : > { %1310 = vmatprep.mubr.bf16.mxu0 %v2345_v2 }
  0x6f   : > { %902 = vmatmul.mubr.bf16.gmra.mrb[20].mxu1 %v2280_v5 }
  0x70   : > { %911 = vmatprep.mubr.bf16.mxu1 %v2282_v6 }
  0x72   : > { %1311 = vmatmul.mubr.bf16.gmra.mrb[36].mxu0 %v2293_v10 }
  0x73   : > { %1320 = vmatprep.mubr.bf16.mxu0 %v2345_v2 }
  0x77   : > { %912 = vmatmul.mubr.bf16.gmra.mrb[24].mxu1 %v2284_v8 }
  0x78   : > { %921 = vmatprep.mubr.bf16.mxu1 %v2286_v9 }
  0x7a   : > { %1321 = vmatmul.mubr.bf16.gmra.mrb[40].mxu0 %v2297_v13 }
  0x7b   : > { %1330 = vmatprep.mubr.bf16.mxu0 %v2345_v2 }
  0x7f   : > { %922 = vmatmul.mubr.bf16.gmra.mrb[28].mxu1 %v2288_v11 }
  0x80   : > { %931 = vmatprep.mubr.bf16.mxu1 %v2290_v12 }
  0x82   : > { %1331 = vmatmul.mubr.bf16.gmra.mrb[44].mxu0 %v2301_v16 }
  0x83   : > { %1340 = vmatprep.mubr.bf16.mxu0 %v2345_v2 }
  0x87   : > { %932 = vmatmul.mubr.bf16.gmra.mrb[32].mxu1 %v2292_v14 }
  0x88   : > { %941 = vmatprep.mubr.bf16.mxu1 %v2294_v15 }
  0x8a   : > { %1341 = vmatmul.mubr.bf16.gmra.mrb[48].mxu0 %v2305_v19 }
  0x8b   : > { %1350 = vmatprep.mubr.bf16.mxu0 %v2345_v2 }
  0x8f   : > { %942 = vmatmul.mubr.bf16.gmra.mrb[36].mxu1 %v2296_v17 }
  0x90   : > { %951 = vmatprep.mubr.bf16.mxu1 %v2298_v18 }
  0x92   : > { %1351 = vmatmul.mubr.bf16.gmra.mrb[52].mxu0 %v2309_v22 }
  0x93   : > { %1360 = vmatprep.mubr.bf16.mxu0 %v2345_v2 }
  0x97   : > { %952 = vmatmul.mubr.bf16.gmra.mrb[40].mxu1 %v2300_v20 }
  0x98   : > { %961 = vmatprep.mubr.bf16.mxu1 %v2302_v21 }
  0x9a   : > { %1361 = vmatmul.mubr.bf16.gmra.mrb[56].mxu0 %v2313_v25 }
  0x9b   : > { %1370 = vmatprep.mubr.bf16.mxu0 %v2345_v2  ;;  %v1383_v2 = vlaneseq }
  0x9d   : > { %v1384_v42 = vshrl.u32 %v1383_v2, 7 }
  0x9f   : > { %962 = vmatmul.mubr.bf16.gmra.mrb[44].mxu1 %v2304_v23  ;;  %v1385_v43 = vsub.s32 0, %v1384_v42  ;;  %v1389_v46 = vsub.s32 1, %v1384_v42 }
  0xa0   : > { %971 = vmatprep.mubr.bf16.mxu1 %v2306_v24 }
  0xa1   : > { %v2625_v50 = vrot.slane %v1381_v45, %v1385_v43  ;;  %v2627_v52 = vrot.slane %v1381_v45, %v1389_v46 }
  0xa2   : > { %1371 = vmatmul.mubr.bf16.gmra.mrb[60].mxu0 %v2317_v28 }
  0xa7   : > { %972 = vmatmul.mubr.bf16.gmra.mrb[48].mxu1 %v2308_v26 }
  0xa8   : > { %981 = vmatprep.mubr.bf16.mxu1 %v2310_v27 }
  0xaf   : > { %982 = vmatmul.mubr.bf16.gmra.mrb[52].mxu1 %v2312_v29 }
  0xb0   : > { %991 = vmatprep.mubr.bf16.mxu1 %v2314_v30 }
  0xb7   : > { %992 = vmatmul.mubr.bf16.gmra.mrb[56].mxu1 %v2316_v31 }
  0xb8   : > { %1001 = vmatprep.mubr.bf16.mxu1 %v2318_v32 }
  0xbf   : > { %1002 = vmatmul.mubr.bf16.gmra.mrb[60].mxu1 %v2320_v33 }
  0xfd   : > { %v1222_v34 = vpop.f32.mrb[0].mxu0 }
  0xfe   : > { %v1224_v35 = vpop.f32.mrb[1].mxu0 }
  0xff   : > { %v1226_v36 = vpop.f32.mrb[2].mxu0 }
 0x100   : > { %v1228_v37 = vpop.f32.mrb[3].mxu0 }
 0x105   : > { %v1232_v38 = vpop.f32.mrb[4].mxu0 }
 0x106   : > { %v1234_v39 = vpop.f32.mrb[5].mxu0 }
 0x107   : > { %v1236_v40 = vpop.f32.mrb[6].mxu0 }
 0x108   : > { %v1238_v41 = vpop.f32.mrb[7].mxu0 }
 0x10d   : > { %v1242_v44 = vpop.f32.mrb[8].mxu0 }
 0x10e   : > { %v1244_v47 = vpop.f32.mrb[9].mxu0 }
 0x10f   : > { %v1246_v48 = vpop.f32.mrb[10].mxu0 }
 0x110   : > { %v1248_v49 = vpop.f32.mrb[11].mxu0 }
 0x115   : > { %v2630_v60 = vpop.f32.mrb[12].mxu0 }
 0x116   : > { %v2633_v63 = vpop.f32.mrb[13].mxu0 }
 0x117   : > { %v2636_v3 = vpop.f32.mrb[14].mxu0 }
 0x118   : > { %v2639_v6 = vpop.f32.mrb[15].mxu0 }
 0x11a   : > { %v853_v51 = vpop.f32.mrb[0].mxu1 }
 0x11b   : > { %v1223_v53 = vadd.f32 %v1222_v34, %v853_v51  ;;  %v855_v54 = vpop.f32.mrb[1].mxu1 }
 0x11c   : > { %v1225_v55 = vadd.f32 %v1224_v35, %v855_v54  ;;  %v857_v56 = vpop.f32.mrb[2].mxu1 }
 0x11d   : > { %v1393_v57 = vadd.f32 %v2625_v50, %v1223_v53  ;;  %v1227_v58 = vadd.f32 %v1226_v36, %v857_v56  ;;  %v859_v59 = vpop.f32.mrb[3].mxu1  ;;  %v2650_v19 = vpop.f32.mrb[16].mxu0 }
 0x11e   : > { %v1394_v61 = vadd.f32 %v2627_v52, %v1225_v55  ;;  %v1229_v62 = vadd.f32 %v1228_v37, %v859_v59  ;;  %v2654_v22 = vpop.f32.mrb[17].mxu0 }
 0x11f   : > { %v1457_v0 = vmax.f32 %v1393_v57, 0.0  ;;  %v1395_v1 = vadd.f32 %v2625_v50, %v1227_v58  ;;  %v2657_v25 = vpop.f32.mrb[18].mxu0 }
 0x120   : > { %v1458_v4 = vmax.f32 %v1394_v61, 0.0  ;;  %v1396_v5 = vadd.f32 %v2627_v52, %v1229_v62  ;;  %v2660_v28 = vpop.f32.mrb[19].mxu0 }
 0x121   : > { %v1459_v7 = vmax.f32 %v1395_v1, 0.0 }
 0x122   : > { %v2064_v8 = vpack.c.bf16 %v1458_v4, %v1457_v0  ;;  %v1460_v9 = vmax.f32 %v1396_v5, 0.0  ;;  %v863_v10 = vpop.f32.mrb[4].mxu1 }
 0x123   : > { %v1233_v11 = vadd.f32 %v1232_v38, %v863_v10  ;;  %v865_v12 = vpop.f32.mrb[5].mxu1 }
 0x124   : > { %1713 = vst [vmem:[%s2646_s29] sm:$0xff] %v2064_v8  ;;  %v2065_v13 = vpack.c.bf16 %v1460_v9, %v1459_v7  ;;  %v1235_v14 = vadd.f32 %v1234_v39, %v865_v12  ;;  %v867_v15 = vpop.f32.mrb[6].mxu1 }
 0x125   : > { %v1397_v16 = vadd.f32 %v2625_v50, %v1233_v11  ;;  %v1237_v17 = vadd.f32 %v1236_v40, %v867_v15  ;;  %v869_v18 = vpop.f32.mrb[7].mxu1  ;;  %v2664_v40 = vpop.f32.mrb[20].mxu0 }
 0x126   : > { %1714 = vst [vmem:[%s2646_s29 + $0x8] sm:$0xff] %v2065_v13  ;;  %v1398_v20 = vadd.f32 %v2627_v52, %v1235_v14  ;;  %v1239_v21 = vadd.f32 %v1238_v41, %v869_v18  ;;  %v2668_v43 = vpop.f32.mrb[21].mxu0 }
 0x127   : > { %v1461_v23 = vmax.f32 %v1397_v16, 0.0  ;;  %v1399_v24 = vadd.f32 %v2625_v50, %v1237_v17  ;;  %v2671_v46 = vpop.f32.mrb[22].mxu0 }
 0x128   : > { %v1462_v26 = vmax.f32 %v1398_v20, 0.0  ;;  %v1400_v27 = vadd.f32 %v2627_v52, %v1239_v21 }
 0x129   : > { %v1463_v29 = vmax.f32 %v1399_v24, 0.0 }
 0x12a   : > { %v2066_v30 = vpack.c.bf16 %v1462_v26, %v1461_v23  ;;  %v1464_v31 = vmax.f32 %v1400_v27, 0.0  ;;  %v873_v32 = vpop.f32.mrb[8].mxu1 }
 0x12b   : > { %v1243_v33 = vadd.f32 %v1242_v44, %v873_v32  ;;  %v875_v34 = vpop.f32.mrb[9].mxu1 }
 0x12c   : > { %1715 = vst [vmem:[%s2646_s29 + $0x10] sm:$0xff] %v2066_v30  ;;  %v2067_v35 = vpack.c.bf16 %v1464_v31, %v1463_v29  ;;  %v1245_v36 = vadd.f32 %v1244_v47, %v875_v34  ;;  %v877_v37 = vpop.f32.mrb[10].mxu1 }
 0x12d   : > { %v1401_v2 = vadd.f32 %v2625_v50, %v1243_v33  ;;  %v1247_v38 = vadd.f32 %v1246_v48, %v877_v37  ;;  %v879_v39 = vpop.f32.mrb[11].mxu1  ;;  %v2674_v48 = vpop.f32.mrb[23].mxu0 }
 0x12e   : > { %1716 = vst [vmem:[%s2646_s29 + $0x18] sm:$0xff] %v2067_v35  ;;  %v1402_v41 = vadd.f32 %v2627_v52, %v1245_v36  ;;  %v1249_v42 = vadd.f32 %v1248_v49, %v879_v39  ;;  %v2681_v4 = vpop.f32.mrb[24].mxu0 }
 0x12f   : > { %v1465_v45 = vmax.f32 %v1401_v2, 0.0  ;;  %v1403_v44 = vadd.f32 %v2625_v50, %v1247_v38 }
 0x130   : > { %v1466_v47 = vmax.f32 %v1402_v41, 0.0  ;;  %v1404_v51 = vadd.f32 %v2627_v52, %v1249_v42 }
 0x131   : > { %v1467_v53 = vmax.f32 %v1403_v44, 0.0 }
 0x132   : > { %v2068_v54 = vpack.c.bf16 %v1466_v47, %v1465_v45  ;;  %v1468_v55 = vmax.f32 %v1404_v51, 0.0  ;;  %v883_v56 = vpop.f32.mrb[12].mxu1 }
 0x133   : > { %v1253_v57 = vadd.f32 %v2630_v60, %v883_v56  ;;  %v885_v49 = vpop.f32.mrb[13].mxu1  ;;  %v2686_v60 = vpop.f32.mrb[25].mxu0 }
 0x134   : > { %1717 = vst [vmem:[%s2646_s29 + $0x20] sm:$0xff] %v2068_v54  ;;  %v2069_v58 = vpack.c.bf16 %v1468_v55, %v1467_v53  ;;  %v1255_v59 = vadd.f32 %v2633_v63, %v885_v49  ;;  %v887_v61 = vpop.f32.mrb[14].mxu1  ;;  %v2689_v63 = vpop.f32.mrb[26].mxu0 }
 0x135   : > { %v1405_v62 = vadd.f32 %v2625_v50, %v1253_v57  ;;  %v1257_v0 = vadd.f32 %v2636_v3, %v887_v61  ;;  %v889_v1 = vpop.f32.mrb[15].mxu1  ;;  %v2692_v3 = vpop.f32.mrb[27].mxu0 }
 0x136   : > { %1718 = vst [vmem:[%s2646_s29 + $0x28] sm:$0xff] %v2069_v58  ;;  %v1406_v5 = vadd.f32 %v2627_v52, %v1255_v59  ;;  %v1259_v7 = vadd.f32 %v2639_v6, %v889_v1  ;;  %v2699_v26 = vpop.f32.mrb[28].mxu0 }
 0x137   : > { %v1469_v8 = vmax.f32 %v1405_v62, 0.0  ;;  %v1407_v9 = vadd.f32 %v2625_v50, %v1257_v0 }
 0x138   : > { %v1470_v10 = vmax.f32 %v1406_v5, 0.0  ;;  %v1408_v11 = vadd.f32 %v2627_v52, %v1259_v7 }
 0x139   : > { %v1471_v12 = vmax.f32 %v1407_v9, 0.0 }
 0x13a   : > { %v2070_v13 = vpack.c.bf16 %v1470_v10, %v1469_v8  ;;  %v1472_v14 = vmax.f32 %v1408_v11, 0.0  ;;  %v893_v15 = vpop.f32.mrb[16].mxu1 }
 0x13b   : > { %v1263_v16 = vadd.f32 %v2650_v19, %v893_v15  ;;  %v895_v6 = vpop.f32.mrb[17].mxu1  ;;  %v2704_v19 = vpop.f32.mrb[29].mxu0 }
 0x13c   : > { %1719 = vst [vmem:[%s2646_s29 + $0x30] sm:$0xff] %v2070_v13  ;;  %v2071_v17 = vpack.c.bf16 %v1472_v14, %v1471_v12  ;;  %v1265_v18 = vadd.f32 %v2654_v22, %v895_v6  ;;  %v897_v20 = vpop.f32.mrb[18].mxu1  ;;  %v2707_v22 = vpop.f32.mrb[30].mxu0 }
 0x13d   : > { %v1409_v21 = vadd.f32 %v2625_v50, %v1263_v16  ;;  %v1267_v23 = vadd.f32 %v2657_v25, %v897_v20  ;;  %v899_v24 = vpop.f32.mrb[19].mxu1  ;;  %v2710_v25 = vpop.f32.mrb[31].mxu0 }
 0x13e   : > { %1720 = vst [vmem:[%s2646_s29 + $0x38] sm:$0xff] %v2071_v17  ;;  %v1410_v27 = vadd.f32 %v2627_v52, %v1265_v18  ;;  %v1269_v29 = vadd.f32 %v2660_v28, %v899_v24  ;;  %v2717_v47 = vpop.f32.mrb[32].mxu0 }
 0x13f   : > { %v1473_v30 = vmax.f32 %v1409_v21, 0.0  ;;  %v1411_v31 = vadd.f32 %v2625_v50, %v1267_v23 }
 0x140   : > { %v1474_v32 = vmax.f32 %v1410_v27, 0.0  ;;  %v1412_v33 = vadd.f32 %v2627_v52, %v1269_v29 }
 0x141   : > { %v1475_v34 = vmax.f32 %v1411_v31, 0.0 }
 0x142   : > { %v2072_v35 = vpack.c.bf16 %v1474_v32, %v1473_v30  ;;  %v1476_v36 = vmax.f32 %v1412_v33, 0.0  ;;  %v903_v37 = vpop.f32.mrb[20].mxu1 }
 0x143   : > { %v1273_v2 = vadd.f32 %v2664_v40, %v903_v37  ;;  %v905_v28 = vpop.f32.mrb[21].mxu1  ;;  %v2722_v40 = vpop.f32.mrb[33].mxu0 }
 0x144   : > { %1721 = vst [vmem:[%s2646_s29 + $0x40] sm:$0xff] %v2072_v35  ;;  %v2073_v38 = vpack.c.bf16 %v1476_v36, %v1475_v34  ;;  %v1275_v39 = vadd.f32 %v2668_v43, %v905_v28  ;;  %v907_v41 = vpop.f32.mrb[22].mxu1  ;;  %v2725_v43 = vpop.f32.mrb[34].mxu0 }
 0x145   : > { %v1413_v42 = vadd.f32 %v2625_v50, %v1273_v2  ;;  %v1277_v45 = vadd.f32 %v2671_v46, %v907_v41  ;;  %v909_v44 = vpop.f32.mrb[23].mxu1  ;;  %v2728_v46 = vpop.f32.mrb[35].mxu0 }
 0x146   : > { %1722 = vst [vmem:[%s2646_s29 + $0x48] sm:$0xff] %v2073_v38  ;;  %v1414_v51 = vadd.f32 %v2627_v52, %v1275_v39  ;;  %v1279_v53 = vadd.f32 %v2674_v48, %v909_v44  ;;  %v2735_v10 = vpop.f32.mrb[36].mxu0 }
 0x147   : > { %v1477_v54 = vmax.f32 %v1413_v42, 0.0  ;;  %v1415_v55 = vadd.f32 %v2625_v50, %v1277_v45 }
 0x148   : > { %v1478_v56 = vmax.f32 %v1414_v51, 0.0  ;;  %v1416_v57 = vadd.f32 %v2627_v52, %v1279_v53 }
 0x149   : > { %v1479_v49 = vmax.f32 %v1415_v55, 0.0 }
 0x14a   : > { %v2074_v58 = vpack.c.bf16 %v1478_v56, %v1477_v54  ;;  %v1480_v59 = vmax.f32 %v1416_v57, 0.0  ;;  %v913_v61 = vpop.f32.mrb[24].mxu1 }
 0x14b   : > { %v1283_v62 = vadd.f32 %v2681_v4, %v913_v61  ;;  %v915_v48 = vpop.f32.mrb[25].mxu1  ;;  %v2740_v4 = vpop.f32.mrb[37].mxu0 }
 0x14c   : > { %1723 = vst [vmem:[%s2646_s29 + $0x50] sm:$0xff] %v2074_v58  ;;  %v2075_v0 = vpack.c.bf16 %v1480_v59, %v1479_v49  ;;  %v1285_v1 = vadd.f32 %v2686_v60, %v915_v48  ;;  %v917_v5 = vpop.f32.mrb[26].mxu1  ;;  %v2743_v60 = vpop.f32.mrb[38].mxu0 }
 0x14d   : > { %v1417_v7 = vadd.f32 %v2625_v50, %v1283_v62  ;;  %v1287_v8 = vadd.f32 %v2689_v63, %v917_v5  ;;  %v919_v9 = vpop.f32.mrb[27].mxu1  ;;  %v2746_v63 = vpop.f32.mrb[39].mxu0 }
 0x14e   : > { %1724 = vst [vmem:[%s2646_s29 + $0x58] sm:$0xff] %v2075_v0  ;;  %v1418_v11 = vadd.f32 %v2627_v52, %v1285_v1  ;;  %v1289_v12 = vadd.f32 %v2692_v3, %v919_v9  ;;  %v2753_v32 = vpop.f32.mrb[40].mxu0 }
 0x14f   : > { %v1481_v13 = vmax.f32 %v1417_v7, 0.0  ;;  %v1419_v14 = vadd.f32 %v2625_v50, %v1287_v8 }
 0x150   : > { %v1482_v15 = vmax.f32 %v1418_v11, 0.0  ;;  %v1420_v16 = vadd.f32 %v2627_v52, %v1289_v12 }
 0x151   : > { %v1483_v6 = vmax.f32 %v1419_v14, 0.0 }
 0x152   : > { %v2076_v17 = vpack.c.bf16 %v1482_v15, %v1481_v13  ;;  %v1484_v18 = vmax.f32 %v1420_v16, 0.0  ;;  %v923_v20 = vpop.f32.mrb[28].mxu1 }
 0x153   : > { %v1293_v21 = vadd.f32 %v2699_v26, %v923_v20  ;;  %v925_v3 = vpop.f32.mrb[29].mxu1  ;;  %v2758_v26 = vpop.f32.mrb[41].mxu0 }
 0x154   : > { %1725 = vst [vmem:[%s2646_s29 + $0x60] sm:$0xff] %v2076_v17  ;;  %v2077_v23 = vpack.c.bf16 %v1484_v18, %v1483_v6  ;;  %v1295_v24 = vadd.f32 %v2704_v19, %v925_v3  ;;  %v927_v27 = vpop.f32.mrb[30].mxu1  ;;  %v2761_v19 = vpop.f32.mrb[42].mxu0 }
 0x155   : > { %v1421_v29 = vadd.f32 %v2625_v50, %v1293_v21  ;;  %v1297_v30 = vadd.f32 %v2707_v22, %v927_v27  ;;  %v929_v31 = vpop.f32.mrb[31].mxu1  ;;  %v2764_v22 = vpop.f32.mrb[43].mxu0 }
 0x156   : > { %1726 = vst [vmem:[%s2646_s29 + $0x68] sm:$0xff] %v2077_v23  ;;  %v1422_v33 = vadd.f32 %v2627_v52, %v1295_v24  ;;  %v1299_v34 = vadd.f32 %v2710_v25, %v929_v31  ;;  %v2771_v56 = vpop.f32.mrb[44].mxu0 }
 0x157   : > { %v1485_v35 = vmax.f32 %v1421_v29, 0.0  ;;  %v1423_v36 = vadd.f32 %v2625_v50, %v1297_v30 }
 0x158   : > { %v1486_v37 = vmax.f32 %v1422_v33, 0.0  ;;  %v1424_v2 = vadd.f32 %v2627_v52, %v1299_v34 }
 0x159   : > { %v1487_v28 = vmax.f32 %v1423_v36, 0.0 }
 0x15a   : > { %v2078_v38 = vpack.c.bf16 %v1486_v37, %v1485_v35  ;;  %v1488_v39 = vmax.f32 %v1424_v2, 0.0  ;;  %v933_v41 = vpop.f32.mrb[32].mxu1 }
 0x15b   : > { %v1303_v42 = vadd.f32 %v2717_v47, %v933_v41  ;;  %v935_v25 = vpop.f32.mrb[33].mxu1  ;;  %v2776_v47 = vpop.f32.mrb[45].mxu0 }
 0x15c   : > { %1727 = vst [vmem:[%s2646_s29 + $0x70] sm:$0xff] %v2078_v38  ;;  %v2079_v45 = vpack.c.bf16 %v1488_v39, %v1487_v28  ;;  %v1305_v44 = vadd.f32 %v2722_v40, %v935_v25  ;;  %v937_v51 = vpop.f32.mrb[34].mxu1  ;;  %v2779_v40 = vpop.f32.mrb[46].mxu0 }
 0x15d   : > { %v1425_v53 = vadd.f32 %v2625_v50, %v1303_v42  ;;  %v1307_v54 = vadd.f32 %v2725_v43, %v937_v51  ;;  %v939_v55 = vpop.f32.mrb[35].mxu1  ;;  %v2782_v43 = vpop.f32.mrb[47].mxu0 }
 0x15e   : > { %1728 = vst [vmem:[%s2646_s29 + $0x78] sm:$0xff] %v2079_v45  ;;  %v1426_v57 = vadd.f32 %v2627_v52, %v1305_v44  ;;  %v1309_v49 = vadd.f32 %v2728_v46, %v939_v55  ;;  %v2789_v15 = vpop.f32.mrb[48].mxu0 }
 0x15f   : > { %v1489_v58 = vmax.f32 %v1425_v53, 0.0  ;;  %v1427_v59 = vadd.f32 %v2625_v50, %v1307_v54 }
 0x160   : > { %v1490_v61 = vmax.f32 %v1426_v57, 0.0  ;;  %v1428_v62 = vadd.f32 %v2627_v52, %v1309_v49 }
 0x161   : > { %v1491_v48 = vmax.f32 %v1427_v59, 0.0 }
 0x162   : > { %v2080_v0 = vpack.c.bf16 %v1490_v61, %v1489_v58  ;;  %v1492_v1 = vmax.f32 %v1428_v62, 0.0  ;;  %v943_v5 = vpop.f32.mrb[36].mxu1 }
 0x163   : > { %v1313_v7 = vadd.f32 %v2735_v10, %v943_v5  ;;  %v945_v46 = vpop.f32.mrb[37].mxu1  ;;  %v2794_v10 = vpop.f32.mrb[49].mxu0 }
 0x164   : > { %1729 = vst [vmem:[%s2646_s29 + $0x80] sm:$0xff] %v2080_v0  ;;  %v2081_v8 = vpack.c.bf16 %v1492_v1, %v1491_v48  ;;  %v1315_v9 = vadd.f32 %v2740_v4, %v945_v46  ;;  %v947_v11 = vpop.f32.mrb[38].mxu1  ;;  %v2797_v4 = vpop.f32.mrb[50].mxu0 }
 0x165   : > { %v1429_v12 = vadd.f32 %v2625_v50, %v1313_v7  ;;  %v1317_v13 = vadd.f32 %v2743_v60, %v947_v11  ;;  %v949_v14 = vpop.f32.mrb[39].mxu1  ;;  %v2800_v60 = vpop.f32.mrb[51].mxu0 }
 0x166   : > { %1730 = vst [vmem:[%s2646_s29 + $0x88] sm:$0xff] %v2081_v8  ;;  %v1430_v16 = vadd.f32 %v2627_v52, %v1315_v9  ;;  %v1319_v6 = vadd.f32 %v2746_v63, %v949_v14  ;;  %v2807_v37 = vpop.f32.mrb[52].mxu0 }
 0x167   : > { %v1493_v17 = vmax.f32 %v1429_v12, 0.0  ;;  %v1431_v18 = vadd.f32 %v2625_v50, %v1317_v13 }
 0x168   : > { %v1494_v20 = vmax.f32 %v1430_v16, 0.0  ;;  %v1432_v21 = vadd.f32 %v2627_v52, %v1319_v6 }
 0x169   : > { %v1495_v3 = vmax.f32 %v1431_v18, 0.0 }
 0x16a   : > { %v2082_v23 = vpack.c.bf16 %v1494_v20, %v1493_v17  ;;  %v1496_v24 = vmax.f32 %v1432_v21, 0.0  ;;  %v953_v27 = vpop.f32.mrb[40].mxu1 }
 0x16b   : > { %v1323_v29 = vadd.f32 %v2753_v32, %v953_v27  ;;  %v955_v63 = vpop.f32.mrb[41].mxu1  ;;  %v2812_v32 = vpop.f32.mrb[53].mxu0 }
 0x16c   : > { %1731 = vst [vmem:[%s2646_s29 + $0x90] sm:$0xff] %v2082_v23  ;;  %v2083_v30 = vpack.c.bf16 %v1496_v24, %v1495_v3  ;;  %v1325_v31 = vadd.f32 %v2758_v26, %v955_v63  ;;  %v957_v33 = vpop.f32.mrb[42].mxu1  ;;  %v2815_v26 = vpop.f32.mrb[54].mxu0 }
 0x16d   : > { %v1433_v34 = vadd.f32 %v2625_v50, %v1323_v29  ;;  %v1327_v35 = vadd.f32 %v2761_v19, %v957_v33  ;;  %v959_v36 = vpop.f32.mrb[43].mxu1  ;;  %v2818_v19 = vpop.f32.mrb[55].mxu0 }
 0x16e   : > { %1732 = vst [vmem:[%s2646_s29 + $0x98] sm:$0xff] %v2083_v30  ;;  %v1434_v2 = vadd.f32 %v2627_v52, %v1325_v31  ;;  %v1329_v28 = vadd.f32 %v2764_v22, %v959_v36  ;;  %v1362_v61 = vpop.f32.mrb[56].mxu0 }
 0x16f   : > { %v1497_v38 = vmax.f32 %v1433_v34, 0.0  ;;  %v1435_v39 = vadd.f32 %v2625_v50, %v1327_v35  ;;  %v1364_v0 = vpop.f32.mrb[57].mxu0 }
 0x170   : > { %v1498_v41 = vmax.f32 %v1434_v2, 0.0  ;;  %v1436_v42 = vadd.f32 %v2627_v52, %v1329_v28  ;;  %v1366_v5 = vpop.f32.mrb[58].mxu0 }
 0x171   : > { %v1499_v25 = vmax.f32 %v1435_v39, 0.0  ;;  %v1368_v46 = vpop.f32.mrb[59].mxu0 }
 0x172   : > { %v2084_v45 = vpack.c.bf16 %v1498_v41, %v1497_v38  ;;  %v1500_v44 = vmax.f32 %v1436_v42, 0.0  ;;  %v963_v51 = vpop.f32.mrb[44].mxu1 }
 0x173   : > { %v1333_v53 = vadd.f32 %v2771_v56, %v963_v51  ;;  %v965_v22 = vpop.f32.mrb[45].mxu1 }
 0x174   : > { %1733 = vst [vmem:[%s2646_s29 + $0xa0] sm:$0xff] %v2084_v45  ;;  %v2085_v54 = vpack.c.bf16 %v1500_v44, %v1499_v25  ;;  %v1335_v55 = vadd.f32 %v2776_v47, %v965_v22  ;;  %v967_v57 = vpop.f32.mrb[46].mxu1 }
 0x175   : > { %v1437_v49 = vadd.f32 %v2625_v50, %v1333_v53  ;;  %v1337_v58 = vadd.f32 %v2779_v40, %v967_v57  ;;  %v969_v59 = vpop.f32.mrb[47].mxu1  ;;  %v1372_v20 = vpop.f32.mrb[60].mxu0 }
 0x176   : > { %1734 = vst [vmem:[%s2646_s29 + $0xa8] sm:$0xff] %v2085_v54  ;;  %v1438_v62 = vadd.f32 %v2627_v52, %v1335_v55  ;;  %v1339_v48 = vadd.f32 %v2782_v43, %v969_v59  ;;  %v1374_v23 = vpop.f32.mrb[61].mxu0 }
 0x177   : > { %v1501_v56 = vmax.f32 %v1437_v49, 0.0  ;;  %v1439_v1 = vadd.f32 %v2625_v50, %v1337_v58  ;;  %v1376_v27 = vpop.f32.mrb[62].mxu0 }
 0x178   : > { %v1502_v7 = vmax.f32 %v1438_v62, 0.0  ;;  %v1440_v47 = vadd.f32 %v2627_v52, %v1339_v48  ;;  %v1378_v63 = vpop.f32.mrb[63].mxu0 }
 0x179   : > { %v1503_v8 = vmax.f32 %v1439_v1, 0.0 }
 0x17a   : > { %v2086_v40 = vpack.c.bf16 %v1502_v7, %v1501_v56  ;;  %v1504_v9 = vmax.f32 %v1440_v47, 0.0  ;;  %v973_v11 = vpop.f32.mrb[48].mxu1 }
 0x17b   : > { %v1343_v12 = vadd.f32 %v2789_v15, %v973_v11  ;;  %v975_v13 = vpop.f32.mrb[49].mxu1 }
 0x17c   : > { %1735 = vst [vmem:[%s2646_s29 + $0xb0] sm:$0xff] %v2086_v40  ;;  %v2087_v14 = vpack.c.bf16 %v1504_v9, %v1503_v8  ;;  %v1345_v43 = vadd.f32 %v2794_v10, %v975_v13  ;;  %v977_v16 = vpop.f32.mrb[50].mxu1 }
 0x17d   : > { %v1441_v6 = vadd.f32 %v2625_v50, %v1343_v12  ;;  %v1347_v17 = vadd.f32 %v2797_v4, %v977_v16  ;;  %v979_v18 = vpop.f32.mrb[51].mxu1 }
 0x17e   : > { %1736 = vst [vmem:[%s2646_s29 + $0xb8] sm:$0xff] %v2087_v14  ;;  %v1442_v21 = vadd.f32 %v2627_v52, %v1345_v43  ;;  %v1349_v3 = vadd.f32 %v2800_v60, %v979_v18 }
 0x17f   : > { %v1505_v15 = vmax.f32 %v1441_v6, 0.0  ;;  %v1443_v24 = vadd.f32 %v2625_v50, %v1347_v17 }
 0x180   : > { %v1506_v29 = vmax.f32 %v1442_v21, 0.0  ;;  %v1444_v10 = vadd.f32 %v2627_v52, %v1349_v3 }
 0x181   : > { %v1507_v30 = vmax.f32 %v1443_v24, 0.0 }
 0x182   : > { %v2088_v4 = vpack.c.bf16 %v1506_v29, %v1505_v15  ;;  %v1508_v31 = vmax.f32 %v1444_v10, 0.0  ;;  %v983_v33 = vpop.f32.mrb[52].mxu1 }
 0x183   : > { %v1353_v34 = vadd.f32 %v2807_v37, %v983_v33  ;;  %v985_v35 = vpop.f32.mrb[53].mxu1 }
 0x184   : > { %1737 = vst [vmem:[%s2646_s29 + $0xc0] sm:$0xff] %v2088_v4  ;;  %v2089_v36 = vpack.c.bf16 %v1508_v31, %v1507_v30  ;;  %v1355_v60 = vadd.f32 %v2812_v32, %v985_v35  ;;  %v987_v2 = vpop.f32.mrb[54].mxu1 }
 0x185   : > { %v1445_v28 = vadd.f32 %v2625_v50, %v1353_v34  ;;  %v1357_v38 = vadd.f32 %v2815_v26, %v987_v2  ;;  %v989_v39 = vpop.f32.mrb[55].mxu1 }
 0x186   : > { %1738 = vst [vmem:[%s2646_s29 + $0xc8] sm:$0xff] %v2089_v36  ;;  %v1446_v41 = vadd.f32 %v2627_v52, %v1355_v60  ;;  %v1359_v42 = vadd.f32 %v2818_v19, %v989_v39 }
 0x187   : > { %v1509_v25 = vmax.f32 %v1445_v28, 0.0  ;;  %v1447_v37 = vadd.f32 %v2625_v50, %v1357_v38 }
 0x188   : > { %v1510_v45 = vmax.f32 %v1446_v41, 0.0  ;;  %v1448_v44 = vadd.f32 %v2627_v52, %v1359_v42 }
 0x189   : > { %v1511_v32 = vmax.f32 %v1447_v37, 0.0 }
 0x18a   : > { %v2090_v51 = vpack.c.bf16 %v1510_v45, %v1509_v25  ;;  %v1512_v53 = vmax.f32 %v1448_v44, 0.0  ;;  %v993_v22 = vpop.f32.mrb[56].mxu1 }
 0x18b   : > { %v1363_v54 = vadd.f32 %v1362_v61, %v993_v22  ;;  %v995_v55 = vpop.f32.mrb[57].mxu1 }
 0x18c   : > { %1739 = vst [vmem:[%s2646_s29 + $0xd0] sm:$0xff] %v2090_v51  ;;  %v2091_v26 = vpack.c.bf16 %v1512_v53, %v1511_v32  ;;  %v1365_v57 = vadd.f32 %v1364_v0, %v995_v55  ;;  %v997_v49 = vpop.f32.mrb[58].mxu1 }
 0x18d   : > { %v1449_v58 = vadd.f32 %v2625_v50, %v1363_v54  ;;  %v1367_v19 = vadd.f32 %v1366_v5, %v997_v49  ;;  %v999_v59 = vpop.f32.mrb[59].mxu1 }
 0x18e   : > { %1740 = vst [vmem:[%s2646_s29 + $0xd8] sm:$0xff] %v2091_v26  ;;  %v1450_v62 = vadd.f32 %v2627_v52, %v1365_v57  ;;  %v1369_v48 = vadd.f32 %v1368_v46, %v999_v59 }
 0x18f   : > { %v1513_v56 = vmax.f32 %v1449_v58, 0.0  ;;  %v1451_v1 = vadd.f32 %v2625_v50, %v1367_v19 }
 0x190   : > { %v1514_v7 = vmax.f32 %v1450_v62, 0.0  ;;  %v1452_v61 = vadd.f32 %v2627_v52, %v1369_v48 }
 0x191   : > { %v1515_v47 = vmax.f32 %v1451_v1, 0.0 }
 0x192   : > { %v2092_v8 = vpack.c.bf16 %v1514_v7, %v1513_v56  ;;  %v1516_v0 = vmax.f32 %v1452_v61, 0.0  ;;  %v1003_v40 = vpop.f32.mrb[60].mxu1 }
 0x193   : > { %v1373_v9 = vadd.f32 %v1372_v20, %v1003_v40  ;;  %v1005_v11 = vpop.f32.mrb[61].mxu1 }
 0x194   : > { %1741 = vst [vmem:[%s2646_s29 + $0xe0] sm:$0xff] %v2092_v8  ;;  %v2093_v5 = vpack.c.bf16 %v1516_v0, %v1515_v47  ;;  %v1375_v12 = vadd.f32 %v1374_v23, %v1005_v11  ;;  %v1007_v13 = vpop.f32.mrb[62].mxu1 }
 0x195   : > { %v1453_v46 = vadd.f32 %v2625_v50, %v1373_v9  ;;  %v1377_v14 = vadd.f32 %v1376_v27, %v1007_v13  ;;  %v1009_v43 = vpop.f32.mrb[63].mxu1 }
 0x196   : > { %1742 = vst [vmem:[%s2646_s29 + $0xe8] sm:$0xff] %v2093_v5  ;;  %v1454_v16 = vadd.f32 %v2627_v52, %v1375_v12  ;;  %v1379_v6 = vadd.f32 %v1378_v63, %v1009_v43 }
 0x197   : > { %v1517_v17 = vmax.f32 %v1453_v46, 0.0  ;;  %v1455_v18 = vadd.f32 %v2625_v50, %v1377_v14 }
 0x198   : > { %v1518_v21 = vmax.f32 %v1454_v16, 0.0  ;;  %v1456_v20 = vadd.f32 %v2627_v52, %v1379_v6 }
 0x199   : > { %v1519_v3 = vmax.f32 %v1455_v18, 0.0 }
 0x19a   : > { %v2094_v15 = vpack.c.bf16 %v1518_v21, %v1517_v17  ;;  %v1520_v24 = vmax.f32 %v1456_v20, 0.0 }
 0x19c   : > { %1743 = vst [vmem:[%s2646_s29 + $0xf0] sm:$0xff] %v2094_v15  ;;  %v2095_v23 = vpack.c.bf16 %v1520_v24, %v1519_v3 }
 0x19e   : > { %1744 = vst [vmem:[%s2646_s29 + $0xf8] sm:$0xff] %v2095_v23 }
 0x19f PF: > { %s15_s20 = sadd.s32 1, %s2343_s20   ;;  %s2879_s18 = smov %s2339_s19 }
 0x1a0   : > { %p12_p5 = scmp.ge.s32.totalorder %s15_s20, 4   ;;  %s2880_s19 = smov %s2882_s21 }
 0x1a2   :  { %14 = sbr.rel (!%p12_p5) target bundleno = 2 (0x2), region = 82 }

// kernel: deeplab_head_forward.7
= control target key start
LH: loop header
LB: loop body
LE: loop exit
PB: predicated region body
PF: predicated region fallthrough
CT: control target
= control target key end

     0   :  { %s1865_s18 = smov 0   ;;  %s1867_s19 = smov 0   ;;  %s2225_s0 = inlined_call_operand.vmem [shape: bf16[2,256,256], index: 0, kind: input, shape index: {}]   ;;  %s2226_s1 = inlined_call_operand.vmem [shape: bf16[256,256], index: 1, kind: input, shape index: {}]   ;;  %s2227_s2 = inlined_call_operand.vmem [shape: f32[1,256], index: 2, kind: input, shape index: {}]   ;;  %s2228_s3 = inlined_call_operand.vmem [shape: bf16[256,128], index: 3, kind: input, shape index: {}]   ;;  %s2229_s4 = inlined_call_operand.vmem [shape: f32[1,128], index: 4, kind: input, shape index: {}]   ;;  %s2230_s5 = inlined_call_operand.vmem [shape: f32[2,256,128], index: 5, kind: output, shape index: {}]  }
   0x1   :  { %s1869_s20 = smov 0  }
   0x2 LB: > { %s34_s21 = sadd.s32 1, %s1829_s19  ;;  %p1473_p0 = scmp.ge.s32.totalorder %s1833_s20, 1  ;;  %s1833_s20 = sphi %s1869_s20, %s15_s20   ;;  %s1829_s19 = sphi %s1867_s19, %s2232_s19   ;;  %s1825_s18 = sphi %s1865_s18, %s2231_s18  }
   0x3   : > { %p36_p1 = scmp.ge.s32.totalorder %s34_s21, 2  ;;  %p239_p2 = scmp.lt.s32.totalorder %s1833_s20, 3 }
   0x5   : > { %s2234_s21 = smov (%p36_p1, %s34_s21), 0  ;;  %p240_p3 = pnand %p1473_p0, %p239_p2 }
   0x6   : > { %v1699_v0 = vld [vmem:[%s2226_s1 + $0x4] ss:$8 sps:$4 sm:$0xff] (!%p240_p3)   ;;  %v1701_v1 = vld [vmem:[%s2226_s1] ss:$8 sps:$4 sm:$0xff] (!%p240_p3)   ;;  %v1702_v2 = vld [vmem:[%s2226_s1 + $0x14] ss:$8 sps:$4 sm:$0xff] (!%p240_p3)  }
   0x7   : > { %243 = sbr.rel (%p240_p3) target bundleno = 633 (0x279), region = 40  ;;  %720 = vmatprep.subr.bf16.mxu0 (!%p240_p3), %v1699_v0  ;;  %v1704_v3 = vld [vmem:[%s2226_s1 + $0x10] ss:$8 sps:$4 sm:$0xff] (!%p240_p3)   ;;  %v1705_v4 = vld [vmem:[%s2226_s1 + $0x24] ss:$8 sps:$4 sm:$0xff] (!%p240_p3)   ;;  %p289_p4 = scmp.lt.s32.totalorder (!%p240_p3), %s1825_s18, 1 }
   0x8   : > { %721 = vmatpush1.bf16.msra.mxu0 (!%p240_p3), %v1701_v1  ;;  %v1707_v5 = vld [vmem:[%s2226_s1 + $0x20] ss:$8 sps:$4 sm:$0xff] (!%p240_p3)   ;;  %v1708_v6 = vld [vmem:[%s2226_s1 + $0x34] ss:$8 sps:$4 sm:$0xff] (!%p240_p3)   ;;  %v1710_v7 = vld [vmem:[%s2226_s1 + $0x30] ss:$8 sps:$4 sm:$0xff] (!%p240_p3)  }
   0x9   : > { %722 = vmatprep.subr.bf16.mxu0 (!%p240_p3), %v1702_v2  ;;  %v1711_v8 = vld [vmem:[%s2226_s1 + $0x44] ss:$8 sps:$4 sm:$0xff] (!%p240_p3)   ;;  %v1713_v9 = vld [vmem:[%s2226_s1 + $0x40] ss:$8 sps:$4 sm:$0xff] (!%p240_p3)   ;;  %v1714_v10 = vld [vmem:[%s2226_s1 + $0x54] ss:$8 sps:$4 sm:$0xff] (!%p240_p3)  }
   0xa   : > { %v1716_v11 = vld [vmem:[%s2226_s1 + $0x50] ss:$8 sps:$4 sm:$0xff] (!%p240_p3)   ;;  %v1717_v12 = vld [vmem:[%s2226_s1 + $0x64] ss:$8 sps:$4 sm:$0xff] (!%p240_p3)   ;;  %v1719_v14 = vld [vmem:[%s2226_s1 + $0x60] ss:$8 sps:$4 sm:$0xff] (!%p240_p3)  }
   0xb   : > { %v1720_v15 = vld [vmem:[%s2226_s1 + $0x74] ss:$8 sps:$4 sm:$0xff] (!%p240_p3)   ;;  %v1722_v16 = vld [vmem:[%s2226_s1 + $0x70] ss:$8 sps:$4 sm:$0xff] (!%p240_p3)   ;;  %v1723_v17 = vld [vmem:[%s2226_s1 + $0x84] ss:$8 sps:$4 sm:$0xff] (!%p240_p3)  }
   0xc   : > { %723 = vmatpush1.bf16.msra.mxu0 (!%p240_p3), %v1704_v3  ;;  %v1725_v18 = vld [vmem:[%s2226_s1 + $0x80] ss:$8 sps:$4 sm:$0xff] (!%p240_p3)   ;;  %v1726_v19 = vld [vmem:[%s2226_s1 + $0x94] ss:$8 sps:$4 sm:$0xff] (!%p240_p3)   ;;  %v1728_v20 = vld [vmem:[%s2226_s1 + $0x90] ss:$8 sps:$4 sm:$0xff] (!%p240_p3)  }
   0xd   : > { %724 = vmatprep.subr.bf16.mxu0 (!%p240_p3), %v1705_v4  ;;  %v1729_v21 = vld [vmem:[%s2226_s1 + $0xa4] ss:$8 sps:$4 sm:$0xff] (!%p240_p3)   ;;  %v1731_v22 = vld [vmem:[%s2226_s1 + $0xa0] ss:$8 sps:$4 sm:$0xff] (!%p240_p3)   ;;  %v1732_v23 = vld [vmem:[%s2226_s1 + $0xb4] ss:$8 sps:$4 sm:$0xff] (!%p240_p3)  }
   0xe   : > { %s2236_s18 = smov (!%p289_p4, %s1825_s18), 1  ;;  %v1734_v24 = vld [vmem:[%s2226_s1 + $0xb0] ss:$8 sps:$4 sm:$0xff]   ;;  %v1735_v25 = vld [vmem:[%s2226_s1 + $0xc4] ss:$8 sps:$4 sm:$0xff]  }
   0xf   : > { %s1561_s23 = sshll.u32 %s2236_s18, 8  ;;  %v1737_v26 = vld [vmem:[%s2226_s1 + $0xc0] ss:$8 sps:$4 sm:$0xff]   ;;  %v1738_v27 = vld [vmem:[%s2226_s1 + $0xd4] ss:$8 sps:$4 sm:$0xff]  }
  0x10   : > { %725 = vmatpush1.bf16.msra.mxu0 %v1707_v5  ;;  %s1927_s28 = scalar_lea.vmem %s2225_s0, %s1561_s23  ;;  %v1740_v28 = vld [vmem:[%s2226_s1 + $0xd0] ss:$8 sps:$4 sm:$0xff]   ;;  %v1741_v29 = vld [vmem:[%s2226_s1 + $0xe4] ss:$8 sps:$4 sm:$0xff]   ;;  %v1743_v30 = vld [vmem:[%s2226_s1 + $0xe0] ss:$8 sps:$4 sm:$0xff]   ;;  %s2150_s30 = scalar_lea.vmem %s2230_s5, %s1561_s23 }
  0x11   : > { %726 = vmatprep.subr.bf16.mxu0 %v1708_v6  ;;  %v1749_v13 = vld [vmem:[%s1927_s28 + $0x4] ss:$8 sps:$4 sm:$0xff]   ;;  %v1744_v31 = vld [vmem:[%s2226_s1 + $0xf4] ss:$8 sps:$4 sm:$0xff]   ;;  %v1746_v35 = vld [vmem:[%s2226_s1 + $0xf0] ss:$8 sps:$4 sm:$0xff]  }
  0x12   : > { %752 = vmatprep.mubr.bf16.mxu0 %v1749_v13  ;;  %v1795_v32 = vld [vmem:[%s2228_s3 + $0x40] sm:$0xff]   ;;  %v1797_v34 = vld [vmem:[%s2228_s3 + $0x48] sm:$0xff]   ;;  %v1799_v38 = vld [vmem:[%s2228_s3 + $0x50] sm:$0xff]  }
  0x13   : > { %v1796_v33 = vld [vmem:[%s2228_s3] sm:$0xff]   ;;  %1563 = vmatprep.subr.bf16.mxu1 %v1795_v32  ;;  %v1798_v36 = vld [vmem:[%s2228_s3 + $0x8] sm:$0xff]   ;;  %v1750_v39 = vld [vmem:[%s1927_s28 + $0x14] ss:$8 sps:$4 sm:$0xff]  }
  0x14   : > { %727 = vmatpush1.bf16.msra.mxu0 %v1710_v7  ;;  %1564 = vmatpush3.bf16.msra.mxu1 %v1796_v33  ;;  %v1747_v37 = vld [vmem:[%s1927_s28] ss:$8 sps:$4 sm:$0xff]   ;;  %v1800_v40 = vld [vmem:[%s2228_s3 + $0x10] sm:$0xff]   ;;  %v1801_v41 = vld [vmem:[%s2228_s3 + $0x58] sm:$0xff]  }
  0x15   : > { %728 = vmatprep.subr.bf16.mxu0 %v1711_v8  ;;  %1565 = vmatprep.subr.bf16.mxu1 %v1797_v34  ;;  %v1802_v42 = vld [vmem:[%s2228_s3 + $0x18] sm:$0xff]   ;;  %v1803_v44 = vld [vmem:[%s2228_s3 + $0x60] sm:$0xff]   ;;  %v1805_v47 = vld [vmem:[%s2228_s3 + $0x68] sm:$0xff]  }
  0x16   : > { %v1752_v43 = vld [vmem:[%s1927_s28 + $0x10] ss:$8 sps:$4 sm:$0xff]   ;;  %v1753_v45 = vld [vmem:[%s1927_s28 + $0x24] ss:$8 sps:$4 sm:$0xff]   ;;  %v1755_v48 = vld [vmem:[%s1927_s28 + $0x20] ss:$8 sps:$4 sm:$0xff]  }
  0x17   : > { %v1804_v46 = vld [vmem:[%s2228_s3 + $0x20] sm:$0xff]   ;;  %v1756_v49 = vld [vmem:[%s1927_s28 + $0x34] ss:$8 sps:$4 sm:$0xff]   ;;  %v1758_v50 = vld [vmem:[%s1927_s28 + $0x30] ss:$8 sps:$4 sm:$0xff]  }
  0x18   : > { %729 = vmatpush1.bf16.msra.mxu0 %v1713_v9  ;;  %1566 = vmatpush3.bf16.msra.mxu1 %v1798_v36  ;;  %v1759_v51 = vld [vmem:[%s1927_s28 + $0x44] ss:$8 sps:$4 sm:$0xff]   ;;  %v1761_v52 = vld [vmem:[%s1927_s28 + $0x40] ss:$8 sps:$4 sm:$0xff]   ;;  %v1762_v53 = vld [vmem:[%s1927_s28 + $0x54] ss:$8 sps:$4 sm:$0xff]  }
  0x19   : > { %730 = vmatprep.subr.bf16.mxu0 %v1714_v10  ;;  %1567 = vmatprep.subr.bf16.mxu1 %v1799_v38  ;;  %v1764_v54 = vld [vmem:[%s1927_s28 + $0x50] ss:$8 sps:$4 sm:$0xff]   ;;  %v1765_v55 = vld [vmem:[%s1927_s28 + $0x64] ss:$8 sps:$4 sm:$0xff]   ;;  %v1767_v56 = vld [vmem:[%s1927_s28 + $0x60] ss:$8 sps:$4 sm:$0xff]  }
  0x1a   : > { %v1768_v57 = vld [vmem:[%s1927_s28 + $0x74] ss:$8 sps:$4 sm:$0xff]   ;;  %v1770_v58 = vld [vmem:[%s1927_s28 + $0x70] ss:$8 sps:$4 sm:$0xff]   ;;  %v1771_v59 = vld [vmem:[%s1927_s28 + $0x84] ss:$8 sps:$4 sm:$0xff]  }
  0x1b   : > { %v1773_v60 = vld [vmem:[%s1927_s28 + $0x80] ss:$8 sps:$4 sm:$0xff]   ;;  %v1774_v61 = vld [vmem:[%s1927_s28 + $0x94] ss:$8 sps:$4 sm:$0xff]   ;;  %v1776_v62 = vld [vmem:[%s1927_s28 + $0x90] ss:$8 sps:$4 sm:$0xff]  }
  0x1c   : > { %731 = vmatpush1.bf16.msra.mxu0 %v1716_v11  ;;  %1568 = vmatpush3.bf16.msra.mxu1 %v1800_v40  ;;  %v1777_v63 = vld [vmem:[%s1927_s28 + $0xa4] ss:$8 sps:$4 sm:$0xff]   ;;  %v1779_v0 = vld [vmem:[%s1927_s28 + $0xa0] ss:$8 sps:$4 sm:$0xff]   ;;  %v1780_v1 = vld [vmem:[%s1927_s28 + $0xb4] ss:$8 sps:$4 sm:$0xff]  }
  0x1d   : > { %732 = vmatprep.subr.bf16.mxu0 %v1717_v12  ;;  %1569 = vmatprep.subr.bf16.mxu1 %v1801_v41  ;;  %v1806_v2 = vld [vmem:[%s2228_s3 + $0x28] sm:$0xff]   ;;  %v1782_v3 = vld [vmem:[%s1927_s28 + $0xb0] ss:$8 sps:$4 sm:$0xff]   ;;  %v1786_v10 = vld [vmem:[%s1927_s28 + $0xd4] ss:$8 sps:$4 sm:$0xff]  }
  0x1e   : > { %v1807_v4 = vld [vmem:[%s2228_s3 + $0x70] sm:$0xff]   ;;  %v1783_v5 = vld [vmem:[%s1927_s28 + $0xc4] ss:$8 sps:$4 sm:$0xff]   ;;  %v1809_v7 = vld [vmem:[%s2228_s3 + $0x78] sm:$0xff]  }
  0x1f   : > { %v1808_v6 = vld [vmem:[%s2228_s3 + $0x30] sm:$0xff]   ;;  %v1810_v8 = vld [vmem:[%s2228_s3 + $0x38] sm:$0xff]   ;;  %v1785_v9 = vld [vmem:[%s1927_s28 + $0xc0] ss:$8 sps:$4 sm:$0xff]  }
  0x20   : > { %733 = vmatpush1.bf16.msra.mxu0 %v1719_v14  ;;  %1570 = vmatpush3.bf16.msra.mxu1 %v1802_v42  ;;  %v1788_v11 = vld [vmem:[%s1927_s28 + $0xd0] ss:$8 sps:$4 sm:$0xff]   ;;  %v1789_v12 = vld [vmem:[%s1927_s28 + $0xe4] ss:$8 sps:$4 sm:$0xff]   ;;  %v1791_v13 = vld [vmem:[%s1927_s28 + $0xe0] ss:$8 sps:$4 sm:$0xff]  }
  0x21   : > { %734 = vmatprep.subr.bf16.mxu0 %v1720_v15  ;;  %1571 = vmatprep.subr.bf16.mxu1 %v1803_v44  ;;  %v1792_v14 = vld [vmem:[%s1927_s28 + $0xf4] ss:$8 sps:$4 sm:$0xff]   ;;  %v1794_v15 = vld [vmem:[%s1927_s28 + $0xf0] ss:$8 sps:$4 sm:$0xff]  }
  0x24   : > { %735 = vmatpush1.bf16.msra.mxu0 %v1722_v16  ;;  %1572 = vmatpush3.bf16.msra.mxu1 %v1804_v46  ;;  %v390_v16 = vlaneseq }
  0x25   : > { %736 = vmatprep.subr.bf16.mxu0 %v1723_v17  ;;  %1573 = vmatprep.subr.bf16.mxu1 %v1805_v47 }
  0x26   : > { %v391_v17 = vshrl.u32 %v390_v16, 7 }
  0x28   : > { %737 = vmatpush1.bf16.msra.mxu0 %v1725_v18  ;;  %1574 = vmatpush3.bf16.msra.mxu1 %v1806_v2  ;;  %v392_v18 = vsub.s32 0, %v391_v17 }
  0x29   : > { %738 = vmatprep.subr.bf16.mxu0 %v1726_v19  ;;  %1575 = vmatprep.subr.bf16.mxu1 %v1807_v4  ;;  %v388_v19 = vld [vmem:[%s2227_s2] sm:$0x3] }
  0x2c   : > { %739 = vmatpush1.bf16.msra.mxu0 %v1728_v20  ;;  %1576 = vmatpush3.bf16.msra.mxu1 %v1808_v6  ;;  %v396_v20 = vsub.s32 1, %v391_v17 }
  0x2d   : > { %740 = vmatprep.subr.bf16.mxu0 %v1729_v21  ;;  %1577 = vmatprep.subr.bf16.mxu1 %v1809_v7  ;;  %v2072_v21 = vrot.slane %v388_v19, %v392_v18 }
  0x30   : > { %741 = vmatpush1.bf16.msra.mxu0 %v1731_v22  ;;  %1578 = vmatpush3.bf16.msra.mxu1 %v1810_v8  ;;  %v2074_v22 = vrot.slane %v388_v19, %v396_v20 }
  0x31   : > { %742 = vmatprep.subr.bf16.mxu0 %v1732_v23 }
  0x34   : > { %743 = vmatpush1.bf16.msra.mxu0 %v1734_v24 }
  0x35   : > { %744 = vmatprep.subr.bf16.mxu0 %v1735_v25 }
  0x38   : > { %745 = vmatpush1.bf16.msra.mxu0 %v1737_v26 }
  0x39   : > { %746 = vmatprep.subr.bf16.mxu0 %v1738_v27 }
  0x3c   : > { %747 = vmatpush1.bf16.msra.mxu0 %v1740_v28 }
  0x3d   : > { %748 = vmatprep.subr.bf16.mxu0 %v1741_v29 }
  0x40   : > { %749 = vmatpush1.bf16.msra.mxu0 %v1743_v30 }
  0x41   : > { %750 = vmatprep.subr.bf16.mxu0 %v1744_v31 }
  0x44   : > { %751 = vmatpush1.bf16.msra.mxu0 %v1746_v35 }
  0x47   : > { %753 = vmatmul.mubr.bf16.vlgmr.msra.gmra.mrb[0].mxu0 %v1747_v37 }
  0x48   : > { %762 = vmatprep.mubr.bf16.mxu0 %v1750_v39 }
  0x4f   : > { %763 = vmatmul.mubr.bf16.gmra.mrb[4].mxu0 %v1752_v43 }
  0x50   : > { %772 = vmatprep.mubr.bf16.mxu0 %v1753_v45 }
  0x57   : > { %773 = vmatmul.mubr.bf16.gmra.mrb[8].mxu0 %v1755_v48 }
  0x58   : > { %782 = vmatprep.mubr.bf16.mxu0 %v1756_v49 }
  0x5f   : > { %783 = vmatmul.mubr.bf16.gmra.mrb[12].mxu0 %v1758_v50 }
  0x60   : > { %792 = vmatprep.mubr.bf16.mxu0 %v1759_v51 }
  0x67   : > { %793 = vmatmul.mubr.bf16.gmra.mrb[16].mxu0 %v1761_v52 }
  0x68   : > { %802 = vmatprep.mubr.bf16.mxu0 %v1762_v53 }
  0x6f   : > { %803 = vmatmul.mubr.bf16.gmra.mrb[20].mxu0 %v1764_v54 }
  0x70   : > { %812 = vmatprep.mubr.bf16.mxu0 %v1765_v55 }
  0x77   : > { %813 = vmatmul.mubr.bf16.gmra.mrb[24].mxu0 %v1767_v56 }
  0x78   : > { %822 = vmatprep.mubr.bf16.mxu0 %v1768_v57 }
  0x7f   : > { %823 = vmatmul.mubr.bf16.gmra.mrb[28].mxu0 %v1770_v58 }
  0x80   : > { %832 = vmatprep.mubr.bf16.mxu0 %v1771_v59 }
  0x87   : > { %833 = vmatmul.mubr.bf16.gmra.mrb[32].mxu0 %v1773_v60 }
  0x88   : > { %842 = vmatprep.mubr.bf16.mxu0 %v1774_v61 }
  0x8f   : > { %843 = vmatmul.mubr.bf16.gmra.mrb[36].mxu0 %v1776_v62 }
  0x90   : > { %852 = vmatprep.mubr.bf16.mxu0 %v1777_v63 }
  0x97   : > { %853 = vmatmul.mubr.bf16.gmra.mrb[40].mxu0 %v1779_v0 }
  0x98   : > { %862 = vmatprep.mubr.bf16.mxu0 %v1780_v1 }
  0x9f   : > { %863 = vmatmul.mubr.bf16.gmra.mrb[44].mxu0 %v1782_v3 }
  0xa0   : > { %872 = vmatprep.mubr.bf16.mxu0 %v1783_v5 }
  0xa7   : > { %873 = vmatmul.mubr.bf16.gmra.mrb[48].mxu0 %v1785_v9 }
  0xa8   : > { %882 = vmatprep.mubr.bf16.mxu0 %v1786_v10 }
  0xaf   : > { %883 = vmatmul.mubr.bf16.gmra.mrb[52].mxu0 %v1788_v11 }
  0xb0   : > { %892 = vmatprep.mubr.bf16.mxu0 %v1789_v12 }
  0xb7   : > { %893 = vmatmul.mubr.bf16.gmra.mrb[56].mxu0 %v1791_v13 }
  0xb8   : > { %902 = vmatprep.mubr.bf16.mxu0 %v1792_v14 }
  0xbf   : > { %903 = vmatmul.mubr.bf16.gmra.mrb[60].mxu0 %v1794_v15 }
 0x11a   : > { %v754_v23 = vpop.f32.mrb[0].mxu0 }
 0x11b   : > { %v755_v24 = vadd.f32 %v754_v23, %v2072_v21  ;;  %v756_v25 = vpop.f32.mrb[1].mxu0 }
 0x11c   : > { %v757_v26 = vadd.f32 %v756_v25, %v2074_v22  ;;  %v758_v27 = vpop.f32.mrb[2].mxu0 }
 0x11d   : > { %v759_v28 = vadd.f32 %v758_v27, %v2072_v21  ;;  %v760_v29 = vpop.f32.mrb[3].mxu0  ;;  %v913_v31 = vmax.f32 %v755_v24, 0.0 }
 0x11e   : > { %v761_v30 = vadd.f32 %v760_v29, %v2074_v22  ;;  %v914_v33 = vmax.f32 %v757_v26, 0.0 }
 0x11f   : > { %v915_v32 = vmax.f32 %v759_v28, 0.0 }
 0x120   : > { %v916_v34 = vmax.f32 %v761_v30, 0.0 }
 0x121   : > { %v977_v35 = vpack.c.bf16 %v915_v32, %v913_v31 }
 0x122   : > { %v764_v36 = vpop.f32.mrb[4].mxu0  ;;  %v978_v37 = vpack.c.bf16 %v916_v34, %v914_v33 }
 0x123   : > { %v765_v38 = vadd.f32 %v764_v36, %v2072_v21  ;;  %v766_v39 = vpop.f32.mrb[5].mxu0 }
 0x124   : > { %v767_v40 = vadd.f32 %v766_v39, %v2074_v22  ;;  %v768_v41 = vpop.f32.mrb[6].mxu0  ;;  %1176 = vmatprep.mubr.bf16.mxu1 %v978_v37 }
 0x125   : > { %v769_v42 = vadd.f32 %v768_v41, %v2072_v21  ;;  %v770_v43 = vpop.f32.mrb[7].mxu0  ;;  %1177 = vmatmul.mubr.bf16.vlgmr.msra.gmra.mrb[0].mxu1 %v977_v35  ;;  %v917_v45 = vmax.f32 %v765_v38, 0.0 }
 0x126   : > { %v771_v44 = vadd.f32 %v770_v43, %v2074_v22  ;;  %v918_v47 = vmax.f32 %v767_v40, 0.0 }
 0x127   : > { %v919_v46 = vmax.f32 %v769_v42, 0.0 }
 0x128   : > { %v920_v48 = vmax.f32 %v771_v44, 0.0 }
 0x129   : > { %v979_v49 = vpack.c.bf16 %v919_v46, %v917_v45 }
 0x12a   : > { %v980_v50 = vpack.c.bf16 %v920_v48, %v918_v47  ;;  %v774_v51 = vpop.f32.mrb[8].mxu0 }
 0x12b   : > { %v775_v52 = vadd.f32 %v774_v51, %v2072_v21  ;;  %v776_v53 = vpop.f32.mrb[9].mxu0 }
 0x12c   : > { %v777_v54 = vadd.f32 %v776_v53, %v2074_v22  ;;  %v778_v55 = vpop.f32.mrb[10].mxu0  ;;  %1184 = vmatprep.mubr.bf16.mxu1 %v980_v50 }
 0x12d   : > { %v779_v56 = vadd.f32 %v778_v55, %v2072_v21  ;;  %v780_v57 = vpop.f32.mrb[11].mxu0  ;;  %1185 = vmatmul.mubr.bf16.gmra.mrb[4].mxu1 %v979_v49  ;;  %v921_v59 = vmax.f32 %v775_v52, 0.0 }
 0x12e   : > { %v781_v58 = vadd.f32 %v780_v57, %v2074_v22  ;;  %v922_v61 = vmax.f32 %v777_v54, 0.0 }
 0x12f   : > { %v923_v60 = vmax.f32 %v779_v56, 0.0 }
 0x130   : > { %v924_v62 = vmax.f32 %v781_v58, 0.0 }
 0x131   : > { %v981_v63 = vpack.c.bf16 %v923_v60, %v921_v59 }
 0x132   : > { %v982_v0 = vpack.c.bf16 %v924_v62, %v922_v61  ;;  %v784_v1 = vpop.f32.mrb[12].mxu0 }
 0x133   : > { %v785_v2 = vadd.f32 %v784_v1, %v2072_v21  ;;  %v786_v3 = vpop.f32.mrb[13].mxu0 }
 0x134   : > { %v787_v4 = vadd.f32 %v786_v3, %v2074_v22  ;;  %v788_v5 = vpop.f32.mrb[14].mxu0  ;;  %1192 = vmatprep.mubr.bf16.mxu1 %v982_v0 }
 0x135   : > { %v789_v6 = vadd.f32 %v788_v5, %v2072_v21  ;;  %v790_v7 = vpop.f32.mrb[15].mxu0  ;;  %1193 = vmatmul.mubr.bf16.gmra.mrb[8].mxu1 %v981_v63  ;;  %v925_v9 = vmax.f32 %v785_v2, 0.0 }
 0x136   : > { %v791_v8 = vadd.f32 %v790_v7, %v2074_v22  ;;  %v926_v11 = vmax.f32 %v787_v4, 0.0 }
 0x137   : > { %v927_v10 = vmax.f32 %v789_v6, 0.0 }
 0x138   : > { %v928_v12 = vmax.f32 %v791_v8, 0.0 }
 0x139   : > { %v983_v13 = vpack.c.bf16 %v927_v10, %v925_v9 }
 0x13a   : > { %v984_v14 = vpack.c.bf16 %v928_v12, %v926_v11  ;;  %v794_v15 = vpop.f32.mrb[16].mxu0 }
 0x13b   : > { %v795_v16 = vadd.f32 %v794_v15, %v2072_v21  ;;  %v796_v17 = vpop.f32.mrb[17].mxu0 }
 0x13c   : > { %v797_v18 = vadd.f32 %v796_v17, %v2074_v22  ;;  %v798_v19 = vpop.f32.mrb[18].mxu0  ;;  %1200 = vmatprep.mubr.bf16.mxu1 %v984_v14 }
 0x13d   : > { %v799_v20 = vadd.f32 %v798_v19, %v2072_v21  ;;  %v800_v23 = vpop.f32.mrb[19].mxu0  ;;  %1201 = vmatmul.mubr.bf16.gmra.mrb[12].mxu1 %v983_v13  ;;  %v929_v25 = vmax.f32 %v795_v16, 0.0 }
 0x13e   : > { %v801_v24 = vadd.f32 %v800_v23, %v2074_v22  ;;  %v930_v27 = vmax.f32 %v797_v18, 0.0 }
 0x13f   : > { %v931_v26 = vmax.f32 %v799_v20, 0.0 }
 0x140   : > { %v932_v28 = vmax.f32 %v801_v24, 0.0 }
 0x141   : > { %v985_v29 = vpack.c.bf16 %v931_v26, %v929_v25 }
 0x142   : > { %v986_v30 = vpack.c.bf16 %v932_v28, %v930_v27  ;;  %v804_v31 = vpop.f32.mrb[20].mxu0 }
 0x143   : > { %v805_v32 = vadd.f32 %v804_v31, %v2072_v21  ;;  %v806_v33 = vpop.f32.mrb[21].mxu0 }
 0x144   : > { %v807_v34 = vadd.f32 %v806_v33, %v2074_v22  ;;  %v808_v35 = vpop.f32.mrb[22].mxu0  ;;  %1208 = vmatprep.mubr.bf16.mxu1 %v986_v30 }
 0x145   : > { %v809_v36 = vadd.f32 %v808_v35, %v2072_v21  ;;  %v810_v37 = vpop.f32.mrb[23].mxu0  ;;  %1209 = vmatmul.mubr.bf16.gmra.mrb[16].mxu1 %v985_v29  ;;  %v933_v39 = vmax.f32 %v805_v32, 0.0 }
 0x146   : > { %v811_v38 = vadd.f32 %v810_v37, %v2074_v22  ;;  %v934_v41 = vmax.f32 %v807_v34, 0.0 }
 0x147   : > { %v935_v40 = vmax.f32 %v809_v36, 0.0 }
 0x148   : > { %v936_v42 = vmax.f32 %v811_v38, 0.0 }
 0x149   : > { %v987_v43 = vpack.c.bf16 %v935_v40, %v933_v39 }
 0x14a   : > { %v988_v44 = vpack.c.bf16 %v936_v42, %v934_v41  ;;  %v814_v45 = vpop.f32.mrb[24].mxu0 }
 0x14b   : > { %v815_v46 = vadd.f32 %v814_v45, %v2072_v21  ;;  %v816_v47 = vpop.f32.mrb[25].mxu0 }
 0x14c   : > { %v817_v48 = vadd.f32 %v816_v47, %v2074_v22  ;;  %v818_v49 = vpop.f32.mrb[26].mxu0  ;;  %1216 = vmatprep.mubr.bf16.mxu1 %v988_v44 }
 0x14d   : > { %v819_v50 = vadd.f32 %v818_v49, %v2072_v21  ;;  %v820_v51 = vpop.f32.mrb[27].mxu0  ;;  %1217 = vmatmul.mubr.bf16.gmra.mrb[20].mxu1 %v987_v43  ;;  %v937_v53 = vmax.f32 %v815_v46, 0.0 }
 0x14e   : > { %v821_v52 = vadd.f32 %v820_v51, %v2074_v22  ;;  %v938_v55 = vmax.f32 %v817_v48, 0.0 }
 0x14f   : > { %v939_v54 = vmax.f32 %v819_v50, 0.0 }
 0x150   : > { %v940_v56 = vmax.f32 %v821_v52, 0.0 }
 0x151   : > { %v989_v57 = vpack.c.bf16 %v939_v54, %v937_v53 }
 0x152   : > { %v990_v58 = vpack.c.bf16 %v940_v56, %v938_v55  ;;  %v824_v59 = vpop.f32.mrb[28].mxu0 }
 0x153   : > { %v825_v60 = vadd.f32 %v824_v59, %v2072_v21  ;;  %v826_v61 = vpop.f32.mrb[29].mxu0 }
 0x154   : > { %v827_v62 = vadd.f32 %v826_v61, %v2074_v22  ;;  %v828_v63 = vpop.f32.mrb[30].mxu0  ;;  %1224 = vmatprep.mubr.bf16.mxu1 %v990_v58 }
 0x155   : > { %v829_v0 = vadd.f32 %v828_v63, %v2072_v21  ;;  %v830_v1 = vpop.f32.mrb[31].mxu0  ;;  %1225 = vmatmul.mubr.bf16.gmra.mrb[24].mxu1 %v989_v57  ;;  %v941_v3 = vmax.f32 %v825_v60, 0.0 }
 0x156   : > { %v831_v2 = vadd.f32 %v830_v1, %v2074_v22  ;;  %v942_v5 = vmax.f32 %v827_v62, 0.0 }
 0x157   : > { %v943_v4 = vmax.f32 %v829_v0, 0.0 }
 0x158   : > { %v944_v6 = vmax.f32 %v831_v2, 0.0 }
 0x159   : > { %v991_v7 = vpack.c.bf16 %v943_v4, %v941_v3 }
 0x15a   : > { %v992_v8 = vpack.c.bf16 %v944_v6, %v942_v5  ;;  %v834_v9 = vpop.f32.mrb[32].mxu0 }
 0x15b   : > { %v835_v10 = vadd.f32 %v834_v9, %v2072_v21  ;;  %v836_v11 = vpop.f32.mrb[33].mxu0 }
 0x15c   : > { %v837_v12 = vadd.f32 %v836_v11, %v2074_v22  ;;  %v838_v13 = vpop.f32.mrb[34].mxu0  ;;  %1232 = vmatprep.mubr.bf16.mxu1 %v992_v8 }
 0x15d   : > { %v839_v14 = vadd.f32 %v838_v13, %v2072_v21  ;;  %v840_v15 = vpop.f32.mrb[35].mxu0  ;;  %1233 = vmatmul.mubr.bf16.gmra.mrb[28].mxu1 %v991_v7  ;;  %v945_v17 = vmax.f32 %v835_v10, 0.0 }
 0x15e   : > { %v841_v16 = vadd.f32 %v840_v15, %v2074_v22  ;;  %v946_v19 = vmax.f32 %v837_v12, 0.0 }
 0x15f   : > { %v947_v18 = vmax.f32 %v839_v14, 0.0 }
 0x160   : > { %v948_v20 = vmax.f32 %v841_v16, 0.0 }
 0x161   : > { %v993_v23 = vpack.c.bf16 %v947_v18, %v945_v17 }
 0x162   : > { %v994_v24 = vpack.c.bf16 %v948_v20, %v946_v19  ;;  %v844_v25 = vpop.f32.mrb[36].mxu0 }
 0x163   : > { %v845_v26 = vadd.f32 %v844_v25, %v2072_v21  ;;  %v846_v27 = vpop.f32.mrb[37].mxu0 }
 0x164   : > { %v847_v28 = vadd.f32 %v846_v27, %v2074_v22  ;;  %v848_v29 = vpop.f32.mrb[38].mxu0  ;;  %1240 = vmatprep.mubr.bf16.mxu1 %v994_v24 }
 0x165   : > { %v849_v30 = vadd.f32 %v848_v29, %v2072_v21  ;;  %v850_v31 = vpop.f32.mrb[39].mxu0  ;;  %1241 = vmatmul.mubr.bf16.gmra.mrb[32].mxu1 %v993_v23  ;;  %v949_v33 = vmax.f32 %v845_v26, 0.0 }
 0x166   : > { %v851_v32 = vadd.f32 %v850_v31, %v2074_v22  ;;  %v950_v35 = vmax.f32 %v847_v28, 0.0 }
 0x167   : > { %v951_v34 = vmax.f32 %v849_v30, 0.0 }
 0x168   : > { %v952_v36 = vmax.f32 %v851_v32, 0.0 }
 0x169   : > { %v995_v37 = vpack.c.bf16 %v951_v34, %v949_v33 }
 0x16a   : > { %v996_v38 = vpack.c.bf16 %v952_v36, %v950_v35  ;;  %v854_v39 = vpop.f32.mrb[40].mxu0 }
 0x16b   : > { %v855_v40 = vadd.f32 %v854_v39, %v2072_v21  ;;  %v856_v41 = vpop.f32.mrb[41].mxu0 }
 0x16c   : > { %v857_v42 = vadd.f32 %v856_v41, %v2074_v22  ;;  %v858_v43 = vpop.f32.mrb[42].mxu0  ;;  %1248 = vmatprep.mubr.bf16.mxu1 %v996_v38 }
 0x16d   : > { %v859_v44 = vadd.f32 %v858_v43, %v2072_v21  ;;  %v860_v45 = vpop.f32.mrb[43].mxu0  ;;  %1249 = vmatmul.mubr.bf16.gmra.mrb[36].mxu1 %v995_v37  ;;  %v953_v47 = vmax.f32 %v855_v40, 0.0 }
 0x16e   : > { %v861_v46 = vadd.f32 %v860_v45, %v2074_v22  ;;  %v954_v49 = vmax.f32 %v857_v42, 0.0 }
 0x16f   : > { %v955_v48 = vmax.f32 %v859_v44, 0.0 }
 0x170   : > { %v956_v50 = vmax.f32 %v861_v46, 0.0 }
 0x171   : > { %v997_v51 = vpack.c.bf16 %v955_v48, %v953_v47 }
 0x172   : > { %v998_v52 = vpack.c.bf16 %v956_v50, %v954_v49  ;;  %v864_v53 = vpop.f32.mrb[44].mxu0 }
 0x173   : > { %v865_v54 = vadd.f32 %v864_v53, %v2072_v21  ;;  %v866_v55 = vpop.f32.mrb[45].mxu0 }
 0x174   : > { %v867_v56 = vadd.f32 %v866_v55, %v2074_v22  ;;  %v868_v57 = vpop.f32.mrb[46].mxu0  ;;  %1256 = vmatprep.mubr.bf16.mxu1 %v998_v52 }
 0x175   : > { %v869_v58 = vadd.f32 %v868_v57, %v2072_v21  ;;  %v870_v59 = vpop.f32.mrb[47].mxu0  ;;  %1257 = vmatmul.mubr.bf16.gmra.mrb[40].mxu1 %v997_v51  ;;  %v957_v61 = vmax.f32 %v865_v54, 0.0 }
 0x176   : > { %v871_v60 = vadd.f32 %v870_v59, %v2074_v22  ;;  %v958_v63 = vmax.f32 %v867_v56, 0.0 }
 0x177   : > { %v959_v62 = vmax.f32 %v869_v58, 0.0 }
 0x178   : > { %v960_v0 = vmax.f32 %v871_v60, 0.0 }
 0x179   : > { %v999_v1 = vpack.c.bf16 %v959_v62, %v957_v61  ;;  %v2143_v62 = vld [vmem:[%s2229_s4] ss:$0 sm:$0xff] }
 0x17a   : > { %v1000_v2 = vpack.c.bf16 %v960_v0, %v958_v63  ;;  %v874_v3 = vpop.f32.mrb[48].mxu0 }
 0x17b   : > { %v875_v4 = vadd.f32 %v874_v3, %v2072_v21  ;;  %v876_v5 = vpop.f32.mrb[49].mxu0 }
 0x17c   : > { %v877_v6 = vadd.f32 %v876_v5, %v2074_v22  ;;  %v878_v7 = vpop.f32.mrb[50].mxu0  ;;  %1264 = vmatprep.mubr.bf16.mxu1 %v1000_v2 }
 0x17d   : > { %v879_v8 = vadd.f32 %v878_v7, %v2072_v21  ;;  %v880_v9 = vpop.f32.mrb[51].mxu0  ;;  %1265 = vmatmul.mubr.bf16.gmra.mrb[44].mxu1 %v999_v1  ;;  %v961_v11 = vmax.f32 %v875_v4, 0.0 }
 0x17e   : > { %v881_v10 = vadd.f32 %v880_v9, %v2074_v22  ;;  %v962_v13 = vmax.f32 %v877_v6, 0.0 }
 0x17f   : > { %v963_v12 = vmax.f32 %v879_v8, 0.0 }
 0x180   : > { %v964_v14 = vmax.f32 %v881_v10, 0.0 }
 0x181   : > { %v1001_v15 = vpack.c.bf16 %v963_v12, %v961_v11 }
 0x182   : > { %v1002_v16 = vpack.c.bf16 %v964_v14, %v962_v13  ;;  %v884_v17 = vpop.f32.mrb[52].mxu0 }
 0x183   : > { %v885_v18 = vadd.f32 %v884_v17, %v2072_v21  ;;  %v886_v19 = vpop.f32.mrb[53].mxu0 }
 0x184   : > { %v887_v20 = vadd.f32 %v886_v19, %v2074_v22  ;;  %v888_v23 = vpop.f32.mrb[54].mxu0  ;;  %1272 = vmatprep.mubr.bf16.mxu1 %v1002_v16 }
 0x185   : > { %v889_v24 = vadd.f32 %v888_v23, %v2072_v21  ;;  %v890_v25 = vpop.f32.mrb[55].mxu0  ;;  %1273 = vmatmul.mubr.bf16.gmra.mrb[48].mxu1 %v1001_v15  ;;  %v965_v27 = vmax.f32 %v885_v18, 0.0 }
 0x186   : > { %v891_v26 = vadd.f32 %v890_v25, %v2074_v22  ;;  %v966_v29 = vmax.f32 %v887_v20, 0.0 }
 0x187   : > { %v967_v28 = vmax.f32 %v889_v24, 0.0 }
 0x188   : > { %v968_v30 = vmax.f32 %v891_v26, 0.0 }
 0x189   : > { %v1003_v31 = vpack.c.bf16 %v967_v28, %v965_v27 }
 0x18a   : > { %v1004_v32 = vpack.c.bf16 %v968_v30, %v966_v29  ;;  %v894_v33 = vpop.f32.mrb[56].mxu0 }
 0x18b   : > { %v895_v34 = vadd.f32 %v894_v33, %v2072_v21  ;;  %v896_v35 = vpop.f32.mrb[57].mxu0 }
 0x18c   : > { %v897_v36 = vadd.f32 %v896_v35, %v2074_v22  ;;  %v898_v37 = vpop.f32.mrb[58].mxu0  ;;  %1280 = vmatprep.mubr.bf16.mxu1 %v1004_v32 }
 0x18d   : > { %v899_v38 = vadd.f32 %v898_v37, %v2072_v21  ;;  %v900_v39 = vpop.f32.mrb[59].mxu0  ;;  %1281 = vmatmul.mubr.bf16.gmra.mrb[52].mxu1 %v1003_v31  ;;  %v969_v41 = vmax.f32 %v895_v34, 0.0 }
 0x18e   : > { %v901_v40 = vadd.f32 %v900_v39, %v2074_v22  ;;  %v970_v43 = vmax.f32 %v897_v36, 0.0 }
 0x18f   : > { %v971_v42 = vmax.f32 %v899_v38, 0.0 }
 0x190   : > { %v972_v44 = vmax.f32 %v901_v40, 0.0 }
 0x191   : > { %v1005_v45 = vpack.c.bf16 %v971_v42, %v969_v41 }
 0x192   : > { %v1006_v46 = vpack.c.bf16 %v972_v44, %v970_v43  ;;  %v904_v47 = vpop.f32.mrb[60].mxu0 }
 0x193   : > { %v905_v48 = vadd.f32 %v904_v47, %v2072_v21  ;;  %v906_v49 = vpop.f32.mrb[61].mxu0 }
 0x194   : > { %v907_v50 = vadd.f32 %v906_v49, %v2074_v22  ;;  %v908_v51 = vpop.f32.mrb[62].mxu0  ;;  %1288 = vmatprep.mubr.bf16.mxu1 %v1006_v46 }
 0x195   : > { %v909_v52 = vadd.f32 %v908_v51, %v2072_v21  ;;  %v910_v53 = vpop.f32.mrb[63].mxu0  ;;  %1289 = vmatmul.mubr.bf16.gmra.mrb[56].mxu1 %v1005_v45  ;;  %v973_v55 = vmax.f32 %v905_v48, 0.0 }
 0x196   : > { %v911_v54 = vadd.f32 %v910_v53, %v2074_v22  ;;  %v974_v57 = vmax.f32 %v907_v50, 0.0 }
 0x197   : > { %v975_v56 = vmax.f32 %v909_v52, 0.0 }
 0x198   : > { %v976_v58 = vmax.f32 %v911_v54, 0.0 }
 0x199   : > { %v1007_v59 = vpack.c.bf16 %v975_v56, %v973_v55 }
 0x19a   : > { %v1008_v60 = vpack.c.bf16 %v976_v58, %v974_v57 }
 0x19c   : > { %1296 = vmatprep.mubr.bf16.mxu1 %v1008_v60 }
 0x19d   : > { %1297 = vmatmul.mubr.bf16.gmra.mrb[60].mxu1 %v1007_v59 }
 0x1f8   : > { %v1579_v61 = vpop.f32.mrb[0].mxu1 }
 0x1f9   : > { %v1580_v21 = vpop.f32.mrb[1].mxu1 }
 0x1fa   : > { %v1581_v63 = vadd.f32 %v1580_v21, %v1579_v61  ;;  %v1582_v0 = vpop.f32.mrb[2].mxu1 }
 0x1fb   : > { %v1583_v22 = vpop.f32.mrb[3].mxu1 }
 0x1fc   : > { %v1179_v1 = vadd.f32 %v1581_v63, %v2143_v62  ;;  %v1584_v2 = vadd.f32 %v1583_v22, %v1582_v0 }
 0x1fe   : > { %1305 = vst [vmem:[%s2150_s30] sm:$0xff] %v1179_v1  ;;  %v1182_v3 = vadd.f32 %v1584_v2, %v2143_v62 }
 0x200   : > { %1306 = vst [vmem:[%s2150_s30 + $0x8] sm:$0xff] %v1182_v3  ;;  %v1585_v4 = vpop.f32.mrb[4].mxu1 }
 0x201   : > { %v1586_v5 = vpop.f32.mrb[5].mxu1 }
 0x202   : > { %v1587_v6 = vadd.f32 %v1586_v5, %v1585_v4  ;;  %v1588_v7 = vpop.f32.mrb[6].mxu1 }
 0x203   : > { %v1589_v8 = vpop.f32.mrb[7].mxu1 }
 0x204   : > { %v1187_v9 = vadd.f32 %v1587_v6, %v2143_v62  ;;  %v1590_v10 = vadd.f32 %v1589_v8, %v1588_v7 }
 0x206   : > { %1307 = vst [vmem:[%s2150_s30 + $0x10] sm:$0xff] %v1187_v9  ;;  %v1190_v11 = vadd.f32 %v1590_v10, %v2143_v62 }
 0x208   : > { %1308 = vst [vmem:[%s2150_s30 + $0x18] sm:$0xff] %v1190_v11  ;;  %v1591_v12 = vpop.f32.mrb[8].mxu1 }
 0x209   : > { %v1592_v13 = vpop.f32.mrb[9].mxu1 }
 0x20a   : > { %v1593_v14 = vadd.f32 %v1592_v13, %v1591_v12  ;;  %v1594_v15 = vpop.f32.mrb[10].mxu1 }
 0x20b   : > { %v1595_v16 = vpop.f32.mrb[11].mxu1 }
 0x20c   : > { %v1195_v17 = vadd.f32 %v1593_v14, %v2143_v62  ;;  %v1596_v18 = vadd.f32 %v1595_v16, %v1594_v15 }
 0x20e   : > { %1309 = vst [vmem:[%s2150_s30 + $0x20] sm:$0xff] %v1195_v17  ;;  %v1198_v19 = vadd.f32 %v1596_v18, %v2143_v62 }
 0x210   : > { %1310 = vst [vmem:[%s2150_s30 + $0x28] sm:$0xff] %v1198_v19  ;;  %v1597_v20 = vpop.f32.mrb[12].mxu1 }
 0x211   : > { %v1598_v23 = vpop.f32.mrb[13].mxu1 }
 0x212   : > { %v1599_v24 = vadd.f32 %v1598_v23, %v1597_v20  ;;  %v1600_v25 = vpop.f32.mrb[14].mxu1 }
 0x213   : > { %v1601_v26 = vpop.f32.mrb[15].mxu1 }
 0x214   : > { %v1203_v27 = vadd.f32 %v1599_v24, %v2143_v62  ;;  %v1602_v28 = vadd.f32 %v1601_v26, %v1600_v25 }
 0x216   : > { %1311 = vst [vmem:[%s2150_s30 + $0x30] sm:$0xff] %v1203_v27  ;;  %v1206_v29 = vadd.f32 %v1602_v28, %v2143_v62 }
 0x218   : > { %1312 = vst [vmem:[%s2150_s30 + $0x38] sm:$0xff] %v1206_v29  ;;  %v1603_v30 = vpop.f32.mrb[16].mxu1 }
 0x219   : > { %v1604_v31 = vpop.f32.mrb[17].mxu1 }
 0x21a   : > { %v1605_v32 = vadd.f32 %v1604_v31, %v1603_v30  ;;  %v1606_v33 = vpop.f32.mrb[18].mxu1 }
 0x21b   : > { %v1607_v34 = vpop.f32.mrb[19].mxu1 }
 0x21c   : > { %v1211_v35 = vadd.f32 %v1605_v32, %v2143_v62  ;;  %v1608_v36 = vadd.f32 %v1607_v34, %v1606_v33 }
 0x21e   : > { %1313 = vst [vmem:[%s2150_s30 + $0x40] sm:$0xff] %v1211_v35  ;;  %v1214_v37 = vadd.f32 %v1608_v36, %v2143_v62 }
 0x220   : > { %1314 = vst [vmem:[%s2150_s30 + $0x48] sm:$0xff] %v1214_v37  ;;  %v1609_v38 = vpop.f32.mrb[20].mxu1 }
 0x221   : > { %v1610_v39 = vpop.f32.mrb[21].mxu1 }
 0x222   : > { %v1611_v40 = vadd.f32 %v1610_v39, %v1609_v38  ;;  %v1612_v41 = vpop.f32.mrb[22].mxu1 }
 0x223   : > { %v1613_v42 = vpop.f32.mrb[23].mxu1 }
 0x224   : > { %v1219_v43 = vadd.f32 %v1611_v40, %v2143_v62  ;;  %v1614_v44 = vadd.f32 %v1613_v42, %v1612_v41 }
 0x226   : > { %1315 = vst [vmem:[%s2150_s30 + $0x50] sm:$0xff] %v1219_v43  ;;  %v1222_v45 = vadd.f32 %v1614_v44, %v2143_v62 }
 0x228   : > { %1316 = vst [vmem:[%s2150_s30 + $0x58] sm:$0xff] %v1222_v45  ;;  %v1615_v46 = vpop.f32.mrb[24].mxu1 }
 0x229   : > { %v1616_v47 = vpop.f32.mrb[25].mxu1 }
 0x22a   : > { %v1617_v48 = vadd.f32 %v1616_v47, %v1615_v46  ;;  %v1618_v49 = vpop.f32.mrb[26].mxu1 }
 0x22b   : > { %v1619_v50 = vpop.f32.mrb[27].mxu1 }
 0x22c   : > { %v1227_v51 = vadd.f32 %v1617_v48, %v2143_v62  ;;  %v1620_v52 = vadd.f32 %v1619_v50, %v1618_v49 }
 0x22e   : > { %1317 = vst [vmem:[%s2150_s30 + $0x60] sm:$0xff] %v1227_v51  ;;  %v1230_v53 = vadd.f32 %v1620_v52, %v2143_v62 }
 0x230   : > { %1318 = vst [vmem:[%s2150_s30 + $0x68] sm:$0xff] %v1230_v53  ;;  %v1621_v54 = vpop.f32.mrb[28].mxu1 }
 0x231   : > { %v1622_v55 = vpop.f32.mrb[29].mxu1 }
 0x232   : > { %v1623_v56 = vadd.f32 %v1622_v55, %v1621_v54  ;;  %v1624_v57 = vpop.f32.mrb[30].mxu1 }
 0x233   : > { %v1625_v58 = vpop.f32.mrb[31].mxu1 }
 0x234   : > { %v1235_v59 = vadd.f32 %v1623_v56, %v2143_v62  ;;  %v1626_v60 = vadd.f32 %v1625_v58, %v1624_v57 }
 0x236   : > { %1319 = vst [vmem:[%s2150_s30 + $0x70] sm:$0xff] %v1235_v59  ;;  %v1238_v61 = vadd.f32 %v1626_v60, %v2143_v62 }
 0x238   : > { %1320 = vst [vmem:[%s2150_s30 + $0x78] sm:$0xff] %v1238_v61  ;;  %v1627_v21 = vpop.f32.mrb[32].mxu1 }
 0x239   : > { %v1628_v63 = vpop.f32.mrb[33].mxu1 }
 0x23a   : > { %v1629_v0 = vadd.f32 %v1628_v63, %v1627_v21  ;;  %v1630_v22 = vpop.f32.mrb[34].mxu1 }
 0x23b   : > { %v1631_v1 = vpop.f32.mrb[35].mxu1 }
 0x23c   : > { %v1243_v2 = vadd.f32 %v1629_v0, %v2143_v62  ;;  %v1632_v3 = vadd.f32 %v1631_v1, %v1630_v22 }
 0x23e   : > { %1321 = vst [vmem:[%s2150_s30 + $0x80] sm:$0xff] %v1243_v2  ;;  %v1246_v4 = vadd.f32 %v1632_v3, %v2143_v62 }
 0x240   : > { %1322 = vst [vmem:[%s2150_s30 + $0x88] sm:$0xff] %v1246_v4  ;;  %v1633_v5 = vpop.f32.mrb[36].mxu1 }
 0x241   : > { %v1634_v6 = vpop.f32.mrb[37].mxu1 }
 0x242   : > { %v1635_v7 = vadd.f32 %v1634_v6, %v1633_v5  ;;  %v1636_v8 = vpop.f32.mrb[38].mxu1 }
 0x243   : > { %v1637_v9 = vpop.f32.mrb[39].mxu1 }
 0x244   : > { %v1251_v10 = vadd.f32 %v1635_v7, %v2143_v62  ;;  %v1638_v11 = vadd.f32 %v1637_v9, %v1636_v8 }
 0x246   : > { %1323 = vst [vmem:[%s2150_s30 + $0x90] sm:$0xff] %v1251_v10  ;;  %v1254_v12 = vadd.f32 %v1638_v11, %v2143_v62 }
 0x248   : > { %1324 = vst [vmem:[%s2150_s30 + $0x98] sm:$0xff] %v1254_v12  ;;  %v1639_v13 = vpop.f32.mrb[40].mxu1 }
 0x249   : > { %v1640_v14 = vpop.f32.mrb[41].mxu1 }
 0x24a   : > { %v1641_v15 = vadd.f32 %v1640_v14, %v1639_v13  ;;  %v1642_v16 = vpop.f32.mrb[42].mxu1 }
 0x24b   : > { %v1643_v17 = vpop.f32.mrb[43].mxu1 }
 0x24c   : > { %v1259_v18 = vadd.f32 %v1641_v15, %v2143_v62  ;;  %v1644_v19 = vadd.f32 %v1643_v17, %v1642_v16 }
 0x24e   : > { %1325 = vst [vmem:[%s2150_s30 + $0xa0] sm:$0xff] %v1259_v18  ;;  %v1262_v20 = vadd.f32 %v1644_v19, %v2143_v62 }
 0x250   : > { %1326 = vst [vmem:[%s2150_s30 + $0xa8] sm:$0xff] %v1262_v20  ;;  %v1645_v23 = vpop.f32.mrb[44].mxu1 }
 0x251   : > { %v1646_v24 = vpop.f32.mrb[45].mxu1 }
 0x252   : > { %v1647_v25 = vadd.f32 %v1646_v24, %v1645_v23  ;;  %v1648_v26 = vpop.f32.mrb[46].mxu1 }
 0x253   : > { %v1649_v27 = vpop.f32.mrb[47].mxu1 }
 0x254   : > { %v1267_v28 = vadd.f32 %v1647_v25, %v2143_v62  ;;  %v1650_v29 = vadd.f32 %v1649_v27, %v1648_v26 }
 0x256   : > { %1327 = vst [vmem:[%s2150_s30 + $0xb0] sm:$0xff] %v1267_v28  ;;  %v1270_v30 = vadd.f32 %v1650_v29, %v2143_v62 }
 0x258   : > { %1328 = vst [vmem:[%s2150_s30 + $0xb8] sm:$0xff] %v1270_v30  ;;  %v1651_v31 = vpop.f32.mrb[48].mxu1 }
 0x259   : > { %v1652_v32 = vpop.f32.mrb[49].mxu1 }
 0x25a   : > { %v1653_v33 = vadd.f32 %v1652_v32, %v1651_v31  ;;  %v1654_v34 = vpop.f32.mrb[50].mxu1 }
 0x25b   : > { %v1655_v35 = vpop.f32.mrb[51].mxu1 }
 0x25c   : > { %v1275_v36 = vadd.f32 %v1653_v33, %v2143_v62  ;;  %v1656_v37 = vadd.f32 %v1655_v35, %v1654_v34 }
 0x25e   : > { %1329 = vst [vmem:[%s2150_s30 + $0xc0] sm:$0xff] %v1275_v36  ;;  %v1278_v38 = vadd.f32 %v1656_v37, %v2143_v62 }
 0x260   : > { %1330 = vst [vmem:[%s2150_s30 + $0xc8] sm:$0xff] %v1278_v38  ;;  %v1657_v39 = vpop.f32.mrb[52].mxu1 }
 0x261   : > { %v1658_v40 = vpop.f32.mrb[53].mxu1 }
 0x262   : > { %v1659_v41 = vadd.f32 %v1658_v40, %v1657_v39  ;;  %v1660_v42 = vpop.f32.mrb[54].mxu1 }
 0x263   : > { %v1661_v43 = vpop.f32.mrb[55].mxu1 }
 0x264   : > { %v1283_v44 = vadd.f32 %v1659_v41, %v2143_v62  ;;  %v1662_v45 = vadd.f32 %v1661_v43, %v1660_v42 }
 0x266   : > { %1331 = vst [vmem:[%s2150_s30 + $0xd0] sm:$0xff] %v1283_v44  ;;  %v1286_v46 = vadd.f32 %v1662_v45, %v2143_v62 }
 0x268   : > { %1332 = vst [vmem:[%s2150_s30 + $0xd8] sm:$0xff] %v1286_v46  ;;  %v1663_v47 = vpop.f32.mrb[56].mxu1 }
 0x269   : > { %v1664_v48 = vpop.f32.mrb[57].mxu1 }
 0x26a   : > { %v1665_v49 = vadd.f32 %v1664_v48, %v1663_v47  ;;  %v1666_v50 = vpop.f32.mrb[58].mxu1 }
 0x26b   : > { %v1667_v51 = vpop.f32.mrb[59].mxu1 }
 0x26c   : > { %v1291_v52 = vadd.f32 %v1665_v49, %v2143_v62  ;;  %v1668_v53 = vadd.f32 %v1667_v51, %v1666_v50 }
 0x26e   : > { %1333 = vst [vmem:[%s2150_s30 + $0xe0] sm:$0xff] %v1291_v52  ;;  %v1294_v54 = vadd.f32 %v1668_v53, %v2143_v62 }
 0x270   : > { %1334 = vst [vmem:[%s2150_s30 + $0xe8] sm:$0xff] %v1294_v54  ;;  %v1669_v55 = vpop.f32.mrb[60].mxu1 }
 0x271   : > { %v1670_v56 = vpop.f32.mrb[61].mxu1 }
 0x272   : > { %v1671_v57 = vadd.f32 %v1670_v56, %v1669_v55  ;;  %v1672_v58 = vpop.f32.mrb[62].mxu1 }
 0x273   : > { %v1673_v59 = vpop.f32.mrb[63].mxu1 }
 0x274   : > { %v1299_v60 = vadd.f32 %v1671_v57, %v2143_v62  ;;  %v1674_v61 = vadd.f32 %v1673_v59, %v1672_v58 }
 0x276   : > { %1335 = vst [vmem:[%s2150_s30 + $0xf0] sm:$0xff] %v1299_v60  ;;  %v1302_v21 = vadd.f32 %v1674_v61, %v2143_v62 }
 0x278   : > { %1336 = vst [vmem:[%s2150_s30 + $0xf8] sm:$0xff] %v1302_v21 }
 0x279 PF: > { %s15_s20 = sadd.s32 1, %s1833_s20   ;;  %s2231_s18 = smov %s1829_s19 }
 0x27a   : > { %p12_p5 = scmp.ge.s32.totalorder %s15_s20, 4   ;;  %s2232_s19 = smov %s2234_s21 }
 0x27c   :  { %14 = sbr.rel (!%p12_p5) target bundleno = 2 (0x2), region = 76 }

</bundles_post_ra>
